<compile_context>
chip_gen: v7x
topology: tpu7x:2x2x1
jax: 0.10.0
libtpu: 0.0.40
codegen_flags: <defaults>
</compile_context>

<pallas_src>
import jax
import jax.numpy as jnp
from jax.experimental import pallas as pl
from jax.experimental.pallas import tpu as pltpu

C = 3   # in/out channels fixed by the module
K = 3   # kernel size


def _ceil_div(a, b):
    return -(-a // b)


def _round_up(a, b):
    return _ceil_div(a, b) * b


def _conv3x3(src_ref, w_ref, b_ref, H, W):
    """3x3 'SAME' conv over a (Nb, C, H+1, W+1) VMEM scratch whose last row/col are zero.

    Data sits at offset (0, 0); the shift for tap (kh, kw) is a circular pltpu.roll whose
    wrap-around lands exactly on the zero pad row/col, so every read is an aligned
    [0:H, 0:W] slice.  Returns C f32 accumulators of shape (Nb, H, W), bias included,
    no activation.  Each shifted view is computed once and shared by all 3 output
    channels, whose accumulators advance round-robin (3 independent add chains).
    """
    Hp1, Wp1 = H + 1, W + 1
    accs = [None] * C
    for ci in range(C):
        plane = src_ref[:, ci, :, :]                          # (Nb, H+1, W+1), loaded once
        for kh in range(K):
            dh = kh - 1                                       # -1, 0, +1
            rows = plane if dh == 0 else pltpu.roll(plane, (-dh) % Hp1, axis=1)
            for kw in range(K):
                dw = kw - 1
                view = rows if dw == 0 else pltpu.roll(rows, (-dw) % Wp1, axis=2)
                v = view[:, 0:H, 0:W]                         # aligned slice
                for co in range(C):
                    w = w_ref[((co * C + ci) * K + kh) * K + kw]
                    t = w * v
                    accs[co] = t if accs[co] is None else accs[co] + t
    return [accs[co] + b_ref[co] for co in range(C)]


def residual_block_kernel(x_ref, w1_ref, b1_ref, w2_ref, b2_ref,
                          out_ref, xpad_ref, mid_ref):
    """One block of Nb images per grid step (NCHW layout, W in lanes, H in sublanes).

    x_ref    : (Nb, C, H, W)       VMEM  input block
    w*_ref   : (C*C*K*K,)          SMEM  flattened conv weights, index (co, ci, kh, kw)
    b*_ref   : (C,)                SMEM  conv biases
    out_ref  : (Nb, C, H, W)       VMEM  output block
    xpad_ref : (Nb, C, H+1, W+1)   VMEM  scratch: input + zero bottom row / right col
    mid_ref  : (Nb, C, H+1, W+1)   VMEM  scratch: conv1 activation, same padding
    """
    Nb, Cc, Hp1, Wp1 = xpad_ref.shape
    H, W = Hp1 - 1, Wp1 - 1

    # Zero only the single pad row / pad column of both scratches (interior is fully
    # overwritten every step).  Done unconditionally so it stays correct when the
    # "parallel" batch axis is split across TensorCores, each owning its own scratch.
    zrow = jnp.zeros((Nb, Cc, 1, Wp1), jnp.float32)
    zcol = jnp.zeros((Nb, Cc, Hp1, 1), jnp.float32)
    for ref in (xpad_ref, mid_ref):
        ref[:, :, H:H + 1, :] = zrow
        ref[:, :, :, W:W + 1] = zcol

    # Stage the input block at offset (0, 0) of the padded scratch (aligned store).
    # The same staged data is re-read for the residual add below — no separate x copy.
    xpad_ref[:, :, 0:H, 0:W] = x_ref[...].astype(jnp.float32)

    # ---- conv1 + bias + ReLU -> padded intermediate (aligned interior store) ----
    a1 = _conv3x3(xpad_ref, w1_ref, b1_ref, H, W)
    for co in range(C):
        mid_ref[:, co, 0:H, 0:W] = jnp.maximum(a1[co], 0.0)

    # ---- conv2 + bias + ReLU + residual add ----
    a2 = _conv3x3(mid_ref, w2_ref, b2_ref, H, W)
    for co in range(C):
        out_ref[:, co, :, :] = (jnp.maximum(a2[co], 0.0)
                                + xpad_ref[:, co, 0:H, 0:W]).astype(out_ref.dtype)


def _per_image_vmem_bytes(H, W):
    """f32 VMEM footprint per image per grid step, with (sublane, lane) tile rounding."""
    def tiled(h, w):
        return C * _round_up(h, 8) * _round_up(w, 128) * 4
    io = 2 * 2 * tiled(H, W)            # x + out blocks, double-buffered by the pipeline
    scratch = 2 * tiled(H + 1, W + 1)   # xpad + mid scratches (single-buffered)
    return io + scratch


def simple_residual_block(x, w1, b1, w2, b2, *, vmem_budget_bytes=16 << 20):
    """x: (N, 3, H, W); w*: (3, 3, 3, 3); b*: (3,). Returns (N, 3, H, W), dtype of x."""
    N, Cc, H, W = x.shape
    assert Cc == C

    per_img = _per_image_vmem_bytes(H, W)
    # TODO(synk): add H-strip halo tiling for very large images where a single image's padded
    # working set exceeds the per-step VMEM budget (not needed at these shapes).
    nb = max(1, min(N, max(1, vmem_budget_bytes // per_img), 8))
    if N >= 2:
        nb = min(nb, _ceil_div(N, 2))   # guarantee >= 2 grid steps so both v7x TCs get work
    nb = int(nb)

    Npad = _round_up(N, nb)
    xp = jnp.pad(x, ((0, Npad - N), (0, 0), (0, 0), (0, 0))) if Npad != N else x

    w1f = w1.reshape(-1).astype(jnp.float32)
    w2f = w2.reshape(-1).astype(jnp.float32)
    b1f = b1.astype(jnp.float32)
    b2f = b2.astype(jnp.float32)

    smem_spec = pl.BlockSpec(memory_space=pltpu.MemorySpace.SMEM)
    blk_spec = pl.BlockSpec((nb, C, H, W), lambda b: (b, 0, 0, 0))

    footprint = per_img * nb
    vmem_limit = int(min(48 << 20, max(32 << 20, 2 * footprint + (8 << 20))))

    out = pl.pallas_call(
        residual_block_kernel,
        out_shape=jax.ShapeDtypeStruct((Npad, C, H, W), x.dtype),
        grid_spec=pltpu.PrefetchScalarGridSpec(
            num_scalar_prefetch=0,
            grid=(Npad // nb,),
            in_specs=[
                blk_spec,     # x block (W in lanes, H in sublanes, N/C untiled)
                smem_spec,    # w1 (flattened)
                smem_spec,    # b1
                smem_spec,    # w2 (flattened)
                smem_spec,    # b2
            ],
            out_specs=blk_spec,
            scratch_shapes=[
                pltpu.VMEM((nb, C, H + 1, W + 1), jnp.float32),   # padded input
                pltpu.VMEM((nb, C, H + 1, W + 1), jnp.float32),   # padded conv1 act
            ],
        ),
        compiler_params=pltpu.CompilerParams(
            dimension_semantics=("parallel",),
            vmem_limit_bytes=vmem_limit,
        ),
    )(xp, w1f, b1f, w2f, b2f)

    return out[:N]


def ref_forward(x, w1, b1, w2, b2):
    """Pure-JAX reference matching the PyTorch forward (ReLU before residual add)."""
    dn = ('NCHW', 'OIHW', 'NCHW')
    y = jax.lax.conv_general_dilated(x, w1, (1, 1), 'SAME', dimension_numbers=dn,
                                     precision=jax.lax.Precision.HIGHEST)
    y = jnp.maximum(y + b1.reshape(1, -1, 1, 1), 0.0)
    y = jax.lax.conv_general_dilated(y, w2, (1, 1), 'SAME', dimension_numbers=dn,
                                     precision=jax.lax.Precision.HIGHEST)
    return jnp.maximum(y + b2.reshape(1, -1, 1, 1), 0.0) + x


if __name__ == "__main__":
    key = jax.random.PRNGKey(0)
    kx, kw1, kb1, kw2, kb2 = jax.random.split(key, 5)

    N, H, W = 2, 16, 16
    x = jax.random.normal(kx, (N, C, H, W), dtype=jnp.float32)

    # Deterministic PyTorch-style uniform(-1/sqrt(fan_in), 1/sqrt(fan_in)) init.
    bound = 1.0 / jnp.sqrt(jnp.float32(C * K * K))
    w1 = jax.random.uniform(kw1, (C, C, K, K), jnp.float32, -bound, bound)
    b1 = jax.random.uniform(kb1, (C,), jnp.float32, -bound, bound)
    w2 = jax.random.uniform(kw2, (C, C, K, K), jnp.float32, -bound, bound)
    b2 = jax.random.uniform(kb2, (C,), jnp.float32, -bound, bound)

    out = simple_residual_block(x, w1, b1, w2, b2)
    out = jax.block_until_ready(out)

    ref = ref_forward(x, w1, b1, w2, b2)
    assert out.shape == (N, C, H, W)
    assert jnp.allclose(out, ref, atol=1e-4, rtol=1e-4), "mismatch vs JAX reference"

    print("KERNEL_OK")
</pallas_src>

<mosaic_0001>
module attributes {stable_mosaic.version = 11 : i64} {
  func.func @residual_block_kernel(%arg0: i32, %arg1: memref<1x3x16x16xf32, #tpu.memory_space<vmem>>, %arg2: memref<81xf32, #tpu.memory_space<smem>>, %arg3: memref<3xf32, #tpu.memory_space<smem>>, %arg4: memref<81xf32, #tpu.memory_space<smem>>, %arg5: memref<3xf32, #tpu.memory_space<smem>>, %arg6: memref<1x3x16x16xf32, #tpu.memory_space<vmem>>, %arg7: memref<1x3x17x17xf32, #tpu.memory_space<vmem>>, %arg8: memref<1x3x17x17xf32, #tpu.memory_space<vmem>>) attributes {dimension_semantics = [#tpu.dimension_semantics<parallel>], iteration_bounds = array<i64: 2>, scalar_prefetch = 0 : i64, scratch_operands = 2 : i64, tpu.core_type = #tpu.core_type<tc>, window_params = [{transform_indices = @transform_0, window_bounds = array<i64: 1, 3, 16, 16>}, {transform_indices = @transform_1, window_bounds = array<i64: 81>}, {transform_indices = @transform_2, window_bounds = array<i64: 3>}, {transform_indices = @transform_3, window_bounds = array<i64: 81>}, {transform_indices = @transform_4, window_bounds = array<i64: 3>}, {transform_indices = @transform_5, window_bounds = array<i64: 1, 3, 16, 16>}]} {
    %cst = arith.constant 0.000000e+00 : f32
    %0 = vector.broadcast %cst : f32 to vector<1x3x1x17xf32>
    %cst_0 = arith.constant 0.000000e+00 : f32
    %1 = vector.broadcast %cst_0 : f32 to vector<1x3x17x1xf32>
    %c0 = arith.constant 0 : index
    %c0_1 = arith.constant 0 : index
    %c16 = arith.constant 16 : index
    %c0_2 = arith.constant 0 : index
    %2 = vector.load %arg7[%c0, %c0_1, %c16, %c0_2] : memref<1x3x17x17xf32, #tpu.memory_space<vmem>>, vector<1x3x1x17xf32>
    tpu.vector_store %arg7[%c0, %c0_1, %c16, %c0_2], %0 {strides = array<i32>} : memref<1x3x17x17xf32, #tpu.memory_space<vmem>>, vector<1x3x1x17xf32>,
    %c0_3 = arith.constant 0 : index
    %c0_4 = arith.constant 0 : index
    %c0_5 = arith.constant 0 : index
    %c16_6 = arith.constant 16 : index
    %3 = vector.load %arg7[%c0_3, %c0_4, %c0_5, %c16_6] : memref<1x3x17x17xf32, #tpu.memory_space<vmem>>, vector<1x3x17x1xf32>
    tpu.vector_store %arg7[%c0_3, %c0_4, %c0_5, %c16_6], %1 {strides = array<i32>} : memref<1x3x17x17xf32, #tpu.memory_space<vmem>>, vector<1x3x17x1xf32>,
    %c0_7 = arith.constant 0 : index
    %c0_8 = arith.constant 0 : index
    %c16_9 = arith.constant 16 : index
    %c0_10 = arith.constant 0 : index
    %4 = vector.load %arg8[%c0_7, %c0_8, %c16_9, %c0_10] : memref<1x3x17x17xf32, #tpu.memory_space<vmem>>, vector<1x3x1x17xf32>
    tpu.vector_store %arg8[%c0_7, %c0_8, %c16_9, %c0_10], %0 {strides = array<i32>} : memref<1x3x17x17xf32, #tpu.memory_space<vmem>>, vector<1x3x1x17xf32>,
    %c0_11 = arith.constant 0 : index
    %c0_12 = arith.constant 0 : index
    %c0_13 = arith.constant 0 : index
    %c16_14 = arith.constant 16 : index
    %5 = vector.load %arg8[%c0_11, %c0_12, %c0_13, %c16_14] : memref<1x3x17x17xf32, #tpu.memory_space<vmem>>, vector<1x3x17x1xf32>
    tpu.vector_store %arg8[%c0_11, %c0_12, %c0_13, %c16_14], %1 {strides = array<i32>} : memref<1x3x17x17xf32, #tpu.memory_space<vmem>>, vector<1x3x17x1xf32>,
    %c0_15 = arith.constant 0 : index
    %c0_16 = arith.constant 0 : index
    %c0_17 = arith.constant 0 : index
    %c0_18 = arith.constant 0 : index
    %6 = vector.load %arg1[%c0_15, %c0_16, %c0_17, %c0_18] : memref<1x3x16x16xf32, #tpu.memory_space<vmem>>, vector<1x3x16x16xf32>
    %c0_19 = arith.constant 0 : index
    %c0_20 = arith.constant 0 : index
    %c0_21 = arith.constant 0 : index
    %c0_22 = arith.constant 0 : index
    %7 = vector.load %arg7[%c0_19, %c0_20, %c0_21, %c0_22] : memref<1x3x17x17xf32, #tpu.memory_space<vmem>>, vector<1x3x16x16xf32>
    tpu.vector_store %arg7[%c0_19, %c0_20, %c0_21, %c0_22], %6 {strides = array<i32>} : memref<1x3x17x17xf32, #tpu.memory_space<vmem>>, vector<1x3x16x16xf32>,
    %c0_23 = arith.constant 0 : index
    %c0_24 = arith.constant 0 : index
    %c0_25 = arith.constant 0 : index
    %c0_26 = arith.constant 0 : index
    %8 = vector.load %arg7[%c0_23, %c0_24, %c0_25, %c0_26] : memref<1x3x17x17xf32, #tpu.memory_space<vmem>>, vector<1x1x17x17xf32>
    %9 = vector.shape_cast %8 : vector<1x1x17x17xf32> to vector<1x17x17xf32>
    %c1_i32 = arith.constant 1 : i32
    %10 = tpu.dynamic_rotate %9 by %c1_i32 dim 1 : vector<1x17x17xf32>, i32 -> vector<1x17x17xf32>
    %c1_i32_27 = arith.constant 1 : i32
    %11 = tpu.dynamic_rotate %10 by %c1_i32_27 dim 2 : vector<1x17x17xf32>, i32 -> vector<1x17x17xf32>
    %12 = vector.extract_strided_slice %11 {offsets = [0, 0, 0], sizes = [1, 16, 16], strides = [1, 1, 1]} : vector<1x17x17xf32> to vector<1x16x16xf32>
    %c0_28 = arith.constant 0 : index
    %13 = memref.load %arg2[%c0_28] : memref<81xf32, #tpu.memory_space<smem>>
    %14 = vector.broadcast %13 : f32 to vector<1x16x16xf32>
    %15 = arith.mulf %14, %12 : vector<1x16x16xf32>
    %c27 = arith.constant 27 : index
    %16 = memref.load %arg2[%c27] : memref<81xf32, #tpu.memory_space<smem>>
    %17 = vector.broadcast %16 : f32 to vector<1x16x16xf32>
    %18 = arith.mulf %17, %12 : vector<1x16x16xf32>
    %c54 = arith.constant 54 : index
    %19 = memref.load %arg2[%c54] : memref<81xf32, #tpu.memory_space<smem>>
    %20 = vector.broadcast %19 : f32 to vector<1x16x16xf32>
    %21 = arith.mulf %20, %12 : vector<1x16x16xf32>
    %22 = vector.extract_strided_slice %10 {offsets = [0, 0, 0], sizes = [1, 16, 16], strides = [1, 1, 1]} : vector<1x17x17xf32> to vector<1x16x16xf32>
    %c1 = arith.constant 1 : index
    %23 = memref.load %arg2[%c1] : memref<81xf32, #tpu.memory_space<smem>>
    %24 = vector.broadcast %23 : f32 to vector<1x16x16xf32>
    %25 = arith.mulf %24, %22 : vector<1x16x16xf32>
    %26 = arith.addf %15, %25 : vector<1x16x16xf32>
    %c28 = arith.constant 28 : index
    %27 = memref.load %arg2[%c28] : memref<81xf32, #tpu.memory_space<smem>>
    %28 = vector.broadcast %27 : f32 to vector<1x16x16xf32>
    %29 = arith.mulf %28, %22 : vector<1x16x16xf32>
    %30 = arith.addf %18, %29 : vector<1x16x16xf32>
    %c55 = arith.constant 55 : index
    %31 = memref.load %arg2[%c55] : memref<81xf32, #tpu.memory_space<smem>>
    %32 = vector.broadcast %31 : f32 to vector<1x16x16xf32>
    %33 = arith.mulf %32, %22 : vector<1x16x16xf32>
    %34 = arith.addf %21, %33 : vector<1x16x16xf32>
    %c16_i32 = arith.constant 16 : i32
    %35 = tpu.dynamic_rotate %10 by %c16_i32 dim 2 : vector<1x17x17xf32>, i32 -> vector<1x17x17xf32>
    %36 = vector.extract_strided_slice %35 {offsets = [0, 0, 0], sizes = [1, 16, 16], strides = [1, 1, 1]} : vector<1x17x17xf32> to vector<1x16x16xf32>
    %c2 = arith.constant 2 : index
    %37 = memref.load %arg2[%c2] : memref<81xf32, #tpu.memory_space<smem>>
    %38 = vector.broadcast %37 : f32 to vector<1x16x16xf32>
    %39 = arith.mulf %38, %36 : vector<1x16x16xf32>
    %40 = arith.addf %26, %39 : vector<1x16x16xf32>
    %c29 = arith.constant 29 : index
    %41 = memref.load %arg2[%c29] : memref<81xf32, #tpu.memory_space<smem>>
    %42 = vector.broadcast %41 : f32 to vector<1x16x16xf32>
    %43 = arith.mulf %42, %36 : vector<1x16x16xf32>
    %44 = arith.addf %30, %43 : vector<1x16x16xf32>
    %c56 = arith.constant 56 : index
    %45 = memref.load %arg2[%c56] : memref<81xf32, #tpu.memory_space<smem>>
    %46 = vector.broadcast %45 : f32 to vector<1x16x16xf32>
    %47 = arith.mulf %46, %36 : vector<1x16x16xf32>
    %48 = arith.addf %34, %47 : vector<1x16x16xf32>
    %c1_i32_29 = arith.constant 1 : i32
    %49 = tpu.dynamic_rotate %9 by %c1_i32_29 dim 2 : vector<1x17x17xf32>, i32 -> vector<1x17x17xf32>
    %50 = vector.extract_strided_slice %49 {offsets = [0, 0, 0], sizes = [1, 16, 16], strides = [1, 1, 1]} : vector<1x17x17xf32> to vector<1x16x16xf32>
    %c3 = arith.constant 3 : index
    %51 = memref.load %arg2[%c3] : memref<81xf32, #tpu.memory_space<smem>>
    %52 = vector.broadcast %51 : f32 to vector<1x16x16xf32>
    %53 = arith.mulf %52, %50 : vector<1x16x16xf32>
    %54 = arith.addf %40, %53 : vector<1x16x16xf32>
    %c30 = arith.constant 30 : index
    %55 = memref.load %arg2[%c30] : memref<81xf32, #tpu.memory_space<smem>>
    %56 = vector.broadcast %55 : f32 to vector<1x16x16xf32>
    %57 = arith.mulf %56, %50 : vector<1x16x16xf32>
    %58 = arith.addf %44, %57 : vector<1x16x16xf32>
    %c57 = arith.constant 57 : index
    %59 = memref.load %arg2[%c57] : memref<81xf32, #tpu.memory_space<smem>>
    %60 = vector.broadcast %59 : f32 to vector<1x16x16xf32>
    %61 = arith.mulf %60, %50 : vector<1x16x16xf32>
    %62 = arith.addf %48, %61 : vector<1x16x16xf32>
    %63 = vector.extract_strided_slice %9 {offsets = [0, 0, 0], sizes = [1, 16, 16], strides = [1, 1, 1]} : vector<1x17x17xf32> to vector<1x16x16xf32>
    %c4 = arith.constant 4 : index
    %64 = memref.load %arg2[%c4] : memref<81xf32, #tpu.memory_space<smem>>
    %65 = vector.broadcast %64 : f32 to vector<1x16x16xf32>
    %66 = arith.mulf %65, %63 : vector<1x16x16xf32>
    %67 = arith.addf %54, %66 : vector<1x16x16xf32>
    %c31 = arith.constant 31 : index
    %68 = memref.load %arg2[%c31] : memref<81xf32, #tpu.memory_space<smem>>
    %69 = vector.broadcast %68 : f32 to vector<1x16x16xf32>
    %70 = arith.mulf %69, %63 : vector<1x16x16xf32>
    %71 = arith.addf %58, %70 : vector<1x16x16xf32>
    %c58 = arith.constant 58 : index
    %72 = memref.load %arg2[%c58] : memref<81xf32, #tpu.memory_space<smem>>
    %73 = vector.broadcast %72 : f32 to vector<1x16x16xf32>
    %74 = arith.mulf %73, %63 : vector<1x16x16xf32>
    %75 = arith.addf %62, %74 : vector<1x16x16xf32>
    %c16_i32_30 = arith.constant 16 : i32
    %76 = tpu.dynamic_rotate %9 by %c16_i32_30 dim 2 : vector<1x17x17xf32>, i32 -> vector<1x17x17xf32>
    %77 = vector.extract_strided_slice %76 {offsets = [0, 0, 0], sizes = [1, 16, 16], strides = [1, 1, 1]} : vector<1x17x17xf32> to vector<1x16x16xf32>
    %c5 = arith.constant 5 : index
    %78 = memref.load %arg2[%c5] : memref<81xf32, #tpu.memory_space<smem>>
    %79 = vector.broadcast %78 : f32 to vector<1x16x16xf32>
    %80 = arith.mulf %79, %77 : vector<1x16x16xf32>
    %81 = arith.addf %67, %80 : vector<1x16x16xf32>
    %c32 = arith.constant 32 : index
    %82 = memref.load %arg2[%c32] : memref<81xf32, #tpu.memory_space<smem>>
    %83 = vector.broadcast %82 : f32 to vector<1x16x16xf32>
    %84 = arith.mulf %83, %77 : vector<1x16x16xf32>
    %85 = arith.addf %71, %84 : vector<1x16x16xf32>
    %c59 = arith.constant 59 : index
    %86 = memref.load %arg2[%c59] : memref<81xf32, #tpu.memory_space<smem>>
    %87 = vector.broadcast %86 : f32 to vector<1x16x16xf32>
    %88 = arith.mulf %87, %77 : vector<1x16x16xf32>
    %89 = arith.addf %75, %88 : vector<1x16x16xf32>
    %c16_i32_31 = arith.constant 16 : i32
    %90 = tpu.dynamic_rotate %9 by %c16_i32_31 dim 1 : vector<1x17x17xf32>, i32 -> vector<1x17x17xf32>
    %c1_i32_32 = arith.constant 1 : i32
    %91 = tpu.dynamic_rotate %90 by %c1_i32_32 dim 2 : vector<1x17x17xf32>, i32 -> vector<1x17x17xf32>
    %92 = vector.extract_strided_slice %91 {offsets = [0, 0, 0], sizes = [1, 16, 16], strides = [1, 1, 1]} : vector<1x17x17xf32> to vector<1x16x16xf32>
    %c6 = arith.constant 6 : index
    %93 = memref.load %arg2[%c6] : memref<81xf32, #tpu.memory_space<smem>>
    %94 = vector.broadcast %93 : f32 to vector<1x16x16xf32>
    %95 = arith.mulf %94, %92 : vector<1x16x16xf32>
    %96 = arith.addf %81, %95 : vector<1x16x16xf32>
    %c33 = arith.constant 33 : index
    %97 = memref.load %arg2[%c33] : memref<81xf32, #tpu.memory_space<smem>>
    %98 = vector.broadcast %97 : f32 to vector<1x16x16xf32>
    %99 = arith.mulf %98, %92 : vector<1x16x16xf32>
    %100 = arith.addf %85, %99 : vector<1x16x16xf32>
    %c60 = arith.constant 60 : index
    %101 = memref.load %arg2[%c60] : memref<81xf32, #tpu.memory_space<smem>>
    %102 = vector.broadcast %101 : f32 to vector<1x16x16xf32>
    %103 = arith.mulf %102, %92 : vector<1x16x16xf32>
    %104 = arith.addf %89, %103 : vector<1x16x16xf32>
    %105 = vector.extract_strided_slice %90 {offsets = [0, 0, 0], sizes = [1, 16, 16], strides = [1, 1, 1]} : vector<1x17x17xf32> to vector<1x16x16xf32>
    %c7 = arith.constant 7 : index
    %106 = memref.load %arg2[%c7] : memref<81xf32, #tpu.memory_space<smem>>
    %107 = vector.broadcast %106 : f32 to vector<1x16x16xf32>
    %108 = arith.mulf %107, %105 : vector<1x16x16xf32>
    %109 = arith.addf %96, %108 : vector<1x16x16xf32>
    %c34 = arith.constant 34 : index
    %110 = memref.load %arg2[%c34] : memref<81xf32, #tpu.memory_space<smem>>
    %111 = vector.broadcast %110 : f32 to vector<1x16x16xf32>
    %112 = arith.mulf %111, %105 : vector<1x16x16xf32>
    %113 = arith.addf %100, %112 : vector<1x16x16xf32>
    %c61 = arith.constant 61 : index
    %114 = memref.load %arg2[%c61] : memref<81xf32, #tpu.memory_space<smem>>
    %115 = vector.broadcast %114 : f32 to vector<1x16x16xf32>
    %116 = arith.mulf %115, %105 : vector<1x16x16xf32>
    %117 = arith.addf %104, %116 : vector<1x16x16xf32>
    %c16_i32_33 = arith.constant 16 : i32
    %118 = tpu.dynamic_rotate %90 by %c16_i32_33 dim 2 : vector<1x17x17xf32>, i32 -> vector<1x17x17xf32>
    %119 = vector.extract_strided_slice %118 {offsets = [0, 0, 0], sizes = [1, 16, 16], strides = [1, 1, 1]} : vector<1x17x17xf32> to vector<1x16x16xf32>
    %c8 = arith.constant 8 : index
    %120 = memref.load %arg2[%c8] : memref<81xf32, #tpu.memory_space<smem>>
    %121 = vector.broadcast %120 : f32 to vector<1x16x16xf32>
    %122 = arith.mulf %121, %119 : vector<1x16x16xf32>
    %123 = arith.addf %109, %122 : vector<1x16x16xf32>
    %c35 = arith.constant 35 : index
    %124 = memref.load %arg2[%c35] : memref<81xf32, #tpu.memory_space<smem>>
    %125 = vector.broadcast %124 : f32 to vector<1x16x16xf32>
    %126 = arith.mulf %125, %119 : vector<1x16x16xf32>
    %127 = arith.addf %113, %126 : vector<1x16x16xf32>
    %c62 = arith.constant 62 : index
    %128 = memref.load %arg2[%c62] : memref<81xf32, #tpu.memory_space<smem>>
    %129 = vector.broadcast %128 : f32 to vector<1x16x16xf32>
    %130 = arith.mulf %129, %119 : vector<1x16x16xf32>
    %131 = arith.addf %117, %130 : vector<1x16x16xf32>
    %c0_34 = arith.constant 0 : index
    %c1_35 = arith.constant 1 : index
    %c0_36 = arith.constant 0 : index
    %c0_37 = arith.constant 0 : index
    %132 = vector.load %arg7[%c0_34, %c1_35, %c0_36, %c0_37] : memref<1x3x17x17xf32, #tpu.memory_space<vmem>>, vector<1x1x17x17xf32>
    %133 = vector.shape_cast %132 : vector<1x1x17x17xf32> to vector<1x17x17xf32>
    %c1_i32_38 = arith.constant 1 : i32
    %134 = tpu.dynamic_rotate %133 by %c1_i32_38 dim 1 : vector<1x17x17xf32>, i32 -> vector<1x17x17xf32>
    %c1_i32_39 = arith.constant 1 : i32
    %135 = tpu.dynamic_rotate %134 by %c1_i32_39 dim 2 : vector<1x17x17xf32>, i32 -> vector<1x17x17xf32>
    %136 = vector.extract_strided_slice %135 {offsets = [0, 0, 0], sizes = [1, 16, 16], strides = [1, 1, 1]} : vector<1x17x17xf32> to vector<1x16x16xf32>
    %c9 = arith.constant 9 : index
    %137 = memref.load %arg2[%c9] : memref<81xf32, #tpu.memory_space<smem>>
    %138 = vector.broadcast %137 : f32 to vector<1x16x16xf32>
    %139 = arith.mulf %138, %136 : vector<1x16x16xf32>
    %140 = arith.addf %123, %139 : vector<1x16x16xf32>
    %c36 = arith.constant 36 : index
    %141 = memref.load %arg2[%c36] : memref<81xf32, #tpu.memory_space<smem>>
    %142 = vector.broadcast %141 : f32 to vector<1x16x16xf32>
    %143 = arith.mulf %142, %136 : vector<1x16x16xf32>
    %144 = arith.addf %127, %143 : vector<1x16x16xf32>
    %c63 = arith.constant 63 : index
    %145 = memref.load %arg2[%c63] : memref<81xf32, #tpu.memory_space<smem>>
    %146 = vector.broadcast %145 : f32 to vector<1x16x16xf32>
    %147 = arith.mulf %146, %136 : vector<1x16x16xf32>
    %148 = arith.addf %131, %147 : vector<1x16x16xf32>
    %149 = vector.extract_strided_slice %134 {offsets = [0, 0, 0], sizes = [1, 16, 16], strides = [1, 1, 1]} : vector<1x17x17xf32> to vector<1x16x16xf32>
    %c10 = arith.constant 10 : index
    %150 = memref.load %arg2[%c10] : memref<81xf32, #tpu.memory_space<smem>>
    %151 = vector.broadcast %150 : f32 to vector<1x16x16xf32>
    %152 = arith.mulf %151, %149 : vector<1x16x16xf32>
    %153 = arith.addf %140, %152 : vector<1x16x16xf32>
    %c37 = arith.constant 37 : index
    %154 = memref.load %arg2[%c37] : memref<81xf32, #tpu.memory_space<smem>>
    %155 = vector.broadcast %154 : f32 to vector<1x16x16xf32>
    %156 = arith.mulf %155, %149 : vector<1x16x16xf32>
    %157 = arith.addf %144, %156 : vector<1x16x16xf32>
    %c64 = arith.constant 64 : index
    %158 = memref.load %arg2[%c64] : memref<81xf32, #tpu.memory_space<smem>>
    %159 = vector.broadcast %158 : f32 to vector<1x16x16xf32>
    %160 = arith.mulf %159, %149 : vector<1x16x16xf32>
    %161 = arith.addf %148, %160 : vector<1x16x16xf32>
    %c16_i32_40 = arith.constant 16 : i32
    %162 = tpu.dynamic_rotate %134 by %c16_i32_40 dim 2 : vector<1x17x17xf32>, i32 -> vector<1x17x17xf32>
    %163 = vector.extract_strided_slice %162 {offsets = [0, 0, 0], sizes = [1, 16, 16], strides = [1, 1, 1]} : vector<1x17x17xf32> to vector<1x16x16xf32>
    %c11 = arith.constant 11 : index
    %164 = memref.load %arg2[%c11] : memref<81xf32, #tpu.memory_space<smem>>
    %165 = vector.broadcast %164 : f32 to vector<1x16x16xf32>
    %166 = arith.mulf %165, %163 : vector<1x16x16xf32>
    %167 = arith.addf %153, %166 : vector<1x16x16xf32>
    %c38 = arith.constant 38 : index
    %168 = memref.load %arg2[%c38] : memref<81xf32, #tpu.memory_space<smem>>
    %169 = vector.broadcast %168 : f32 to vector<1x16x16xf32>
    %170 = arith.mulf %169, %163 : vector<1x16x16xf32>
    %171 = arith.addf %157, %170 : vector<1x16x16xf32>
    %c65 = arith.constant 65 : index
    %172 = memref.load %arg2[%c65] : memref<81xf32, #tpu.memory_space<smem>>
    %173 = vector.broadcast %172 : f32 to vector<1x16x16xf32>
    %174 = arith.mulf %173, %163 : vector<1x16x16xf32>
    %175 = arith.addf %161, %174 : vector<1x16x16xf32>
    %c1_i32_41 = arith.constant 1 : i32
    %176 = tpu.dynamic_rotate %133 by %c1_i32_41 dim 2 : vector<1x17x17xf32>, i32 -> vector<1x17x17xf32>
    %177 = vector.extract_strided_slice %176 {offsets = [0, 0, 0], sizes = [1, 16, 16], strides = [1, 1, 1]} : vector<1x17x17xf32> to vector<1x16x16xf32>
    %c12 = arith.constant 12 : index
    %178 = memref.load %arg2[%c12] : memref<81xf32, #tpu.memory_space<smem>>
    %179 = vector.broadcast %178 : f32 to vector<1x16x16xf32>
    %180 = arith.mulf %179, %177 : vector<1x16x16xf32>
    %181 = arith.addf %167, %180 : vector<1x16x16xf32>
    %c39 = arith.constant 39 : index
    %182 = memref.load %arg2[%c39] : memref<81xf32, #tpu.memory_space<smem>>
    %183 = vector.broadcast %182 : f32 to vector<1x16x16xf32>
    %184 = arith.mulf %183, %177 : vector<1x16x16xf32>
    %185 = arith.addf %171, %184 : vector<1x16x16xf32>
    %c66 = arith.constant 66 : index
    %186 = memref.load %arg2[%c66] : memref<81xf32, #tpu.memory_space<smem>>
    %187 = vector.broadcast %186 : f32 to vector<1x16x16xf32>
    %188 = arith.mulf %187, %177 : vector<1x16x16xf32>
    %189 = arith.addf %175, %188 : vector<1x16x16xf32>
    %190 = vector.extract_strided_slice %133 {offsets = [0, 0, 0], sizes = [1, 16, 16], strides = [1, 1, 1]} : vector<1x17x17xf32> to vector<1x16x16xf32>
    %c13 = arith.constant 13 : index
    %191 = memref.load %arg2[%c13] : memref<81xf32, #tpu.memory_space<smem>>
    %192 = vector.broadcast %191 : f32 to vector<1x16x16xf32>
    %193 = arith.mulf %192, %190 : vector<1x16x16xf32>
    %194 = arith.addf %181, %193 : vector<1x16x16xf32>
    %c40 = arith.constant 40 : index
    %195 = memref.load %arg2[%c40] : memref<81xf32, #tpu.memory_space<smem>>
    %196 = vector.broadcast %195 : f32 to vector<1x16x16xf32>
    %197 = arith.mulf %196, %190 : vector<1x16x16xf32>
    %198 = arith.addf %185, %197 : vector<1x16x16xf32>
    %c67 = arith.constant 67 : index
    %199 = memref.load %arg2[%c67] : memref<81xf32, #tpu.memory_space<smem>>
    %200 = vector.broadcast %199 : f32 to vector<1x16x16xf32>
    %201 = arith.mulf %200, %190 : vector<1x16x16xf32>
    %202 = arith.addf %189, %201 : vector<1x16x16xf32>
    %c16_i32_42 = arith.constant 16 : i32
    %203 = tpu.dynamic_rotate %133 by %c16_i32_42 dim 2 : vector<1x17x17xf32>, i32 -> vector<1x17x17xf32>
    %204 = vector.extract_strided_slice %203 {offsets = [0, 0, 0], sizes = [1, 16, 16], strides = [1, 1, 1]} : vector<1x17x17xf32> to vector<1x16x16xf32>
    %c14 = arith.constant 14 : index
    %205 = memref.load %arg2[%c14] : memref<81xf32, #tpu.memory_space<smem>>
    %206 = vector.broadcast %205 : f32 to vector<1x16x16xf32>
    %207 = arith.mulf %206, %204 : vector<1x16x16xf32>
    %208 = arith.addf %194, %207 : vector<1x16x16xf32>
    %c41 = arith.constant 41 : index
    %209 = memref.load %arg2[%c41] : memref<81xf32, #tpu.memory_space<smem>>
    %210 = vector.broadcast %209 : f32 to vector<1x16x16xf32>
    %211 = arith.mulf %210, %204 : vector<1x16x16xf32>
    %212 = arith.addf %198, %211 : vector<1x16x16xf32>
    %c68 = arith.constant 68 : index
    %213 = memref.load %arg2[%c68] : memref<81xf32, #tpu.memory_space<smem>>
    %214 = vector.broadcast %213 : f32 to vector<1x16x16xf32>
    %215 = arith.mulf %214, %204 : vector<1x16x16xf32>
    %216 = arith.addf %202, %215 : vector<1x16x16xf32>
    %c16_i32_43 = arith.constant 16 : i32
    %217 = tpu.dynamic_rotate %133 by %c16_i32_43 dim 1 : vector<1x17x17xf32>, i32 -> vector<1x17x17xf32>
    %c1_i32_44 = arith.constant 1 : i32
    %218 = tpu.dynamic_rotate %217 by %c1_i32_44 dim 2 : vector<1x17x17xf32>, i32 -> vector<1x17x17xf32>
    %219 = vector.extract_strided_slice %218 {offsets = [0, 0, 0], sizes = [1, 16, 16], strides = [1, 1, 1]} : vector<1x17x17xf32> to vector<1x16x16xf32>
    %c15 = arith.constant 15 : index
    %220 = memref.load %arg2[%c15] : memref<81xf32, #tpu.memory_space<smem>>
    %221 = vector.broadcast %220 : f32 to vector<1x16x16xf32>
    %222 = arith.mulf %221, %219 : vector<1x16x16xf32>
    %223 = arith.addf %208, %222 : vector<1x16x16xf32>
    %c42 = arith.constant 42 : index
    %224 = memref.load %arg2[%c42] : memref<81xf32, #tpu.memory_space<smem>>
    %225 = vector.broadcast %224 : f32 to vector<1x16x16xf32>
    %226 = arith.mulf %225, %219 : vector<1x16x16xf32>
    %227 = arith.addf %212, %226 : vector<1x16x16xf32>
    %c69 = arith.constant 69 : index
    %228 = memref.load %arg2[%c69] : memref<81xf32, #tpu.memory_space<smem>>
    %229 = vector.broadcast %228 : f32 to vector<1x16x16xf32>
    %230 = arith.mulf %229, %219 : vector<1x16x16xf32>
    %231 = arith.addf %216, %230 : vector<1x16x16xf32>
    %232 = vector.extract_strided_slice %217 {offsets = [0, 0, 0], sizes = [1, 16, 16], strides = [1, 1, 1]} : vector<1x17x17xf32> to vector<1x16x16xf32>
    %c16_45 = arith.constant 16 : index
    %233 = memref.load %arg2[%c16_45] : memref<81xf32, #tpu.memory_space<smem>>
    %234 = vector.broadcast %233 : f32 to vector<1x16x16xf32>
    %235 = arith.mulf %234, %232 : vector<1x16x16xf32>
    %236 = arith.addf %223, %235 : vector<1x16x16xf32>
    %c43 = arith.constant 43 : index
    %237 = memref.load %arg2[%c43] : memref<81xf32, #tpu.memory_space<smem>>
    %238 = vector.broadcast %237 : f32 to vector<1x16x16xf32>
    %239 = arith.mulf %238, %232 : vector<1x16x16xf32>
    %240 = arith.addf %227, %239 : vector<1x16x16xf32>
    %c70 = arith.constant 70 : index
    %241 = memref.load %arg2[%c70] : memref<81xf32, #tpu.memory_space<smem>>
    %242 = vector.broadcast %241 : f32 to vector<1x16x16xf32>
    %243 = arith.mulf %242, %232 : vector<1x16x16xf32>
    %244 = arith.addf %231, %243 : vector<1x16x16xf32>
    %c16_i32_46 = arith.constant 16 : i32
    %245 = tpu.dynamic_rotate %217 by %c16_i32_46 dim 2 : vector<1x17x17xf32>, i32 -> vector<1x17x17xf32>
    %246 = vector.extract_strided_slice %245 {offsets = [0, 0, 0], sizes = [1, 16, 16], strides = [1, 1, 1]} : vector<1x17x17xf32> to vector<1x16x16xf32>
    %c17 = arith.constant 17 : index
    %247 = memref.load %arg2[%c17] : memref<81xf32, #tpu.memory_space<smem>>
    %248 = vector.broadcast %247 : f32 to vector<1x16x16xf32>
    %249 = arith.mulf %248, %246 : vector<1x16x16xf32>
    %250 = arith.addf %236, %249 : vector<1x16x16xf32>
    %c44 = arith.constant 44 : index
    %251 = memref.load %arg2[%c44] : memref<81xf32, #tpu.memory_space<smem>>
    %252 = vector.broadcast %251 : f32 to vector<1x16x16xf32>
    %253 = arith.mulf %252, %246 : vector<1x16x16xf32>
    %254 = arith.addf %240, %253 : vector<1x16x16xf32>
    %c71 = arith.constant 71 : index
    %255 = memref.load %arg2[%c71] : memref<81xf32, #tpu.memory_space<smem>>
    %256 = vector.broadcast %255 : f32 to vector<1x16x16xf32>
    %257 = arith.mulf %256, %246 : vector<1x16x16xf32>
    %258 = arith.addf %244, %257 : vector<1x16x16xf32>
    %c0_47 = arith.constant 0 : index
    %c2_48 = arith.constant 2 : index
    %c0_49 = arith.constant 0 : index
    %c0_50 = arith.constant 0 : index
    %259 = vector.load %arg7[%c0_47, %c2_48, %c0_49, %c0_50] : memref<1x3x17x17xf32, #tpu.memory_space<vmem>>, vector<1x1x17x17xf32>
    %260 = vector.shape_cast %259 : vector<1x1x17x17xf32> to vector<1x17x17xf32>
    %c1_i32_51 = arith.constant 1 : i32
    %261 = tpu.dynamic_rotate %260 by %c1_i32_51 dim 1 : vector<1x17x17xf32>, i32 -> vector<1x17x17xf32>
    %c1_i32_52 = arith.constant 1 : i32
    %262 = tpu.dynamic_rotate %261 by %c1_i32_52 dim 2 : vector<1x17x17xf32>, i32 -> vector<1x17x17xf32>
    %263 = vector.extract_strided_slice %262 {offsets = [0, 0, 0], sizes = [1, 16, 16], strides = [1, 1, 1]} : vector<1x17x17xf32> to vector<1x16x16xf32>
    %c18 = arith.constant 18 : index
    %264 = memref.load %arg2[%c18] : memref<81xf32, #tpu.memory_space<smem>>
    %265 = vector.broadcast %264 : f32 to vector<1x16x16xf32>
    %266 = arith.mulf %265, %263 : vector<1x16x16xf32>
    %267 = arith.addf %250, %266 : vector<1x16x16xf32>
    %c45 = arith.constant 45 : index
    %268 = memref.load %arg2[%c45] : memref<81xf32, #tpu.memory_space<smem>>
    %269 = vector.broadcast %268 : f32 to vector<1x16x16xf32>
    %270 = arith.mulf %269, %263 : vector<1x16x16xf32>
    %271 = arith.addf %254, %270 : vector<1x16x16xf32>
    %c72 = arith.constant 72 : index
    %272 = memref.load %arg2[%c72] : memref<81xf32, #tpu.memory_space<smem>>
    %273 = vector.broadcast %272 : f32 to vector<1x16x16xf32>
    %274 = arith.mulf %273, %263 : vector<1x16x16xf32>
    %275 = arith.addf %258, %274 : vector<1x16x16xf32>
    %276 = vector.extract_strided_slice %261 {offsets = [0, 0, 0], sizes = [1, 16, 16], strides = [1, 1, 1]} : vector<1x17x17xf32> to vector<1x16x16xf32>
    %c19 = arith.constant 19 : index
    %277 = memref.load %arg2[%c19] : memref<81xf32, #tpu.memory_space<smem>>
    %278 = vector.broadcast %277 : f32 to vector<1x16x16xf32>
    %279 = arith.mulf %278, %276 : vector<1x16x16xf32>
    %280 = arith.addf %267, %279 : vector<1x16x16xf32>
    %c46 = arith.constant 46 : index
    %281 = memref.load %arg2[%c46] : memref<81xf32, #tpu.memory_space<smem>>
    %282 = vector.broadcast %281 : f32 to vector<1x16x16xf32>
    %283 = arith.mulf %282, %276 : vector<1x16x16xf32>
    %284 = arith.addf %271, %283 : vector<1x16x16xf32>
    %c73 = arith.constant 73 : index
    %285 = memref.load %arg2[%c73] : memref<81xf32, #tpu.memory_space<smem>>
    %286 = vector.broadcast %285 : f32 to vector<1x16x16xf32>
    %287 = arith.mulf %286, %276 : vector<1x16x16xf32>
    %288 = arith.addf %275, %287 : vector<1x16x16xf32>
    %c16_i32_53 = arith.constant 16 : i32
    %289 = tpu.dynamic_rotate %261 by %c16_i32_53 dim 2 : vector<1x17x17xf32>, i32 -> vector<1x17x17xf32>
    %290 = vector.extract_strided_slice %289 {offsets = [0, 0, 0], sizes = [1, 16, 16], strides = [1, 1, 1]} : vector<1x17x17xf32> to vector<1x16x16xf32>
    %c20 = arith.constant 20 : index
    %291 = memref.load %arg2[%c20] : memref<81xf32, #tpu.memory_space<smem>>
    %292 = vector.broadcast %291 : f32 to vector<1x16x16xf32>
    %293 = arith.mulf %292, %290 : vector<1x16x16xf32>
    %294 = arith.addf %280, %293 : vector<1x16x16xf32>
    %c47 = arith.constant 47 : index
    %295 = memref.load %arg2[%c47] : memref<81xf32, #tpu.memory_space<smem>>
    %296 = vector.broadcast %295 : f32 to vector<1x16x16xf32>
    %297 = arith.mulf %296, %290 : vector<1x16x16xf32>
    %298 = arith.addf %284, %297 : vector<1x16x16xf32>
    %c74 = arith.constant 74 : index
    %299 = memref.load %arg2[%c74] : memref<81xf32, #tpu.memory_space<smem>>
    %300 = vector.broadcast %299 : f32 to vector<1x16x16xf32>
    %301 = arith.mulf %300, %290 : vector<1x16x16xf32>
    %302 = arith.addf %288, %301 : vector<1x16x16xf32>
    %c1_i32_54 = arith.constant 1 : i32
    %303 = tpu.dynamic_rotate %260 by %c1_i32_54 dim 2 : vector<1x17x17xf32>, i32 -> vector<1x17x17xf32>
    %304 = vector.extract_strided_slice %303 {offsets = [0, 0, 0], sizes = [1, 16, 16], strides = [1, 1, 1]} : vector<1x17x17xf32> to vector<1x16x16xf32>
    %c21 = arith.constant 21 : index
    %305 = memref.load %arg2[%c21] : memref<81xf32, #tpu.memory_space<smem>>
    %306 = vector.broadcast %305 : f32 to vector<1x16x16xf32>
    %307 = arith.mulf %306, %304 : vector<1x16x16xf32>
    %308 = arith.addf %294, %307 : vector<1x16x16xf32>
    %c48 = arith.constant 48 : index
    %309 = memref.load %arg2[%c48] : memref<81xf32, #tpu.memory_space<smem>>
    %310 = vector.broadcast %309 : f32 to vector<1x16x16xf32>
    %311 = arith.mulf %310, %304 : vector<1x16x16xf32>
    %312 = arith.addf %298, %311 : vector<1x16x16xf32>
    %c75 = arith.constant 75 : index
    %313 = memref.load %arg2[%c75] : memref<81xf32, #tpu.memory_space<smem>>
    %314 = vector.broadcast %313 : f32 to vector<1x16x16xf32>
    %315 = arith.mulf %314, %304 : vector<1x16x16xf32>
    %316 = arith.addf %302, %315 : vector<1x16x16xf32>
    %317 = vector.extract_strided_slice %260 {offsets = [0, 0, 0], sizes = [1, 16, 16], strides = [1, 1, 1]} : vector<1x17x17xf32> to vector<1x16x16xf32>
    %c22 = arith.constant 22 : index
    %318 = memref.load %arg2[%c22] : memref<81xf32, #tpu.memory_space<smem>>
    %319 = vector.broadcast %318 : f32 to vector<1x16x16xf32>
    %320 = arith.mulf %319, %317 : vector<1x16x16xf32>
    %321 = arith.addf %308, %320 : vector<1x16x16xf32>
    %c49 = arith.constant 49 : index
    %322 = memref.load %arg2[%c49] : memref<81xf32, #tpu.memory_space<smem>>
    %323 = vector.broadcast %322 : f32 to vector<1x16x16xf32>
    %324 = arith.mulf %323, %317 : vector<1x16x16xf32>
    %325 = arith.addf %312, %324 : vector<1x16x16xf32>
    %c76 = arith.constant 76 : index
    %326 = memref.load %arg2[%c76] : memref<81xf32, #tpu.memory_space<smem>>
    %327 = vector.broadcast %326 : f32 to vector<1x16x16xf32>
    %328 = arith.mulf %327, %317 : vector<1x16x16xf32>
    %329 = arith.addf %316, %328 : vector<1x16x16xf32>
    %c16_i32_55 = arith.constant 16 : i32
    %330 = tpu.dynamic_rotate %260 by %c16_i32_55 dim 2 : vector<1x17x17xf32>, i32 -> vector<1x17x17xf32>
    %331 = vector.extract_strided_slice %330 {offsets = [0, 0, 0], sizes = [1, 16, 16], strides = [1, 1, 1]} : vector<1x17x17xf32> to vector<1x16x16xf32>
    %c23 = arith.constant 23 : index
    %332 = memref.load %arg2[%c23] : memref<81xf32, #tpu.memory_space<smem>>
    %333 = vector.broadcast %332 : f32 to vector<1x16x16xf32>
    %334 = arith.mulf %333, %331 : vector<1x16x16xf32>
    %335 = arith.addf %321, %334 : vector<1x16x16xf32>
    %c50 = arith.constant 50 : index
    %336 = memref.load %arg2[%c50] : memref<81xf32, #tpu.memory_space<smem>>
    %337 = vector.broadcast %336 : f32 to vector<1x16x16xf32>
    %338 = arith.mulf %337, %331 : vector<1x16x16xf32>
    %339 = arith.addf %325, %338 : vector<1x16x16xf32>
    %c77 = arith.constant 77 : index
    %340 = memref.load %arg2[%c77] : memref<81xf32, #tpu.memory_space<smem>>
    %341 = vector.broadcast %340 : f32 to vector<1x16x16xf32>
    %342 = arith.mulf %341, %331 : vector<1x16x16xf32>
    %343 = arith.addf %329, %342 : vector<1x16x16xf32>
    %c16_i32_56 = arith.constant 16 : i32
    %344 = tpu.dynamic_rotate %260 by %c16_i32_56 dim 1 : vector<1x17x17xf32>, i32 -> vector<1x17x17xf32>
    %c1_i32_57 = arith.constant 1 : i32
    %345 = tpu.dynamic_rotate %344 by %c1_i32_57 dim 2 : vector<1x17x17xf32>, i32 -> vector<1x17x17xf32>
    %346 = vector.extract_strided_slice %345 {offsets = [0, 0, 0], sizes = [1, 16, 16], strides = [1, 1, 1]} : vector<1x17x17xf32> to vector<1x16x16xf32>
    %c24 = arith.constant 24 : index
    %347 = memref.load %arg2[%c24] : memref<81xf32, #tpu.memory_space<smem>>
    %348 = vector.broadcast %347 : f32 to vector<1x16x16xf32>
    %349 = arith.mulf %348, %346 : vector<1x16x16xf32>
    %350 = arith.addf %335, %349 : vector<1x16x16xf32>
    %c51 = arith.constant 51 : index
    %351 = memref.load %arg2[%c51] : memref<81xf32, #tpu.memory_space<smem>>
    %352 = vector.broadcast %351 : f32 to vector<1x16x16xf32>
    %353 = arith.mulf %352, %346 : vector<1x16x16xf32>
    %354 = arith.addf %339, %353 : vector<1x16x16xf32>
    %c78 = arith.constant 78 : index
    %355 = memref.load %arg2[%c78] : memref<81xf32, #tpu.memory_space<smem>>
    %356 = vector.broadcast %355 : f32 to vector<1x16x16xf32>
    %357 = arith.mulf %356, %346 : vector<1x16x16xf32>
    %358 = arith.addf %343, %357 : vector<1x16x16xf32>
    %359 = vector.extract_strided_slice %344 {offsets = [0, 0, 0], sizes = [1, 16, 16], strides = [1, 1, 1]} : vector<1x17x17xf32> to vector<1x16x16xf32>
    %c25 = arith.constant 25 : index
    %360 = memref.load %arg2[%c25] : memref<81xf32, #tpu.memory_space<smem>>
    %361 = vector.broadcast %360 : f32 to vector<1x16x16xf32>
    %362 = arith.mulf %361, %359 : vector<1x16x16xf32>
    %363 = arith.addf %350, %362 : vector<1x16x16xf32>
    %c52 = arith.constant 52 : index
    %364 = memref.load %arg2[%c52] : memref<81xf32, #tpu.memory_space<smem>>
    %365 = vector.broadcast %364 : f32 to vector<1x16x16xf32>
    %366 = arith.mulf %365, %359 : vector<1x16x16xf32>
    %367 = arith.addf %354, %366 : vector<1x16x16xf32>
    %c79 = arith.constant 79 : index
    %368 = memref.load %arg2[%c79] : memref<81xf32, #tpu.memory_space<smem>>
    %369 = vector.broadcast %368 : f32 to vector<1x16x16xf32>
    %370 = arith.mulf %369, %359 : vector<1x16x16xf32>
    %371 = arith.addf %358, %370 : vector<1x16x16xf32>
    %c16_i32_58 = arith.constant 16 : i32
    %372 = tpu.dynamic_rotate %344 by %c16_i32_58 dim 2 : vector<1x17x17xf32>, i32 -> vector<1x17x17xf32>
    %373 = vector.extract_strided_slice %372 {offsets = [0, 0, 0], sizes = [1, 16, 16], strides = [1, 1, 1]} : vector<1x17x17xf32> to vector<1x16x16xf32>
    %c26 = arith.constant 26 : index
    %374 = memref.load %arg2[%c26] : memref<81xf32, #tpu.memory_space<smem>>
    %375 = vector.broadcast %374 : f32 to vector<1x16x16xf32>
    %376 = arith.mulf %375, %373 : vector<1x16x16xf32>
    %377 = arith.addf %363, %376 : vector<1x16x16xf32>
    %c53 = arith.constant 53 : index
    %378 = memref.load %arg2[%c53] : memref<81xf32, #tpu.memory_space<smem>>
    %379 = vector.broadcast %378 : f32 to vector<1x16x16xf32>
    %380 = arith.mulf %379, %373 : vector<1x16x16xf32>
    %381 = arith.addf %367, %380 : vector<1x16x16xf32>
    %c80 = arith.constant 80 : index
    %382 = memref.load %arg2[%c80] : memref<81xf32, #tpu.memory_space<smem>>
    %383 = vector.broadcast %382 : f32 to vector<1x16x16xf32>
    %384 = arith.mulf %383, %373 : vector<1x16x16xf32>
    %385 = arith.addf %371, %384 : vector<1x16x16xf32>
    %c0_59 = arith.constant 0 : index
    %386 = memref.load %arg3[%c0_59] : memref<3xf32, #tpu.memory_space<smem>>
    %387 = vector.broadcast %386 : f32 to vector<1x16x16xf32>
    %388 = arith.addf %377, %387 : vector<1x16x16xf32>
    %c1_60 = arith.constant 1 : index
    %389 = memref.load %arg3[%c1_60] : memref<3xf32, #tpu.memory_space<smem>>
    %390 = vector.broadcast %389 : f32 to vector<1x16x16xf32>
    %391 = arith.addf %381, %390 : vector<1x16x16xf32>
    %c2_61 = arith.constant 2 : index
    %392 = memref.load %arg3[%c2_61] : memref<3xf32, #tpu.memory_space<smem>>
    %393 = vector.broadcast %392 : f32 to vector<1x16x16xf32>
    %394 = arith.addf %385, %393 : vector<1x16x16xf32>
    %cst_62 = arith.constant 0.000000e+00 : f32
    %395 = vector.broadcast %cst_62 : f32 to vector<1x16x16xf32>
    %396 = arith.maximumf %388, %395 : vector<1x16x16xf32>
    %c0_63 = arith.constant 0 : index
    %c0_64 = arith.constant 0 : index
    %c0_65 = arith.constant 0 : index
    %c0_66 = arith.constant 0 : index
    %397 = vector.load %arg8[%c0_63, %c0_64, %c0_65, %c0_66] : memref<1x3x17x17xf32, #tpu.memory_space<vmem>>, vector<1x1x16x16xf32>
    %398 = vector.shape_cast %397 : vector<1x1x16x16xf32> to vector<1x16x16xf32>
    %399 = vector.shape_cast %396 : vector<1x16x16xf32> to vector<1x1x16x16xf32>
    tpu.vector_store %arg8[%c0_63, %c0_64, %c0_65, %c0_66], %399 {strides = array<i32>} : memref<1x3x17x17xf32, #tpu.memory_space<vmem>>, vector<1x1x16x16xf32>,
    %cst_67 = arith.constant 0.000000e+00 : f32
    %400 = vector.broadcast %cst_67 : f32 to vector<1x16x16xf32>
    %401 = arith.maximumf %391, %400 : vector<1x16x16xf32>
    %c0_68 = arith.constant 0 : index
    %c1_69 = arith.constant 1 : index
    %c0_70 = arith.constant 0 : index
    %c0_71 = arith.constant 0 : index
    %402 = vector.load %arg8[%c0_68, %c1_69, %c0_70, %c0_71] : memref<1x3x17x17xf32, #tpu.memory_space<vmem>>, vector<1x1x16x16xf32>
    %403 = vector.shape_cast %402 : vector<1x1x16x16xf32> to vector<1x16x16xf32>
    %404 = vector.shape_cast %401 : vector<1x16x16xf32> to vector<1x1x16x16xf32>
    tpu.vector_store %arg8[%c0_68, %c1_69, %c0_70, %c0_71], %404 {strides = array<i32>} : memref<1x3x17x17xf32, #tpu.memory_space<vmem>>, vector<1x1x16x16xf32>,
    %cst_72 = arith.constant 0.000000e+00 : f32
    %405 = vector.broadcast %cst_72 : f32 to vector<1x16x16xf32>
    %406 = arith.maximumf %394, %405 : vector<1x16x16xf32>
    %c0_73 = arith.constant 0 : index
    %c2_74 = arith.constant 2 : index
    %c0_75 = arith.constant 0 : index
    %c0_76 = arith.constant 0 : index
    %407 = vector.load %arg8[%c0_73, %c2_74, %c0_75, %c0_76] : memref<1x3x17x17xf32, #tpu.memory_space<vmem>>, vector<1x1x16x16xf32>
    %408 = vector.shape_cast %407 : vector<1x1x16x16xf32> to vector<1x16x16xf32>
    %409 = vector.shape_cast %406 : vector<1x16x16xf32> to vector<1x1x16x16xf32>
    tpu.vector_store %arg8[%c0_73, %c2_74, %c0_75, %c0_76], %409 {strides = array<i32>} : memref<1x3x17x17xf32, #tpu.memory_space<vmem>>, vector<1x1x16x16xf32>,
    %c0_77 = arith.constant 0 : index
    %c0_78 = arith.constant 0 : index
    %c0_79 = arith.constant 0 : index
    %c0_80 = arith.constant 0 : index
    %410 = vector.load %arg8[%c0_77, %c0_78, %c0_79, %c0_80] : memref<1x3x17x17xf32, #tpu.memory_space<vmem>>, vector<1x1x17x17xf32>
    %411 = vector.shape_cast %410 : vector<1x1x17x17xf32> to vector<1x17x17xf32>
    %c1_i32_81 = arith.constant 1 : i32
    %412 = tpu.dynamic_rotate %411 by %c1_i32_81 dim 1 : vector<1x17x17xf32>, i32 -> vector<1x17x17xf32>
    %c1_i32_82 = arith.constant 1 : i32
    %413 = tpu.dynamic_rotate %412 by %c1_i32_82 dim 2 : vector<1x17x17xf32>, i32 -> vector<1x17x17xf32>
    %414 = vector.extract_strided_slice %413 {offsets = [0, 0, 0], sizes = [1, 16, 16], strides = [1, 1, 1]} : vector<1x17x17xf32> to vector<1x16x16xf32>
    %c0_83 = arith.constant 0 : index
    %415 = memref.load %arg4[%c0_83] : memref<81xf32, #tpu.memory_space<smem>>
    %416 = vector.broadcast %415 : f32 to vector<1x16x16xf32>
    %417 = arith.mulf %416, %414 : vector<1x16x16xf32>
    %c27_84 = arith.constant 27 : index
    %418 = memref.load %arg4[%c27_84] : memref<81xf32, #tpu.memory_space<smem>>
    %419 = vector.broadcast %418 : f32 to vector<1x16x16xf32>
    %420 = arith.mulf %419, %414 : vector<1x16x16xf32>
    %c54_85 = arith.constant 54 : index
    %421 = memref.load %arg4[%c54_85] : memref<81xf32, #tpu.memory_space<smem>>
    %422 = vector.broadcast %421 : f32 to vector<1x16x16xf32>
    %423 = arith.mulf %422, %414 : vector<1x16x16xf32>
    %424 = vector.extract_strided_slice %412 {offsets = [0, 0, 0], sizes = [1, 16, 16], strides = [1, 1, 1]} : vector<1x17x17xf32> to vector<1x16x16xf32>
    %c1_86 = arith.constant 1 : index
    %425 = memref.load %arg4[%c1_86] : memref<81xf32, #tpu.memory_space<smem>>
    %426 = vector.broadcast %425 : f32 to vector<1x16x16xf32>
    %427 = arith.mulf %426, %424 : vector<1x16x16xf32>
    %428 = arith.addf %417, %427 : vector<1x16x16xf32>
    %c28_87 = arith.constant 28 : index
    %429 = memref.load %arg4[%c28_87] : memref<81xf32, #tpu.memory_space<smem>>
    %430 = vector.broadcast %429 : f32 to vector<1x16x16xf32>
    %431 = arith.mulf %430, %424 : vector<1x16x16xf32>
    %432 = arith.addf %420, %431 : vector<1x16x16xf32>
    %c55_88 = arith.constant 55 : index
    %433 = memref.load %arg4[%c55_88] : memref<81xf32, #tpu.memory_space<smem>>
    %434 = vector.broadcast %433 : f32 to vector<1x16x16xf32>
    %435 = arith.mulf %434, %424 : vector<1x16x16xf32>
    %436 = arith.addf %423, %435 : vector<1x16x16xf32>
    %c16_i32_89 = arith.constant 16 : i32
    %437 = tpu.dynamic_rotate %412 by %c16_i32_89 dim 2 : vector<1x17x17xf32>, i32 -> vector<1x17x17xf32>
    %438 = vector.extract_strided_slice %437 {offsets = [0, 0, 0], sizes = [1, 16, 16], strides = [1, 1, 1]} : vector<1x17x17xf32> to vector<1x16x16xf32>
    %c2_90 = arith.constant 2 : index
    %439 = memref.load %arg4[%c2_90] : memref<81xf32, #tpu.memory_space<smem>>
    %440 = vector.broadcast %439 : f32 to vector<1x16x16xf32>
    %441 = arith.mulf %440, %438 : vector<1x16x16xf32>
    %442 = arith.addf %428, %441 : vector<1x16x16xf32>
    %c29_91 = arith.constant 29 : index
    %443 = memref.load %arg4[%c29_91] : memref<81xf32, #tpu.memory_space<smem>>
    %444 = vector.broadcast %443 : f32 to vector<1x16x16xf32>
    %445 = arith.mulf %444, %438 : vector<1x16x16xf32>
    %446 = arith.addf %432, %445 : vector<1x16x16xf32>
    %c56_92 = arith.constant 56 : index
    %447 = memref.load %arg4[%c56_92] : memref<81xf32, #tpu.memory_space<smem>>
    %448 = vector.broadcast %447 : f32 to vector<1x16x16xf32>
    %449 = arith.mulf %448, %438 : vector<1x16x16xf32>
    %450 = arith.addf %436, %449 : vector<1x16x16xf32>
    %c1_i32_93 = arith.constant 1 : i32
    %451 = tpu.dynamic_rotate %411 by %c1_i32_93 dim 2 : vector<1x17x17xf32>, i32 -> vector<1x17x17xf32>
    %452 = vector.extract_strided_slice %451 {offsets = [0, 0, 0], sizes = [1, 16, 16], strides = [1, 1, 1]} : vector<1x17x17xf32> to vector<1x16x16xf32>
    %c3_94 = arith.constant 3 : index
    %453 = memref.load %arg4[%c3_94] : memref<81xf32, #tpu.memory_space<smem>>
    %454 = vector.broadcast %453 : f32 to vector<1x16x16xf32>
    %455 = arith.mulf %454, %452 : vector<1x16x16xf32>
    %456 = arith.addf %442, %455 : vector<1x16x16xf32>
    %c30_95 = arith.constant 30 : index
    %457 = memref.load %arg4[%c30_95] : memref<81xf32, #tpu.memory_space<smem>>
    %458 = vector.broadcast %457 : f32 to vector<1x16x16xf32>
    %459 = arith.mulf %458, %452 : vector<1x16x16xf32>
    %460 = arith.addf %446, %459 : vector<1x16x16xf32>
    %c57_96 = arith.constant 57 : index
    %461 = memref.load %arg4[%c57_96] : memref<81xf32, #tpu.memory_space<smem>>
    %462 = vector.broadcast %461 : f32 to vector<1x16x16xf32>
    %463 = arith.mulf %462, %452 : vector<1x16x16xf32>
    %464 = arith.addf %450, %463 : vector<1x16x16xf32>
    %465 = vector.extract_strided_slice %411 {offsets = [0, 0, 0], sizes = [1, 16, 16], strides = [1, 1, 1]} : vector<1x17x17xf32> to vector<1x16x16xf32>
    %c4_97 = arith.constant 4 : index
    %466 = memref.load %arg4[%c4_97] : memref<81xf32, #tpu.memory_space<smem>>
    %467 = vector.broadcast %466 : f32 to vector<1x16x16xf32>
    %468 = arith.mulf %467, %465 : vector<1x16x16xf32>
    %469 = arith.addf %456, %468 : vector<1x16x16xf32>
    %c31_98 = arith.constant 31 : index
    %470 = memref.load %arg4[%c31_98] : memref<81xf32, #tpu.memory_space<smem>>
    %471 = vector.broadcast %470 : f32 to vector<1x16x16xf32>
    %472 = arith.mulf %471, %465 : vector<1x16x16xf32>
    %473 = arith.addf %460, %472 : vector<1x16x16xf32>
    %c58_99 = arith.constant 58 : index
    %474 = memref.load %arg4[%c58_99] : memref<81xf32, #tpu.memory_space<smem>>
    %475 = vector.broadcast %474 : f32 to vector<1x16x16xf32>
    %476 = arith.mulf %475, %465 : vector<1x16x16xf32>
    %477 = arith.addf %464, %476 : vector<1x16x16xf32>
    %c16_i32_100 = arith.constant 16 : i32
    %478 = tpu.dynamic_rotate %411 by %c16_i32_100 dim 2 : vector<1x17x17xf32>, i32 -> vector<1x17x17xf32>
    %479 = vector.extract_strided_slice %478 {offsets = [0, 0, 0], sizes = [1, 16, 16], strides = [1, 1, 1]} : vector<1x17x17xf32> to vector<1x16x16xf32>
    %c5_101 = arith.constant 5 : index
    %480 = memref.load %arg4[%c5_101] : memref<81xf32, #tpu.memory_space<smem>>
    %481 = vector.broadcast %480 : f32 to vector<1x16x16xf32>
    %482 = arith.mulf %481, %479 : vector<1x16x16xf32>
    %483 = arith.addf %469, %482 : vector<1x16x16xf32>
    %c32_102 = arith.constant 32 : index
    %484 = memref.load %arg4[%c32_102] : memref<81xf32, #tpu.memory_space<smem>>
    %485 = vector.broadcast %484 : f32 to vector<1x16x16xf32>
    %486 = arith.mulf %485, %479 : vector<1x16x16xf32>
    %487 = arith.addf %473, %486 : vector<1x16x16xf32>
    %c59_103 = arith.constant 59 : index
    %488 = memref.load %arg4[%c59_103] : memref<81xf32, #tpu.memory_space<smem>>
    %489 = vector.broadcast %488 : f32 to vector<1x16x16xf32>
    %490 = arith.mulf %489, %479 : vector<1x16x16xf32>
    %491 = arith.addf %477, %490 : vector<1x16x16xf32>
    %c16_i32_104 = arith.constant 16 : i32
    %492 = tpu.dynamic_rotate %411 by %c16_i32_104 dim 1 : vector<1x17x17xf32>, i32 -> vector<1x17x17xf32>
    %c1_i32_105 = arith.constant 1 : i32
    %493 = tpu.dynamic_rotate %492 by %c1_i32_105 dim 2 : vector<1x17x17xf32>, i32 -> vector<1x17x17xf32>
    %494 = vector.extract_strided_slice %493 {offsets = [0, 0, 0], sizes = [1, 16, 16], strides = [1, 1, 1]} : vector<1x17x17xf32> to vector<1x16x16xf32>
    %c6_106 = arith.constant 6 : index
    %495 = memref.load %arg4[%c6_106] : memref<81xf32, #tpu.memory_space<smem>>
    %496 = vector.broadcast %495 : f32 to vector<1x16x16xf32>
    %497 = arith.mulf %496, %494 : vector<1x16x16xf32>
    %498 = arith.addf %483, %497 : vector<1x16x16xf32>
    %c33_107 = arith.constant 33 : index
    %499 = memref.load %arg4[%c33_107] : memref<81xf32, #tpu.memory_space<smem>>
    %500 = vector.broadcast %499 : f32 to vector<1x16x16xf32>
    %501 = arith.mulf %500, %494 : vector<1x16x16xf32>
    %502 = arith.addf %487, %501 : vector<1x16x16xf32>
    %c60_108 = arith.constant 60 : index
    %503 = memref.load %arg4[%c60_108] : memref<81xf32, #tpu.memory_space<smem>>
    %504 = vector.broadcast %503 : f32 to vector<1x16x16xf32>
    %505 = arith.mulf %504, %494 : vector<1x16x16xf32>
    %506 = arith.addf %491, %505 : vector<1x16x16xf32>
    %507 = vector.extract_strided_slice %492 {offsets = [0, 0, 0], sizes = [1, 16, 16], strides = [1, 1, 1]} : vector<1x17x17xf32> to vector<1x16x16xf32>
    %c7_109 = arith.constant 7 : index
    %508 = memref.load %arg4[%c7_109] : memref<81xf32, #tpu.memory_space<smem>>
    %509 = vector.broadcast %508 : f32 to vector<1x16x16xf32>
    %510 = arith.mulf %509, %507 : vector<1x16x16xf32>
    %511 = arith.addf %498, %510 : vector<1x16x16xf32>
    %c34_110 = arith.constant 34 : index
    %512 = memref.load %arg4[%c34_110] : memref<81xf32, #tpu.memory_space<smem>>
    %513 = vector.broadcast %512 : f32 to vector<1x16x16xf32>
    %514 = arith.mulf %513, %507 : vector<1x16x16xf32>
    %515 = arith.addf %502, %514 : vector<1x16x16xf32>
    %c61_111 = arith.constant 61 : index
    %516 = memref.load %arg4[%c61_111] : memref<81xf32, #tpu.memory_space<smem>>
    %517 = vector.broadcast %516 : f32 to vector<1x16x16xf32>
    %518 = arith.mulf %517, %507 : vector<1x16x16xf32>
    %519 = arith.addf %506, %518 : vector<1x16x16xf32>
    %c16_i32_112 = arith.constant 16 : i32
    %520 = tpu.dynamic_rotate %492 by %c16_i32_112 dim 2 : vector<1x17x17xf32>, i32 -> vector<1x17x17xf32>
    %521 = vector.extract_strided_slice %520 {offsets = [0, 0, 0], sizes = [1, 16, 16], strides = [1, 1, 1]} : vector<1x17x17xf32> to vector<1x16x16xf32>
    %c8_113 = arith.constant 8 : index
    %522 = memref.load %arg4[%c8_113] : memref<81xf32, #tpu.memory_space<smem>>
    %523 = vector.broadcast %522 : f32 to vector<1x16x16xf32>
    %524 = arith.mulf %523, %521 : vector<1x16x16xf32>
    %525 = arith.addf %511, %524 : vector<1x16x16xf32>
    %c35_114 = arith.constant 35 : index
    %526 = memref.load %arg4[%c35_114] : memref<81xf32, #tpu.memory_space<smem>>
    %527 = vector.broadcast %526 : f32 to vector<1x16x16xf32>
    %528 = arith.mulf %527, %521 : vector<1x16x16xf32>
    %529 = arith.addf %515, %528 : vector<1x16x16xf32>
    %c62_115 = arith.constant 62 : index
    %530 = memref.load %arg4[%c62_115] : memref<81xf32, #tpu.memory_space<smem>>
    %531 = vector.broadcast %530 : f32 to vector<1x16x16xf32>
    %532 = arith.mulf %531, %521 : vector<1x16x16xf32>
    %533 = arith.addf %519, %532 : vector<1x16x16xf32>
    %c0_116 = arith.constant 0 : index
    %c1_117 = arith.constant 1 : index
    %c0_118 = arith.constant 0 : index
    %c0_119 = arith.constant 0 : index
    %534 = vector.load %arg8[%c0_116, %c1_117, %c0_118, %c0_119] : memref<1x3x17x17xf32, #tpu.memory_space<vmem>>, vector<1x1x17x17xf32>
    %535 = vector.shape_cast %534 : vector<1x1x17x17xf32> to vector<1x17x17xf32>
    %c1_i32_120 = arith.constant 1 : i32
    %536 = tpu.dynamic_rotate %535 by %c1_i32_120 dim 1 : vector<1x17x17xf32>, i32 -> vector<1x17x17xf32>
    %c1_i32_121 = arith.constant 1 : i32
    %537 = tpu.dynamic_rotate %536 by %c1_i32_121 dim 2 : vector<1x17x17xf32>, i32 -> vector<1x17x17xf32>
    %538 = vector.extract_strided_slice %537 {offsets = [0, 0, 0], sizes = [1, 16, 16], strides = [1, 1, 1]} : vector<1x17x17xf32> to vector<1x16x16xf32>
    %c9_122 = arith.constant 9 : index
    %539 = memref.load %arg4[%c9_122] : memref<81xf32, #tpu.memory_space<smem>>
    %540 = vector.broadcast %539 : f32 to vector<1x16x16xf32>
    %541 = arith.mulf %540, %538 : vector<1x16x16xf32>
    %542 = arith.addf %525, %541 : vector<1x16x16xf32>
    %c36_123 = arith.constant 36 : index
    %543 = memref.load %arg4[%c36_123] : memref<81xf32, #tpu.memory_space<smem>>
    %544 = vector.broadcast %543 : f32 to vector<1x16x16xf32>
    %545 = arith.mulf %544, %538 : vector<1x16x16xf32>
    %546 = arith.addf %529, %545 : vector<1x16x16xf32>
    %c63_124 = arith.constant 63 : index
    %547 = memref.load %arg4[%c63_124] : memref<81xf32, #tpu.memory_space<smem>>
    %548 = vector.broadcast %547 : f32 to vector<1x16x16xf32>
    %549 = arith.mulf %548, %538 : vector<1x16x16xf32>
    %550 = arith.addf %533, %549 : vector<1x16x16xf32>
    %551 = vector.extract_strided_slice %536 {offsets = [0, 0, 0], sizes = [1, 16, 16], strides = [1, 1, 1]} : vector<1x17x17xf32> to vector<1x16x16xf32>
    %c10_125 = arith.constant 10 : index
    %552 = memref.load %arg4[%c10_125] : memref<81xf32, #tpu.memory_space<smem>>
    %553 = vector.broadcast %552 : f32 to vector<1x16x16xf32>
    %554 = arith.mulf %553, %551 : vector<1x16x16xf32>
    %555 = arith.addf %542, %554 : vector<1x16x16xf32>
    %c37_126 = arith.constant 37 : index
    %556 = memref.load %arg4[%c37_126] : memref<81xf32, #tpu.memory_space<smem>>
    %557 = vector.broadcast %556 : f32 to vector<1x16x16xf32>
    %558 = arith.mulf %557, %551 : vector<1x16x16xf32>
    %559 = arith.addf %546, %558 : vector<1x16x16xf32>
    %c64_127 = arith.constant 64 : index
    %560 = memref.load %arg4[%c64_127] : memref<81xf32, #tpu.memory_space<smem>>
    %561 = vector.broadcast %560 : f32 to vector<1x16x16xf32>
    %562 = arith.mulf %561, %551 : vector<1x16x16xf32>
    %563 = arith.addf %550, %562 : vector<1x16x16xf32>
    %c16_i32_128 = arith.constant 16 : i32
    %564 = tpu.dynamic_rotate %536 by %c16_i32_128 dim 2 : vector<1x17x17xf32>, i32 -> vector<1x17x17xf32>
    %565 = vector.extract_strided_slice %564 {offsets = [0, 0, 0], sizes = [1, 16, 16], strides = [1, 1, 1]} : vector<1x17x17xf32> to vector<1x16x16xf32>
    %c11_129 = arith.constant 11 : index
    %566 = memref.load %arg4[%c11_129] : memref<81xf32, #tpu.memory_space<smem>>
    %567 = vector.broadcast %566 : f32 to vector<1x16x16xf32>
    %568 = arith.mulf %567, %565 : vector<1x16x16xf32>
    %569 = arith.addf %555, %568 : vector<1x16x16xf32>
    %c38_130 = arith.constant 38 : index
    %570 = memref.load %arg4[%c38_130] : memref<81xf32, #tpu.memory_space<smem>>
    %571 = vector.broadcast %570 : f32 to vector<1x16x16xf32>
    %572 = arith.mulf %571, %565 : vector<1x16x16xf32>
    %573 = arith.addf %559, %572 : vector<1x16x16xf32>
    %c65_131 = arith.constant 65 : index
    %574 = memref.load %arg4[%c65_131] : memref<81xf32, #tpu.memory_space<smem>>
    %575 = vector.broadcast %574 : f32 to vector<1x16x16xf32>
    %576 = arith.mulf %575, %565 : vector<1x16x16xf32>
    %577 = arith.addf %563, %576 : vector<1x16x16xf32>
    %c1_i32_132 = arith.constant 1 : i32
    %578 = tpu.dynamic_rotate %535 by %c1_i32_132 dim 2 : vector<1x17x17xf32>, i32 -> vector<1x17x17xf32>
    %579 = vector.extract_strided_slice %578 {offsets = [0, 0, 0], sizes = [1, 16, 16], strides = [1, 1, 1]} : vector<1x17x17xf32> to vector<1x16x16xf32>
    %c12_133 = arith.constant 12 : index
    %580 = memref.load %arg4[%c12_133] : memref<81xf32, #tpu.memory_space<smem>>
    %581 = vector.broadcast %580 : f32 to vector<1x16x16xf32>
    %582 = arith.mulf %581, %579 : vector<1x16x16xf32>
    %583 = arith.addf %569, %582 : vector<1x16x16xf32>
    %c39_134 = arith.constant 39 : index
    %584 = memref.load %arg4[%c39_134] : memref<81xf32, #tpu.memory_space<smem>>
    %585 = vector.broadcast %584 : f32 to vector<1x16x16xf32>
    %586 = arith.mulf %585, %579 : vector<1x16x16xf32>
    %587 = arith.addf %573, %586 : vector<1x16x16xf32>
    %c66_135 = arith.constant 66 : index
    %588 = memref.load %arg4[%c66_135] : memref<81xf32, #tpu.memory_space<smem>>
    %589 = vector.broadcast %588 : f32 to vector<1x16x16xf32>
    %590 = arith.mulf %589, %579 : vector<1x16x16xf32>
    %591 = arith.addf %577, %590 : vector<1x16x16xf32>
    %592 = vector.extract_strided_slice %535 {offsets = [0, 0, 0], sizes = [1, 16, 16], strides = [1, 1, 1]} : vector<1x17x17xf32> to vector<1x16x16xf32>
    %c13_136 = arith.constant 13 : index
    %593 = memref.load %arg4[%c13_136] : memref<81xf32, #tpu.memory_space<smem>>
    %594 = vector.broadcast %593 : f32 to vector<1x16x16xf32>
    %595 = arith.mulf %594, %592 : vector<1x16x16xf32>
    %596 = arith.addf %583, %595 : vector<1x16x16xf32>
    %c40_137 = arith.constant 40 : index
    %597 = memref.load %arg4[%c40_137] : memref<81xf32, #tpu.memory_space<smem>>
    %598 = vector.broadcast %597 : f32 to vector<1x16x16xf32>
    %599 = arith.mulf %598, %592 : vector<1x16x16xf32>
    %600 = arith.addf %587, %599 : vector<1x16x16xf32>
    %c67_138 = arith.constant 67 : index
    %601 = memref.load %arg4[%c67_138] : memref<81xf32, #tpu.memory_space<smem>>
    %602 = vector.broadcast %601 : f32 to vector<1x16x16xf32>
    %603 = arith.mulf %602, %592 : vector<1x16x16xf32>
    %604 = arith.addf %591, %603 : vector<1x16x16xf32>
    %c16_i32_139 = arith.constant 16 : i32
    %605 = tpu.dynamic_rotate %535 by %c16_i32_139 dim 2 : vector<1x17x17xf32>, i32 -> vector<1x17x17xf32>
    %606 = vector.extract_strided_slice %605 {offsets = [0, 0, 0], sizes = [1, 16, 16], strides = [1, 1, 1]} : vector<1x17x17xf32> to vector<1x16x16xf32>
    %c14_140 = arith.constant 14 : index
    %607 = memref.load %arg4[%c14_140] : memref<81xf32, #tpu.memory_space<smem>>
    %608 = vector.broadcast %607 : f32 to vector<1x16x16xf32>
    %609 = arith.mulf %608, %606 : vector<1x16x16xf32>
    %610 = arith.addf %596, %609 : vector<1x16x16xf32>
    %c41_141 = arith.constant 41 : index
    %611 = memref.load %arg4[%c41_141] : memref<81xf32, #tpu.memory_space<smem>>
    %612 = vector.broadcast %611 : f32 to vector<1x16x16xf32>
    %613 = arith.mulf %612, %606 : vector<1x16x16xf32>
    %614 = arith.addf %600, %613 : vector<1x16x16xf32>
    %c68_142 = arith.constant 68 : index
    %615 = memref.load %arg4[%c68_142] : memref<81xf32, #tpu.memory_space<smem>>
    %616 = vector.broadcast %615 : f32 to vector<1x16x16xf32>
    %617 = arith.mulf %616, %606 : vector<1x16x16xf32>
    %618 = arith.addf %604, %617 : vector<1x16x16xf32>
    %c16_i32_143 = arith.constant 16 : i32
    %619 = tpu.dynamic_rotate %535 by %c16_i32_143 dim 1 : vector<1x17x17xf32>, i32 -> vector<1x17x17xf32>
    %c1_i32_144 = arith.constant 1 : i32
    %620 = tpu.dynamic_rotate %619 by %c1_i32_144 dim 2 : vector<1x17x17xf32>, i32 -> vector<1x17x17xf32>
    %621 = vector.extract_strided_slice %620 {offsets = [0, 0, 0], sizes = [1, 16, 16], strides = [1, 1, 1]} : vector<1x17x17xf32> to vector<1x16x16xf32>
    %c15_145 = arith.constant 15 : index
    %622 = memref.load %arg4[%c15_145] : memref<81xf32, #tpu.memory_space<smem>>
    %623 = vector.broadcast %622 : f32 to vector<1x16x16xf32>
    %624 = arith.mulf %623, %621 : vector<1x16x16xf32>
    %625 = arith.addf %610, %624 : vector<1x16x16xf32>
    %c42_146 = arith.constant 42 : index
    %626 = memref.load %arg4[%c42_146] : memref<81xf32, #tpu.memory_space<smem>>
    %627 = vector.broadcast %626 : f32 to vector<1x16x16xf32>
    %628 = arith.mulf %627, %621 : vector<1x16x16xf32>
    %629 = arith.addf %614, %628 : vector<1x16x16xf32>
    %c69_147 = arith.constant 69 : index
    %630 = memref.load %arg4[%c69_147] : memref<81xf32, #tpu.memory_space<smem>>
    %631 = vector.broadcast %630 : f32 to vector<1x16x16xf32>
    %632 = arith.mulf %631, %621 : vector<1x16x16xf32>
    %633 = arith.addf %618, %632 : vector<1x16x16xf32>
    %634 = vector.extract_strided_slice %619 {offsets = [0, 0, 0], sizes = [1, 16, 16], strides = [1, 1, 1]} : vector<1x17x17xf32> to vector<1x16x16xf32>
    %c16_148 = arith.constant 16 : index
    %635 = memref.load %arg4[%c16_148] : memref<81xf32, #tpu.memory_space<smem>>
    %636 = vector.broadcast %635 : f32 to vector<1x16x16xf32>
    %637 = arith.mulf %636, %634 : vector<1x16x16xf32>
    %638 = arith.addf %625, %637 : vector<1x16x16xf32>
    %c43_149 = arith.constant 43 : index
    %639 = memref.load %arg4[%c43_149] : memref<81xf32, #tpu.memory_space<smem>>
    %640 = vector.broadcast %639 : f32 to vector<1x16x16xf32>
    %641 = arith.mulf %640, %634 : vector<1x16x16xf32>
    %642 = arith.addf %629, %641 : vector<1x16x16xf32>
    %c70_150 = arith.constant 70 : index
    %643 = memref.load %arg4[%c70_150] : memref<81xf32, #tpu.memory_space<smem>>
    %644 = vector.broadcast %643 : f32 to vector<1x16x16xf32>
    %645 = arith.mulf %644, %634 : vector<1x16x16xf32>
    %646 = arith.addf %633, %645 : vector<1x16x16xf32>
    %c16_i32_151 = arith.constant 16 : i32
    %647 = tpu.dynamic_rotate %619 by %c16_i32_151 dim 2 : vector<1x17x17xf32>, i32 -> vector<1x17x17xf32>
    %648 = vector.extract_strided_slice %647 {offsets = [0, 0, 0], sizes = [1, 16, 16], strides = [1, 1, 1]} : vector<1x17x17xf32> to vector<1x16x16xf32>
    %c17_152 = arith.constant 17 : index
    %649 = memref.load %arg4[%c17_152] : memref<81xf32, #tpu.memory_space<smem>>
    %650 = vector.broadcast %649 : f32 to vector<1x16x16xf32>
    %651 = arith.mulf %650, %648 : vector<1x16x16xf32>
    %652 = arith.addf %638, %651 : vector<1x16x16xf32>
    %c44_153 = arith.constant 44 : index
    %653 = memref.load %arg4[%c44_153] : memref<81xf32, #tpu.memory_space<smem>>
    %654 = vector.broadcast %653 : f32 to vector<1x16x16xf32>
    %655 = arith.mulf %654, %648 : vector<1x16x16xf32>
    %656 = arith.addf %642, %655 : vector<1x16x16xf32>
    %c71_154 = arith.constant 71 : index
    %657 = memref.load %arg4[%c71_154] : memref<81xf32, #tpu.memory_space<smem>>
    %658 = vector.broadcast %657 : f32 to vector<1x16x16xf32>
    %659 = arith.mulf %658, %648 : vector<1x16x16xf32>
    %660 = arith.addf %646, %659 : vector<1x16x16xf32>
    %c0_155 = arith.constant 0 : index
    %c2_156 = arith.constant 2 : index
    %c0_157 = arith.constant 0 : index
    %c0_158 = arith.constant 0 : index
    %661 = vector.load %arg8[%c0_155, %c2_156, %c0_157, %c0_158] : memref<1x3x17x17xf32, #tpu.memory_space<vmem>>, vector<1x1x17x17xf32>
    %662 = vector.shape_cast %661 : vector<1x1x17x17xf32> to vector<1x17x17xf32>
    %c1_i32_159 = arith.constant 1 : i32
    %663 = tpu.dynamic_rotate %662 by %c1_i32_159 dim 1 : vector<1x17x17xf32>, i32 -> vector<1x17x17xf32>
    %c1_i32_160 = arith.constant 1 : i32
    %664 = tpu.dynamic_rotate %663 by %c1_i32_160 dim 2 : vector<1x17x17xf32>, i32 -> vector<1x17x17xf32>
    %665 = vector.extract_strided_slice %664 {offsets = [0, 0, 0], sizes = [1, 16, 16], strides = [1, 1, 1]} : vector<1x17x17xf32> to vector<1x16x16xf32>
    %c18_161 = arith.constant 18 : index
    %666 = memref.load %arg4[%c18_161] : memref<81xf32, #tpu.memory_space<smem>>
    %667 = vector.broadcast %666 : f32 to vector<1x16x16xf32>
    %668 = arith.mulf %667, %665 : vector<1x16x16xf32>
    %669 = arith.addf %652, %668 : vector<1x16x16xf32>
    %c45_162 = arith.constant 45 : index
    %670 = memref.load %arg4[%c45_162] : memref<81xf32, #tpu.memory_space<smem>>
    %671 = vector.broadcast %670 : f32 to vector<1x16x16xf32>
    %672 = arith.mulf %671, %665 : vector<1x16x16xf32>
    %673 = arith.addf %656, %672 : vector<1x16x16xf32>
    %c72_163 = arith.constant 72 : index
    %674 = memref.load %arg4[%c72_163] : memref<81xf32, #tpu.memory_space<smem>>
    %675 = vector.broadcast %674 : f32 to vector<1x16x16xf32>
    %676 = arith.mulf %675, %665 : vector<1x16x16xf32>
    %677 = arith.addf %660, %676 : vector<1x16x16xf32>
    %678 = vector.extract_strided_slice %663 {offsets = [0, 0, 0], sizes = [1, 16, 16], strides = [1, 1, 1]} : vector<1x17x17xf32> to vector<1x16x16xf32>
    %c19_164 = arith.constant 19 : index
    %679 = memref.load %arg4[%c19_164] : memref<81xf32, #tpu.memory_space<smem>>
    %680 = vector.broadcast %679 : f32 to vector<1x16x16xf32>
    %681 = arith.mulf %680, %678 : vector<1x16x16xf32>
    %682 = arith.addf %669, %681 : vector<1x16x16xf32>
    %c46_165 = arith.constant 46 : index
    %683 = memref.load %arg4[%c46_165] : memref<81xf32, #tpu.memory_space<smem>>
    %684 = vector.broadcast %683 : f32 to vector<1x16x16xf32>
    %685 = arith.mulf %684, %678 : vector<1x16x16xf32>
    %686 = arith.addf %673, %685 : vector<1x16x16xf32>
    %c73_166 = arith.constant 73 : index
    %687 = memref.load %arg4[%c73_166] : memref<81xf32, #tpu.memory_space<smem>>
    %688 = vector.broadcast %687 : f32 to vector<1x16x16xf32>
    %689 = arith.mulf %688, %678 : vector<1x16x16xf32>
    %690 = arith.addf %677, %689 : vector<1x16x16xf32>
    %c16_i32_167 = arith.constant 16 : i32
    %691 = tpu.dynamic_rotate %663 by %c16_i32_167 dim 2 : vector<1x17x17xf32>, i32 -> vector<1x17x17xf32>
    %692 = vector.extract_strided_slice %691 {offsets = [0, 0, 0], sizes = [1, 16, 16], strides = [1, 1, 1]} : vector<1x17x17xf32> to vector<1x16x16xf32>
    %c20_168 = arith.constant 20 : index
    %693 = memref.load %arg4[%c20_168] : memref<81xf32, #tpu.memory_space<smem>>
    %694 = vector.broadcast %693 : f32 to vector<1x16x16xf32>
    %695 = arith.mulf %694, %692 : vector<1x16x16xf32>
    %696 = arith.addf %682, %695 : vector<1x16x16xf32>
    %c47_169 = arith.constant 47 : index
    %697 = memref.load %arg4[%c47_169] : memref<81xf32, #tpu.memory_space<smem>>
    %698 = vector.broadcast %697 : f32 to vector<1x16x16xf32>
    %699 = arith.mulf %698, %692 : vector<1x16x16xf32>
    %700 = arith.addf %686, %699 : vector<1x16x16xf32>
    %c74_170 = arith.constant 74 : index
    %701 = memref.load %arg4[%c74_170] : memref<81xf32, #tpu.memory_space<smem>>
    %702 = vector.broadcast %701 : f32 to vector<1x16x16xf32>
    %703 = arith.mulf %702, %692 : vector<1x16x16xf32>
    %704 = arith.addf %690, %703 : vector<1x16x16xf32>
    %c1_i32_171 = arith.constant 1 : i32
    %705 = tpu.dynamic_rotate %662 by %c1_i32_171 dim 2 : vector<1x17x17xf32>, i32 -> vector<1x17x17xf32>
    %706 = vector.extract_strided_slice %705 {offsets = [0, 0, 0], sizes = [1, 16, 16], strides = [1, 1, 1]} : vector<1x17x17xf32> to vector<1x16x16xf32>
    %c21_172 = arith.constant 21 : index
    %707 = memref.load %arg4[%c21_172] : memref<81xf32, #tpu.memory_space<smem>>
    %708 = vector.broadcast %707 : f32 to vector<1x16x16xf32>
    %709 = arith.mulf %708, %706 : vector<1x16x16xf32>
    %710 = arith.addf %696, %709 : vector<1x16x16xf32>
    %c48_173 = arith.constant 48 : index
    %711 = memref.load %arg4[%c48_173] : memref<81xf32, #tpu.memory_space<smem>>
    %712 = vector.broadcast %711 : f32 to vector<1x16x16xf32>
    %713 = arith.mulf %712, %706 : vector<1x16x16xf32>
    %714 = arith.addf %700, %713 : vector<1x16x16xf32>
    %c75_174 = arith.constant 75 : index
    %715 = memref.load %arg4[%c75_174] : memref<81xf32, #tpu.memory_space<smem>>
    %716 = vector.broadcast %715 : f32 to vector<1x16x16xf32>
    %717 = arith.mulf %716, %706 : vector<1x16x16xf32>
    %718 = arith.addf %704, %717 : vector<1x16x16xf32>
    %719 = vector.extract_strided_slice %662 {offsets = [0, 0, 0], sizes = [1, 16, 16], strides = [1, 1, 1]} : vector<1x17x17xf32> to vector<1x16x16xf32>
    %c22_175 = arith.constant 22 : index
    %720 = memref.load %arg4[%c22_175] : memref<81xf32, #tpu.memory_space<smem>>
    %721 = vector.broadcast %720 : f32 to vector<1x16x16xf32>
    %722 = arith.mulf %721, %719 : vector<1x16x16xf32>
    %723 = arith.addf %710, %722 : vector<1x16x16xf32>
    %c49_176 = arith.constant 49 : index
    %724 = memref.load %arg4[%c49_176] : memref<81xf32, #tpu.memory_space<smem>>
    %725 = vector.broadcast %724 : f32 to vector<1x16x16xf32>
    %726 = arith.mulf %725, %719 : vector<1x16x16xf32>
    %727 = arith.addf %714, %726 : vector<1x16x16xf32>
    %c76_177 = arith.constant 76 : index
    %728 = memref.load %arg4[%c76_177] : memref<81xf32, #tpu.memory_space<smem>>
    %729 = vector.broadcast %728 : f32 to vector<1x16x16xf32>
    %730 = arith.mulf %729, %719 : vector<1x16x16xf32>
    %731 = arith.addf %718, %730 : vector<1x16x16xf32>
    %c16_i32_178 = arith.constant 16 : i32
    %732 = tpu.dynamic_rotate %662 by %c16_i32_178 dim 2 : vector<1x17x17xf32>, i32 -> vector<1x17x17xf32>
    %733 = vector.extract_strided_slice %732 {offsets = [0, 0, 0], sizes = [1, 16, 16], strides = [1, 1, 1]} : vector<1x17x17xf32> to vector<1x16x16xf32>
    %c23_179 = arith.constant 23 : index
    %734 = memref.load %arg4[%c23_179] : memref<81xf32, #tpu.memory_space<smem>>
    %735 = vector.broadcast %734 : f32 to vector<1x16x16xf32>
    %736 = arith.mulf %735, %733 : vector<1x16x16xf32>
    %737 = arith.addf %723, %736 : vector<1x16x16xf32>
    %c50_180 = arith.constant 50 : index
    %738 = memref.load %arg4[%c50_180] : memref<81xf32, #tpu.memory_space<smem>>
    %739 = vector.broadcast %738 : f32 to vector<1x16x16xf32>
    %740 = arith.mulf %739, %733 : vector<1x16x16xf32>
    %741 = arith.addf %727, %740 : vector<1x16x16xf32>
    %c77_181 = arith.constant 77 : index
    %742 = memref.load %arg4[%c77_181] : memref<81xf32, #tpu.memory_space<smem>>
    %743 = vector.broadcast %742 : f32 to vector<1x16x16xf32>
    %744 = arith.mulf %743, %733 : vector<1x16x16xf32>
    %745 = arith.addf %731, %744 : vector<1x16x16xf32>
    %c16_i32_182 = arith.constant 16 : i32
    %746 = tpu.dynamic_rotate %662 by %c16_i32_182 dim 1 : vector<1x17x17xf32>, i32 -> vector<1x17x17xf32>
    %c1_i32_183 = arith.constant 1 : i32
    %747 = tpu.dynamic_rotate %746 by %c1_i32_183 dim 2 : vector<1x17x17xf32>, i32 -> vector<1x17x17xf32>
    %748 = vector.extract_strided_slice %747 {offsets = [0, 0, 0], sizes = [1, 16, 16], strides = [1, 1, 1]} : vector<1x17x17xf32> to vector<1x16x16xf32>
    %c24_184 = arith.constant 24 : index
    %749 = memref.load %arg4[%c24_184] : memref<81xf32, #tpu.memory_space<smem>>
    %750 = vector.broadcast %749 : f32 to vector<1x16x16xf32>
    %751 = arith.mulf %750, %748 : vector<1x16x16xf32>
    %752 = arith.addf %737, %751 : vector<1x16x16xf32>
    %c51_185 = arith.constant 51 : index
    %753 = memref.load %arg4[%c51_185] : memref<81xf32, #tpu.memory_space<smem>>
    %754 = vector.broadcast %753 : f32 to vector<1x16x16xf32>
    %755 = arith.mulf %754, %748 : vector<1x16x16xf32>
    %756 = arith.addf %741, %755 : vector<1x16x16xf32>
    %c78_186 = arith.constant 78 : index
    %757 = memref.load %arg4[%c78_186] : memref<81xf32, #tpu.memory_space<smem>>
    %758 = vector.broadcast %757 : f32 to vector<1x16x16xf32>
    %759 = arith.mulf %758, %748 : vector<1x16x16xf32>
    %760 = arith.addf %745, %759 : vector<1x16x16xf32>
    %761 = vector.extract_strided_slice %746 {offsets = [0, 0, 0], sizes = [1, 16, 16], strides = [1, 1, 1]} : vector<1x17x17xf32> to vector<1x16x16xf32>
    %c25_187 = arith.constant 25 : index
    %762 = memref.load %arg4[%c25_187] : memref<81xf32, #tpu.memory_space<smem>>
    %763 = vector.broadcast %762 : f32 to vector<1x16x16xf32>
    %764 = arith.mulf %763, %761 : vector<1x16x16xf32>
    %765 = arith.addf %752, %764 : vector<1x16x16xf32>
    %c52_188 = arith.constant 52 : index
    %766 = memref.load %arg4[%c52_188] : memref<81xf32, #tpu.memory_space<smem>>
    %767 = vector.broadcast %766 : f32 to vector<1x16x16xf32>
    %768 = arith.mulf %767, %761 : vector<1x16x16xf32>
    %769 = arith.addf %756, %768 : vector<1x16x16xf32>
    %c79_189 = arith.constant 79 : index
    %770 = memref.load %arg4[%c79_189] : memref<81xf32, #tpu.memory_space<smem>>
    %771 = vector.broadcast %770 : f32 to vector<1x16x16xf32>
    %772 = arith.mulf %771, %761 : vector<1x16x16xf32>
    %773 = arith.addf %760, %772 : vector<1x16x16xf32>
    %c16_i32_190 = arith.constant 16 : i32
    %774 = tpu.dynamic_rotate %746 by %c16_i32_190 dim 2 : vector<1x17x17xf32>, i32 -> vector<1x17x17xf32>
    %775 = vector.extract_strided_slice %774 {offsets = [0, 0, 0], sizes = [1, 16, 16], strides = [1, 1, 1]} : vector<1x17x17xf32> to vector<1x16x16xf32>
    %c26_191 = arith.constant 26 : index
    %776 = memref.load %arg4[%c26_191] : memref<81xf32, #tpu.memory_space<smem>>
    %777 = vector.broadcast %776 : f32 to vector<1x16x16xf32>
    %778 = arith.mulf %777, %775 : vector<1x16x16xf32>
    %779 = arith.addf %765, %778 : vector<1x16x16xf32>
    %c53_192 = arith.constant 53 : index
    %780 = memref.load %arg4[%c53_192] : memref<81xf32, #tpu.memory_space<smem>>
    %781 = vector.broadcast %780 : f32 to vector<1x16x16xf32>
    %782 = arith.mulf %781, %775 : vector<1x16x16xf32>
    %783 = arith.addf %769, %782 : vector<1x16x16xf32>
    %c80_193 = arith.constant 80 : index
    %784 = memref.load %arg4[%c80_193] : memref<81xf32, #tpu.memory_space<smem>>
    %785 = vector.broadcast %784 : f32 to vector<1x16x16xf32>
    %786 = arith.mulf %785, %775 : vector<1x16x16xf32>
    %787 = arith.addf %773, %786 : vector<1x16x16xf32>
    %c0_194 = arith.constant 0 : index
    %788 = memref.load %arg5[%c0_194] : memref<3xf32, #tpu.memory_space<smem>>
    %789 = vector.broadcast %788 : f32 to vector<1x16x16xf32>
    %790 = arith.addf %779, %789 : vector<1x16x16xf32>
    %c1_195 = arith.constant 1 : index
    %791 = memref.load %arg5[%c1_195] : memref<3xf32, #tpu.memory_space<smem>>
    %792 = vector.broadcast %791 : f32 to vector<1x16x16xf32>
    %793 = arith.addf %783, %792 : vector<1x16x16xf32>
    %c2_196 = arith.constant 2 : index
    %794 = memref.load %arg5[%c2_196] : memref<3xf32, #tpu.memory_space<smem>>
    %795 = vector.broadcast %794 : f32 to vector<1x16x16xf32>
    %796 = arith.addf %787, %795 : vector<1x16x16xf32>
    %cst_197 = arith.constant 0.000000e+00 : f32
    %797 = vector.broadcast %cst_197 : f32 to vector<1x16x16xf32>
    %798 = arith.maximumf %790, %797 : vector<1x16x16xf32>
    %c0_198 = arith.constant 0 : index
    %c0_199 = arith.constant 0 : index
    %c0_200 = arith.constant 0 : index
    %c0_201 = arith.constant 0 : index
    %799 = vector.load %arg7[%c0_198, %c0_199, %c0_200, %c0_201] : memref<1x3x17x17xf32, #tpu.memory_space<vmem>>, vector<1x1x16x16xf32>
    %800 = vector.shape_cast %799 : vector<1x1x16x16xf32> to vector<1x16x16xf32>
    %801 = arith.addf %798, %800 : vector<1x16x16xf32>
    %c0_202 = arith.constant 0 : index
    %c0_203 = arith.constant 0 : index
    %c0_204 = arith.constant 0 : index
    %c0_205 = arith.constant 0 : index
    %802 = vector.load %arg6[%c0_202, %c0_203, %c0_204, %c0_205] : memref<1x3x16x16xf32, #tpu.memory_space<vmem>>, vector<1x1x16x16xf32>
    %803 = vector.shape_cast %802 : vector<1x1x16x16xf32> to vector<1x16x16xf32>
    %804 = vector.shape_cast %801 : vector<1x16x16xf32> to vector<1x1x16x16xf32>
    tpu.vector_store %arg6[%c0_202, %c0_203, %c0_204, %c0_205], %804 {strides = array<i32>} : memref<1x3x16x16xf32, #tpu.memory_space<vmem>>, vector<1x1x16x16xf32>,
    %cst_206 = arith.constant 0.000000e+00 : f32
    %805 = vector.broadcast %cst_206 : f32 to vector<1x16x16xf32>
    %806 = arith.maximumf %793, %805 : vector<1x16x16xf32>
    %c0_207 = arith.constant 0 : index
    %c1_208 = arith.constant 1 : index
    %c0_209 = arith.constant 0 : index
    %c0_210 = arith.constant 0 : index
    %807 = vector.load %arg7[%c0_207, %c1_208, %c0_209, %c0_210] : memref<1x3x17x17xf32, #tpu.memory_space<vmem>>, vector<1x1x16x16xf32>
    %808 = vector.shape_cast %807 : vector<1x1x16x16xf32> to vector<1x16x16xf32>
    %809 = arith.addf %806, %808 : vector<1x16x16xf32>
    %c0_211 = arith.constant 0 : index
    %c1_212 = arith.constant 1 : index
    %c0_213 = arith.constant 0 : index
    %c0_214 = arith.constant 0 : index
    %810 = vector.load %arg6[%c0_211, %c1_212, %c0_213, %c0_214] : memref<1x3x16x16xf32, #tpu.memory_space<vmem>>, vector<1x1x16x16xf32>
    %811 = vector.shape_cast %810 : vector<1x1x16x16xf32> to vector<1x16x16xf32>
    %812 = vector.shape_cast %809 : vector<1x16x16xf32> to vector<1x1x16x16xf32>
    tpu.vector_store %arg6[%c0_211, %c1_212, %c0_213, %c0_214], %812 {strides = array<i32>} : memref<1x3x16x16xf32, #tpu.memory_space<vmem>>, vector<1x1x16x16xf32>,
    %cst_215 = arith.constant 0.000000e+00 : f32
    %813 = vector.broadcast %cst_215 : f32 to vector<1x16x16xf32>
    %814 = arith.maximumf %796, %813 : vector<1x16x16xf32>
    %c0_216 = arith.constant 0 : index
    %c2_217 = arith.constant 2 : index
    %c0_218 = arith.constant 0 : index
    %c0_219 = arith.constant 0 : index
    %815 = vector.load %arg7[%c0_216, %c2_217, %c0_218, %c0_219] : memref<1x3x17x17xf32, #tpu.memory_space<vmem>>, vector<1x1x16x16xf32>
    %816 = vector.shape_cast %815 : vector<1x1x16x16xf32> to vector<1x16x16xf32>
    %817 = arith.addf %814, %816 : vector<1x16x16xf32>
    %c0_220 = arith.constant 0 : index
    %c2_221 = arith.constant 2 : index
    %c0_222 = arith.constant 0 : index
    %c0_223 = arith.constant 0 : index
    %818 = vector.load %arg6[%c0_220, %c2_221, %c0_222, %c0_223] : memref<1x3x16x16xf32, #tpu.memory_space<vmem>>, vector<1x1x16x16xf32>
    %819 = vector.shape_cast %818 : vector<1x1x16x16xf32> to vector<1x16x16xf32>
    %820 = vector.shape_cast %817 : vector<1x16x16xf32> to vector<1x1x16x16xf32>
    tpu.vector_store %arg6[%c0_220, %c2_221, %c0_222, %c0_223], %820 {strides = array<i32>} : memref<1x3x16x16xf32, #tpu.memory_space<vmem>>, vector<1x1x16x16xf32>,
    return
  }
  func.func @transform_0(%arg0: i32) -> (i32, i32, i32, i32) {
    %c0_i32 = arith.constant 0 : i32
    %c0_i32_0 = arith.constant 0 : i32
    %c0_i32_1 = arith.constant 0 : i32
    %c0_i32_2 = arith.constant 0 : i32
    return %arg0, %c0_i32, %c0_i32_0, %c0_i32_1 : i32, i32, i32, i32
  }
  func.func @transform_1(%arg0: i32) -> i32 {
    %c0_i32 = arith.constant 0 : i32
    %c0_i32_0 = arith.constant 0 : i32
    return %c0_i32 : i32
  }
  func.func @transform_2(%arg0: i32) -> i32 {
    %c0_i32 = arith.constant 0 : i32
    %c0_i32_0 = arith.constant 0 : i32
    return %c0_i32 : i32
  }
  func.func @transform_3(%arg0: i32) -> i32 {
    %c0_i32 = arith.constant 0 : i32
    %c0_i32_0 = arith.constant 0 : i32
    return %c0_i32 : i32
  }
  func.func @transform_4(%arg0: i32) -> i32 {
    %c0_i32 = arith.constant 0 : i32
    %c0_i32_0 = arith.constant 0 : i32
    return %c0_i32 : i32
  }
  func.func @transform_5(%arg0: i32) -> (i32, i32, i32, i32) {
    %c0_i32 = arith.constant 0 : i32
    %c0_i32_0 = arith.constant 0 : i32
    %c0_i32_1 = arith.constant 0 : i32
    %c0_i32_2 = arith.constant 0 : i32
    return %arg0, %c0_i32, %c0_i32_0, %c0_i32_1 : i32, i32, i32, i32
  }
}

</mosaic_0001>

<bundles_post_ra>
// kernel: tpu_custom_call.1
= control target key start
LH: loop header
LB: loop body
LE: loop exit
PB: predicated region body
PF: predicated region fallthrough
CT: control target
= control target key end

     0   :  { %s5668_s0 = inlined_call_operand.hbm [shape: f32[2,3,16,16], index: 0, kind: input, shape index: {}]   ;;  %s5669_s1 = inlined_call_operand.vmem [shape: f32[81], index: 1, kind: input, shape index: {}]   ;;  %s5670_s2 = inlined_call_operand.vmem [shape: f32[3], index: 2, kind: input, shape index: {}]   ;;  %s5671_s3 = inlined_call_operand.vmem [shape: f32[81], index: 3, kind: input, shape index: {}]   ;;  %s5672_s4 = inlined_call_operand.vmem [shape: f32[3], index: 4, kind: input, shape index: {}]   ;;  %s5673_s5 = inlined_call_operand.hbm [shape: f32[2,3,16,16], index: 5, kind: output, shape index: {}]  }
   0x1   :  { %5707 = sst [smem:[#allocation63_spill]] %s5668_s0 }
   0x2   :  { %10 = vsyncpa [#allocation5], 0 }
   0x3   :  { %12 = vsyncpa [#allocation5 + $0x1], 0 }
   0x4   :  { %13 = vsyncpa [#allocation7], 0 }
   0x5   :  { %14 = vsyncpa [#allocation10], 0 }
   0x6   :  { %15 = vsyncpa [#allocation13], 0 }
   0x7   :  { %16 = vsyncpa [#allocation6], 0 }
   0x8   :  { %18 = vsyncpa [#allocation6 + $0x1], 0  ;;  %s3373_s18 = smov 0   ;;  %s3375_s19 = smov 0  }
   0x9   :  { %s3377_s20 = smov 0   ;;  %s3379_s21 = smov 0  }
   0xa LB: > { %s3394_s22 = sadd.s32 4294967295, %s3326_s21   ;;  %s2872_s23 = sadd.s32 4294967294, %s3326_s21   ;;  %s3326_s21 = sphi %s3379_s21, %s5888_s21   ;;  %s3322_s20 = sphi %s3377_s20, %s5887_s20   ;;  %s3318_s19 = sphi %s3375_s19, %s5886_s19   ;;  %s3314_s18 = sphi %s3373_s18, %s5885_s18  }
   0xb   : > { %p44_p0 = scmp.ne.s32.totalorder %s3318_s19, %s3314_s18  ;;  %p5674_p1 = scmp.eq.s32.totalorder %s3394_s22, 0 }
   0xc   : > { %p158_p3 = scmp.eq.s32.totalorder %s2872_s23, 1  ;;  %p2873_p5 = scmp.ge.s32.totalorder %s3326_s21, 1 }
   0xd   : > { %p3403_p4 = por %p5674_p1, %p44_p0  ;;  %p165_p7 = scmp.lt.s32.totalorder %s3326_s21, 3 }
   0xe   : > { %p3408_p6 = por %p158_p3, %p44_p0  ;;  %s189_s28 = sshll.u32 %s5670_s2, 4  ;;  %s190_s28 = int_to_ptr.vmem [resolvable:$true] %s189_s28 }
   0xf   : > { %s5708_s24 = scalar_select %p3403_p4, 1, 0 }
  0x10   : > { %s5709_s25 = scalar_select %p3408_p6, 1, 0 }
  0x11   : > { %p3416_p8 = pnand %p2873_p5, %p165_p7  ;;  %s178_s7 = sshll.u32 %s5669_s1, 4  ;;  %s179_s7 = int_to_ptr.vmem [resolvable:$true] %s178_s7 }
  0x12   : > { %s200_s11 = sshll.u32 %s5671_s3, 4  ;;  %s211_s14 = sshll.u32 %s5672_s4, 4  ;;  %s3435_s11 = int_to_ptr.vmem [resolvable:$true] %s200_s11  ;;  %s212_s14 = int_to_ptr.vmem [resolvable:$true] %s211_s14 }
  0x13   : > { %s5710_s29 = scalar_select %p3416_p8, 1, 0 }
  0x14   : > { %p3080_p10 = pneg %p3416_p8  ;;  %s3158_s15 = scalar_lea.vmem %s190_s28, 16 }
  0x15   : > { %p3159_p12 = scmp.ne.s32.totalorder %s190_s28, %s3158_s15  ;;  %p3166_p5 = scmp.lt.s32.totalorder %s190_s28, %s190_s28 }
  0x16   : > { %p3428_p11 = pnand %p3080_p10, %p5674_p1  ;;  %p3167_p7 = scmp.lt.s32.totalorder %s3158_s15, %s3158_s15 }
  0x18   : > { %p3160_p13 = pneg %p3428_p11  ;;  %p3168_p10 = por %p3167_p7, %p3166_p5 }
  0x1a   : > { %p3161_p0 = pnand %p3160_p13, %p3159_p12 }
  0x1c   : > { %p3162_p3 = pneg %p3161_p0 }
  0x1e   : > { %p3169_p9 = pnand %p3168_p10, %p3162_p3 }
  0x20   : > { %3172 = shalt.err (!%p3169_p9)
}
  0x21   : > { %s3328_s16 = smov [#allocation9]   ;;  %s3173_s17 = scalar_lea.vmem %s179_s7, 16 }
  0x22   : > { %3086 = dma.vmem_to_smem (!%p3428_p11), %s190_s28, 16, %s3328_s16, [#allocation10]  }
  0x23   : > { %p3174_p1 = scmp.ne.s32.totalorder %s179_s7, %s3173_s17  ;;  %p3181_p4 = scmp.lt.s32.totalorder %s179_s7, %s179_s7 }
  0x24   : > { %p3182_p8 = scmp.lt.s32.totalorder %s3173_s17, %s3173_s17 }
  0x25   : > { %p3176_p2 = pnand %p3174_p1, %p3160_p13 }
  0x26   : > { %p3183_p12 = por %p3182_p8, %p3181_p4 }
  0x27   : > { %p3177_p6 = pneg %p3176_p2 }
  0x29   : > { %p3184_p0 = pnand %p3183_p12, %p3177_p6 }
  0x2b   : > { %3187 = shalt.err (!%p3184_p0)
}
  0x2c   : > { %s3329_s23 = smov [#allocation8]   ;;  %s3188_s26 = scalar_lea.vmem %s3435_s11, 16 }
  0x2d   : > { %3083 = dma.vmem_to_smem (!%p3428_p11), %s179_s7, 16, %s3329_s23, [#allocation7]  }
  0x2e   : > { %p3189_p9 = scmp.ne.s32.totalorder %s3435_s11, %s3188_s26  ;;  %p3196_p2 = scmp.lt.s32.totalorder %s3435_s11, %s3435_s11 }
  0x2f   : > { %p3197_p5 = scmp.lt.s32.totalorder %s3188_s26, %s3188_s26 }
  0x30   : > { %p3191_p3 = pnand %p3189_p9, %p3160_p13 }
  0x31   : > { %p3198_p4 = por %p3197_p5, %p3196_p2 }
  0x32   : > { %p3192_p1 = pneg %p3191_p3 }
  0x34   : > { %p3199_p6 = pnand %p3198_p4, %p3192_p1 }
  0x36   : > { %3202 = shalt.err (!%p3199_p6)
}
  0x37   : > { %s3330_s27 = smov [#allocation11]   ;;  %s3203_s6 = scalar_lea.vmem %s212_s14, 16 }
  0x38   : > { %3089 = dma.vmem_to_smem (!%p3428_p11), %s3435_s11, 16, %s3330_s27, [#allocation10]  }
  0x39   : > { %p3204_p8 = scmp.ne.s32.totalorder %s212_s14, %s3203_s6  ;;  %p3211_p12 = scmp.lt.s32.totalorder %s212_s14, %s212_s14 }
  0x3a   : > { %p3212_p0 = scmp.lt.s32.totalorder %s3203_s6, %s3203_s6 }
  0x3b   : > { %p3206_p7 = pnand %p3204_p8, %p3160_p13 }
  0x3c   : > { %p3213_p9 = por %p3212_p0, %p3211_p12 }
  0x3d   : > { %p3207_p10 = pneg %p3206_p7 }
  0x3f   : > { %p3214_p3 = pnand %p3213_p9, %p3207_p10 }
  0x41   : > { %3217 = shalt.err (!%p3214_p3)
}
  0x42   : > { %s3331_s7 = smov [#allocation12]   ;;  %s3472_s9 = sadd.s32 1, %s3326_s21  }
  0x43   : > { %3092 = dma.vmem_to_smem (!%p3428_p11), %s212_s14, 16, %s3331_s7, [#allocation13]  }
  0x44   : > { %s28_s10 = ssub.s32 %s3326_s21, %s3472_s9  ;;  %s31_s11 = sadd.s32 1, %s3322_s20 }
  0x45   : > { %p29_p13 = scmp.eq.s32.totalorder %s28_s10, 0  ;;  %p38_p1 = scmp.ne.s32.totalorder %s3322_s20, %s3318_s19 }
  0x46   : > { %p39_p2 = scmp.eq.s32.totalorder %s3326_s21, 0  ;;  %p5712_p4 = scmp.eq.s32.totalorder %s3394_s22, 1 }
  0x47   : > { %s3481_s8 = scalar_select %p29_p13, %s3322_s20, %s31_s11  }
  0x48   : > { %p40_p5 = por %p39_p2, %p38_p1  ;;  %p3485_p6 = por %p5712_p4, %p38_p1 }
  0x49   : > { %p3105_p8 = scmp.lt.s32.totalorder %s3326_s21, 2  ;;  %s222_s13 = sand.u32 1, %s3322_s20  }
  0x4a   : > { %s3056_s15 = smul.u32 48, %s222_s13  ;;  %s5715_s0 = sld [smem:[#allocation63_spill]] }
  0x4b   : > { %s3057_s14 = smul.u32 768, %s3326_s21  ;;  %p3492_p11 = pnand %p3105_p8, %p40_p5 }
  0x4c   : > { %s226_s27 = scalar_lea.vmem [#allocation4], %s3056_s15  ;;  %s3503_s30 = scalar_lea.sflag [#allocation5], %s222_s13 }
  0x4d   : > { %s233_s28 = sshll.u32 %s226_s27, 4  ;;  %p3220_p10 = pneg %p3492_p11  ;;  %s3501_s28 = int_to_ptr.vmem [resolvable:$true] %s233_s28 }
  0x50   : > { %s3499_s26 = scalar_lea.hbm %s5715_s0, %s3057_s14  ;;  %s3223_s11 = scalar_lea.hbm %s5715_s0, 1536 }
  0x51   : > { %s3218_s6 = scalar_lea.hbm %s3499_s26, 768  ;;  %p3224_p9 = scmp.lt.u32.totalorder %s3499_s26, %s5715_s0 }
  0x52   : > { %p3219_p7 = scmp.ne.s32.totalorder %s3499_s26, %s3218_s6  ;;  %p3225_p3 = scmp.lt.u32.totalorder %s3223_s11, %s3218_s6 }
  0x53   : > { %p3227_p1 = scmp.lt.u32.totalorder %s3218_s6, %s3499_s26 }
  0x54   : > { %p3221_p12 = pnand %p3220_p10, %p3219_p7  ;;  %p3226_p13 = por %p3225_p3, %p3224_p9 }
  0x56   : > { %p3222_p0 = pneg %p3221_p12  ;;  %p3228_p2 = por %p3227_p1, %p3226_p13 }
  0x58   : > { %p3229_p5 = pnand %p3228_p2, %p3222_p0 }
  0x5a   : > { %3232 = shalt.err (!%p3229_p5)
}
  0x5b   : > { %s3233_s13 = scalar_lea.vmem %s3501_s28, 768  ;;  %s3332_s15 = smov [#allocation4]  }
  0x5c   : > { %p3234_p4 = scmp.ne.s32.totalorder %s3501_s28, %s3233_s13  ;;  %s3238_s23 = sshll.u32 %s3332_s15, 4  ;;  %s3239_s23 = int_to_ptr.vmem [resolvable:$false] %s3238_s23 }
  0x5d   : > { %s3240_s27 = scalar_lea.vmem %s3239_s23, 1536  ;;  %p3241_p12 = scmp.lt.s32.totalorder %s3501_s28, %s3239_s23 }
  0x5e   : > { %p3236_p8 = pnand %p3234_p4, %p3220_p10  ;;  %p3242_p9 = scmp.lt.s32.totalorder %s3240_s27, %s3233_s13 }
  0x60   : > { %p3237_p7 = pneg %p3236_p8  ;;  %p3243_p3 = por %p3242_p9, %p3241_p12 }
  0x62   : > { %p3244_p13 = pnand %p3243_p3, %p3237_p7 }
  0x64   : > { %3247 = shalt.err (!%p3244_p13)
}
  0x65   : > { %s3333_s6 = smov 128   ;;  %s3334_s7 = smov 8  }
  0x66   : > { %3096 = dma.hbm_to_vmem [thread:$0]  (!%p3492_p11), %s3499_s26, 768, %s3501_s28, %s3503_s30, %s3333_s6, %s3333_s6, %s3334_s7  }
  0x67   : > { %p5716_p10 = scmp.ne.s32.totalorder %s5710_s29, 0 }
  0x69   : > { %245 = sbr.rel (%p5716_p10) target bundleno = 1414 (0x586), region = 40 }
  0x70   : > { %s3534_s10 = sand.u32 1, %s3318_s19   ;;  %p5717_p0 = scmp.ne.s32.totalorder %s5708_s24, 0 }
  0x71   : > { %s5704_s11 = smul.u32 48, %s3534_s10  ;;  %s248_s14 = scalar_lea.sflag [#allocation5], %s3534_s10 }
  0x73   : > { %s3540_s17 = scalar_lea.vmem [#allocation4], %s5704_s11 }
  0x74   : > { %3293 = dma.done.wait (%p5717_p0), %s248_s14, 768  }
  0x75   : > { %3295 = vsyncadd (%p5717_p0), %s248_s14, 4294966528  ;;  %p5718_p11 = scmp.eq.s32.totalorder %s3394_s22, 0 }
  0x77   : > { %3297 = dma.done.wait (%p5718_p11), [#allocation7], 16   ;;  %p5719_p1 = pmov %p5718_p11 }
  0x79   : > { %3299 = vsyncadd (%p5719_p1), [#allocation7], 4294967280  ;;  %p5720_p2 = pmov %p5719_p1 }
  0x7a   : > { %p5721_p5 = pmov %p5719_p1 }
  0x7b   : > { %3301 = dma.done.wait (%p5720_p2), [#allocation10], 32  }
  0x7c   : > { %3303 = vsyncadd (%p5721_p5), [#allocation10], 4294967264  ;;  %p5722_p4 = pmov %p5719_p1 }
  0x7d   : > { %p5723_p8 = pmov %p5719_p1 }
  0x7e   : > { %3305 = dma.done.wait (%p5722_p4), [#allocation13], 16  }
  0x7f   : > { %3307 = vsyncadd (%p5723_p8), [#allocation13], 4294967280 }
  0x80   : > { %272 = sfence }
  0x81   : > { %vm295_vm0 = vcmask 131072   ;;  %vm299_vm1 = vcmask 138368   ;;  %vm302_vm2 = vcmask 131200   ;;  %v322_v0 = vld [vmem:[%s3540_s17] sm:$0xff]  ;;  %v3335_v1 = vmov 0.0   ;;  %v323_v2 = vld [vmem:[%s3540_s17 + $0x8] sm:$0xff] }
  0x82   : > { %296 = vst.msk [vmem:[#allocation2 + $0x10] sm:$0x1] %vm295_vm0, %v3335_v1  ;;  %vm328_vm3 = vcmask 130048   ;;  %297 = vst.msk [vmem:[#allocation2 + $0x28] sm:$0x1] %vm295_vm0, %v3335_v1  ;;  %s3581_s24 = sld [smem:[#allocation8 + $0x1]] }
  0x83   : > { %300 = vst.msk [vmem:[#allocation2] sm:$0xff] %vm299_vm1, %v3335_v1  ;;  %301 = vst.msk [vmem:[#allocation2 + $0x8] sm:$0xff] %vm299_vm1, %v3335_v1  ;;  %v324_v3 = vld [vmem:[%s3540_s17 + $0x10] sm:$0xff]  ;;  %v325_v4 = vld [vmem:[%s3540_s17 + $0x18] sm:$0xff]  ;;  %s2888_s29 = sld [smem:[#allocation8 + $0x1c]]  ;;  %s2889_s16 = sld [smem:[#allocation8 + $0x37]] }
  0x84   : > { %298 = vst.msk [vmem:[#allocation2 + $0x40] sm:$0x1] %vm295_vm0, %v3335_v1  ;;  %310 = vst.msk [vmem:[#allocation3 + $0x10] sm:$0x1] %vm295_vm0, %v3335_v1  ;;  %v326_v5 = vld [vmem:[%s3540_s17 + $0x20] sm:$0xff]  ;;  %v327_v6 = vld [vmem:[%s3540_s17 + $0x28] sm:$0xff] }
  0x85   : > { %304 = vst.msk [vmem:[#allocation2 + $0x18] sm:$0xff] %vm299_vm1, %v3335_v1  ;;  %305 = vst.msk [vmem:[#allocation2 + $0x20] sm:$0xff] %vm299_vm1, %v3335_v1  ;;  %vm338_vm4 = vcmask 1047553   ;;  %s3336_s26 = smov 17   ;;  %s3337_s28 = smov 16   ;;  %vm569_vm5 = vcmask 1046528  }
  0x86   : > { %307 = vst.msk [vmem:[#allocation2 + $0x30] sm:$0xff] %vm299_vm1, %v3335_v1  ;;  %308 = vst.msk [vmem:[#allocation2 + $0x38] sm:$0xff] %vm299_vm1, %v3335_v1  ;;  %s2896_s30 = sld [smem:[#allocation8 + $0x4]]  ;;  %s3686_s13 = sld [smem:[#allocation8 + $0x1f]]  ;;  %vm343_vm6 = vcmask 1047688  }
  0x87   : > { %311 = vst.msk [vmem:[#allocation3 + $0x28] sm:$0x1] %vm295_vm0, %v3335_v1  ;;  %312 = vst.msk [vmem:[#allocation3 + $0x40] sm:$0x1] %vm295_vm0, %v3335_v1  ;;  %s2905_s15 = sld [smem:[#allocation8 + $0x7]]  ;;  %s3698_s23 = sld [smem:[#allocation8 + $0x3a]] }
  0x88   : > { %313 = vst.msk [vmem:[#allocation3] sm:$0xff] %vm299_vm1, %v3335_v1  ;;  %314 = vst.msk [vmem:[#allocation3 + $0x8] sm:$0xff] %vm299_vm1, %v3335_v1  ;;  %v369_v12 = vstv %s3581_s24  ;;  %s2906_s27 = sld [smem:[#allocation8 + $0x22]]  ;;  %s2907_s6 = sld [smem:[#allocation8 + $0x3d]] }
  0x89   : > { %316 = vst.msk [vmem:[#allocation3 + $0x18] sm:$0xff] %vm299_vm1, %v3335_v1  ;;  %317 = vst.msk [vmem:[#allocation3 + $0x20] sm:$0xff] %vm299_vm1, %v3335_v1  ;;  %v383_v15 = vstv %s2888_s29  ;;  %v397_v18 = vstv %s2889_s16  ;;  %s3731_s7 = sld [smem:[#allocation8 + $0xa]]  ;;  %s3738_s14 = sld [smem:[#allocation8 + $0x25]] }
  0x8a   : > { %319 = vst.msk [vmem:[#allocation3 + $0x30] sm:$0xff] %vm299_vm1, %v3335_v1  ;;  %320 = vst.msk [vmem:[#allocation3 + $0x38] sm:$0xff] %vm299_vm1, %v3335_v1  ;;  %s3746_s17 = sld [smem:[#allocation8 + $0x40]]  ;;  %s2923_s29 = sld [smem:[#allocation8 + $0xd]] }
  0x8b   : > { %303 = vst.msk [vmem:[#allocation2 + $0x10] sm:$0x1] %vm302_vm2, %v3335_v1  ;;  %306 = vst.msk [vmem:[#allocation2 + $0x28] sm:$0x1] %vm302_vm2, %v3335_v1  ;;  %s2932_s24 = sld [smem:[#allocation8 + $0x10]]  ;;  %s2941_s16 = sld [smem:[#allocation8 + $0x13]] }
  0x8c   : > { %329 = vst.msk [vmem:[#allocation2] sm:$0xff] %vm328_vm3, %v322_v0  ;;  %330 = vst.msk [vmem:[#allocation2 + $0x8] sm:$0xff] %vm328_vm3, %v323_v2  ;;  %v483_v50 = vstv %s2896_s30  ;;  %v497_v52 = vstv %s3686_s13  ;;  %s2924_s30 = sld [smem:[#allocation8 + $0x28]]  ;;  %s2933_s13 = sld [smem:[#allocation8 + $0x2b]] }
  0x8d   : > { %309 = vst.msk [vmem:[#allocation2 + $0x40] sm:$0x1] %vm302_vm2, %v3335_v1  ;;  %315 = vst.msk [vmem:[#allocation3 + $0x10] sm:$0x1] %vm302_vm2, %v3335_v1  ;;  %v608_v54 = vstv %s2905_s15  ;;  %v511_v57 = vstv %s3698_s23  ;;  %s2950_s15 = sld [smem:[#allocation8 + $0x16]]  ;;  %s2959_s23 = sld [smem:[#allocation8 + $0x19]] }
  0x8e   : > { %318 = vst.msk [vmem:[#allocation3 + $0x28] sm:$0x1] %vm302_vm2, %v3335_v1  ;;  %321 = vst.msk [vmem:[#allocation3 + $0x40] sm:$0x1] %vm302_vm2, %v3335_v1  ;;  %v629_v60 = vstv %s2906_s27  ;;  %s2942_s27 = sld [smem:[#allocation8 + $0x2e]]  ;;  %s5440_s11 = sld [smem:[#allocation11 + $0x30]] }
  0x8f   : > { %331 = vst.msk [vmem:[#allocation2 + $0x18] sm:$0xff] %vm328_vm3, %v324_v3  ;;  %332 = vst.msk [vmem:[#allocation2 + $0x20] sm:$0xff] %vm328_vm3, %v325_v4  ;;  %v650_v4 = vstv %s2907_s6  ;;  %s2925_s6 = sld [smem:[#allocation8 + $0x43]] }
  0x90   : > { %333 = vst.msk [vmem:[#allocation2 + $0x30] sm:$0xff] %vm328_vm3, %v326_v5  ;;  %334 = vst.msk [vmem:[#allocation2 + $0x38] sm:$0xff] %vm328_vm3, %v327_v6  ;;  %s5448_s0 = sld [smem:[#allocation11 + $0x4b]] }
  0x92   : > { %v337_v8 = vld [vmem:[#allocation2 + $0x10] sm:$0x1]  ;;  %v715_v30 = vld [vmem:[#allocation2 + $0x28] sm:$0x1] }
  0x93   : > { %v3596_v7 = vld [vmem:[#allocation2] sm:$0xff]  ;;  %v3598_v9 = vld [vmem:[#allocation2 + $0x8] sm:$0xff] }
  0x94   : > { %v339_v10 = vrot.slane %v3596_v7, 7  ;;  %v340_v11 = vrot.slane %v3598_v9, 7  ;;  %v570_v22 = vrot.slane %v3596_v7, 1  ;;  %v571_v23 = vrot.slane %v3598_v9, 1  ;;  %v1096_v40 = vld [vmem:[#allocation2 + $0x40] sm:$0x1] }
  0x95   : > { %v485_v51 = vmul.f32 %v483_v50, %v3598_v9  ;;  %v484_v53 = vmul.f32 %v483_v50, %v3596_v7  ;;  %v499_v56 = vmul.f32 %v497_v52, %v3598_v9  ;;  %v610_v58 = vmul.f32 %v608_v54, %v3598_v9 }
  0x96   : > { %v3604_v13 = vsel %vm338_vm4, %v339_v10, %v337_v8  ;;  %v3607_v14 = vsel %vm338_vm4, %v340_v11, %v339_v10  ;;  %v3626_v25 = vld [vmem:[#allocation2 + $0x18] sm:$0xff]  ;;  %v3628_v26 = vld [vmem:[#allocation2 + $0x20] sm:$0xff]  ;;  %v3633_v27 = vsel %vm569_vm5, %v570_v22, %v571_v23  ;;  %v513_v62 = vmul.f32 %v511_v57, %v3598_v9 }
  0x97   : > { %344 = vrot.lane.b32.xlu0 %v3604_v13, %s3336_s26  ;;  %v371_v16 = vmul.f32 %v369_v12, %v3607_v14  ;;  %v385_v17 = vmul.f32 %v383_v15, %v3607_v14  ;;  %v370_v19 = vmul.f32 %v369_v12, %v3604_v13  ;;  %v399_v20 = vmul.f32 %v397_v18, %v3607_v14  ;;  %v3658_v37 = vld [vmem:[#allocation2 + $0x30] sm:$0xff]  ;;  %v3671_v42 = vld [vmem:[#allocation2 + $0x38] sm:$0xff] }
  0x98   : > { %v384_v21 = vmul.f32 %v383_v15, %v3604_v13  ;;  %v398_v24 = vmul.f32 %v397_v18, %v3604_v13  ;;  %v716_v28 = vrot.slane %v3626_v25, 7  ;;  %v717_v29 = vrot.slane %v3628_v26, 7 }
  0x99   : > { %376 = vrot.lane.b32.xlu1 %v371_v16, %s3337_s28  ;;  %v573_v31 = vrot.slane %v3604_v13, 1  ;;  %v952_v35 = vrot.slane %v3628_v26, 1  ;;  %v1097_v39 = vrot.slane %v3658_v37, 7  ;;  %v951_v41 = vrot.slane %v3626_v25, 1 }
  0x9a   : > { %v3642_v32 = vsel %vm338_vm4, %v717_v29, %v716_v28  ;;  %v3647_v33 = vsel %vm338_vm4, %v716_v28, %v715_v30  ;;  %v1098_v45 = vrot.slane %v3671_v42, 7  ;;  %v1332_v46 = vrot.slane %v3658_v37, 1 }
  0x9b   : > { %347 = vrot.lane.b32.xlu0 %v3607_v14, %s3336_s26  ;;  %v3650_v34 = vsel %vm569_vm5, %v571_v23, %v573_v31  ;;  %v954_v36 = vrot.slane %v3647_v33, 1  ;;  %v3674_v43 = vsel %vm338_vm4, %v1097_v39, %v1096_v40  ;;  %v3679_v44 = vsel %vm569_vm5, %v951_v41, %v952_v35 }
  0x9c   : > { %v1333_v47 = vrot.slane %v3671_v42, 1  ;;  %v3691_v48 = vsel %vm338_vm4, %v1098_v45, %v1097_v39  ;;  %v1335_v55 = vrot.slane %v3674_v43, 1  ;;  %v611_v59 = vmul.f32 %v608_v54, %v3604_v13 }
  0x9d   : > { %390 = vrot.lane.b32.xlu1 %v385_v17, %s3337_s28  ;;  %v3663_v38 = vsel %vm569_vm5, %v952_v35, %v954_v36  ;;  %v631_v63 = vmul.f32 %v629_v60, %v3598_v9  ;;  %v616_v0 = vrot.slane %v610_v58, 1  ;;  %v632_v2 = vmul.f32 %v629_v60, %v3604_v13 }
  0x9e   : > { %v3696_v49 = vsel %vm569_vm5, %v1332_v46, %v1333_v47  ;;  %v3717_v61 = vsel %vm569_vm5, %v1333_v47, %v1335_v55  ;;  %v618_v1 = vrot.slane %v611_v59, 1  ;;  %v498_v3 = vmul.f32 %v497_v52, %v3596_v7 }
  0x9f   : > { %374 = vrot.lane.b32.xlu0 %v370_v19, %s3337_s28  ;;  %v609_v5 = vmul.f32 %v608_v54, %v3596_v7  ;;  %v637_v6 = vrot.slane %v631_v63, 1  ;;  %v639_v10 = vrot.slane %v632_v2, 1  ;;  %v652_v11 = vmul.f32 %v650_v4, %v3598_v9 }
  0xa0   : > { %v619_v8 = vsel %vm569_vm5, %v616_v0, %v618_v1  ;;  %v653_v12 = vmul.f32 %v650_v4, %v3604_v13  ;;  %v512_v15 = vmul.f32 %v511_v57, %v3596_v7  ;;  %v630_v17 = vmul.f32 %v629_v60, %v3596_v7 }
  0xa1   : > { %404 = vrot.lane.b32.xlu1 %v399_v20, %s3337_s28  ;;  %v615_v16 = vrot.slane %v609_v5, 1  ;;  %v640_v18 = vsel %vm569_vm5, %v637_v6, %v639_v10  ;;  %v658_v19 = vrot.slane %v652_v11, 1  ;;  %v651_v23 = vmul.f32 %v650_v4, %v3596_v7 }
  0xa2   : > { %v660_v20 = vrot.slane %v653_v12, 1  ;;  %v636_v22 = vrot.slane %v630_v17, 1  ;;  %v751_v28 = vstv %s3731_s7  ;;  %v765_v35 = vstv %s3738_s14  ;;  %s2951_s7 = sld [smem:[#allocation8 + $0x31]]  ;;  %s2899_s14 = sld [smem:[#allocation8 + $0x5]] }
  0xa3   : > { %388 = vrot.lane.b32.xlu0 %v384_v21, %s3337_s28  ;;  %v617_v21 = vsel %vm569_vm5, %v615_v16, %v616_v0  ;;  %v657_v30 = vrot.slane %v651_v23, 1  ;;  %v753_v31 = vmul.f32 %v751_v28, %v3642_v32  ;;  %v767_v39 = vmul.f32 %v765_v35, %v3642_v32 }
  0xa4   : > { %v638_v29 = vsel %vm569_vm5, %v636_v22, %v637_v6  ;;  %v779_v40 = vstv %s3746_s17  ;;  %v752_v41 = vmul.f32 %v751_v28, %v3647_v33  ;;  %v989_v45 = vstv %s2932_s24  ;;  %s2900_s17 = sld [smem:[#allocation8 + $0x20]]  ;;  %s2901_s24 = sld [smem:[#allocation8 + $0x3b]] }
  0xa5   : > { %455 = vrot.lane.b32.xlu1 %v3598_v9, %s3336_s26  ;;  %v659_v36 = vsel %vm569_vm5, %v657_v30, %v658_v19  ;;  %v781_v46 = vmul.f32 %v779_v40, %v3642_v32  ;;  %v865_v47 = vstv %s2923_s29  ;;  %v991_v50 = vmul.f32 %v989_v45, %v3628_v26  ;;  %s3338_s29 = smov 15  }
  0xa6   : > { %v766_v52 = vmul.f32 %v765_v35, %v3647_v33  ;;  %v990_v57 = vmul.f32 %v989_v45, %v3626_v25  ;;  %v1132_v59 = vstv %s2941_s16  ;;  %v866_v60 = vmul.f32 %v865_v47, %v3626_v25  ;;  %s2926_s16 = sld [smem:[#allocation8 + $0xe]] }
  0xa7   : > { %402 = vrot.lane.b32.xlu0 %v398_v24, %s3337_s28  ;;  %v661_v24 = vsel %vm569_vm5, %v658_v19, %v660_v20  ;;  %v997_v54 = vrot.slane %v991_v50, 1  ;;  %v1134_v63 = vmul.f32 %v1132_v59, %v3691_v48  ;;  %v879_v0 = vstv %s2924_s30  ;;  %s2927_s30 = sld [smem:[#allocation8 + $0x29]] }
  0xa8   : > { %v881_v2 = vmul.f32 %v879_v0, %v3628_v26  ;;  %v880_v4 = vmul.f32 %v879_v0, %v3626_v25 }
  0xa9   : > { %577 = vrot.lane.b32.xlu1 %v3633_v27, %s3336_s26 }
  0xab   : > { %452 = vrot.lane.b32.xlu0 %v3596_v7, %s3336_s26 }
  0xad   : > { %723 = vrot.lane.b32.xlu1 %v3642_v32, %s3336_s26 }
  0xaf   : > { %580 = vrot.lane.b32.xlu0 %v3650_v34, %s3336_s26 }
  0xb1   : > { %834 = vrot.lane.b32.xlu1 %v3626_v25, %s3336_s26 }
  0xb3   : > { %720 = vrot.lane.b32.xlu0 %v3647_v33, %s3336_s26 }
  0xb5   : > { %961 = vrot.lane.b32.xlu1 %v3663_v38, %s3336_s26 }
  0xb7   : > { %837 = vrot.lane.b32.xlu0 %v3628_v26, %s3336_s26 }
  0xb9   : > { %1101 = vrot.lane.b32.xlu1 %v3674_v43, %s3336_s26 }
  0xbb   : > { %958 = vrot.lane.b32.xlu0 %v3679_v44, %s3336_s26 }
  0xbd   : > { %1218 = vrot.lane.b32.xlu1 %v3671_v42, %s3336_s26 }
  0xbf   : > { %1104 = vrot.lane.b32.xlu0 %v3691_v48, %s3336_s26 }
  0xc1   : > { %1339 = vrot.lane.b32.xlu1 %v3696_v49, %s3336_s26 }
  0xc3   : > { %1215 = vrot.lane.b32.xlu0 %v3658_v37, %s3336_s26 }
  0xc5   : > { %490 = vrot.lane.b32.xlu1 %v485_v51, %s3337_s28  ;;  %v992_v51 = vmul.f32 %v989_v45, %v3647_v33 }
  0xc7   : > { %488 = vrot.lane.b32.xlu0 %v484_v53, %s3337_s28  ;;  %v867_v53 = vmul.f32 %v865_v47, %v3628_v26  ;;  %v999_v55 = vrot.slane %v992_v51, 1 }
  0xc9   : > { %504 = vrot.lane.b32.xlu1 %v499_v56, %s3337_s28  ;;  %v780_v56 = vmul.f32 %v779_v40, %v3647_v33  ;;  %v1000_v58 = vsel %vm569_vm5, %v997_v54, %v999_v55 }
  0xcb   : > { %1342 = vrot.lane.b32.xlu0 %v3717_v61, %s3336_s26 }
  0xcd   : > { %518 = vrot.lane.b32.xlu1 %v513_v62, %s3337_s28  ;;  %v996_v62 = vrot.slane %v990_v57, 1 }
  0xcf   : > { %502 = vrot.lane.b32.xlu0 %v498_v3, %s3337_s28  ;;  %v998_v1 = vsel %vm569_vm5, %v996_v62, %v997_v54  ;;  %v1133_v3 = vmul.f32 %v1132_v59, %v3674_v43 }
  0xd1   : > { %622 = vrot.lane.b32.xlu1 %v619_v8, %s3337_s28 }
  0xd3   : > { %516 = vrot.lane.b32.xlu0 %v512_v15, %s3337_s28 }
  0xd5   : > { %643 = vrot.lane.b32.xlu1 %v640_v18, %s3337_s28 }
  0xd7   : > { %620 = vrot.lane.b32.xlu0 %v617_v21, %s3337_s28 }
  0xd9   : > { %664 = vrot.lane.b32.xlu1 %v661_v24, %s3337_s28 }
  0xdb   : > { %641 = vrot.lane.b32.xlu0 %v638_v29, %s3337_s28 }
  0xdd   : > { %758 = vrot.lane.b32.xlu1 %v753_v31, %s3337_s28 }
  0xdf   : > { %662 = vrot.lane.b32.xlu0 %v659_v36, %s3337_s28 }
  0xe1   : > { %772 = vrot.lane.b32.xlu1 %v767_v39, %s3337_s28 }
  0xe3   : > { %756 = vrot.lane.b32.xlu0 %v752_v41, %s3337_s28 }
  0xe5   : > { %786 = vrot.lane.b32.xlu1 %v781_v46, %s3337_s28 }
  0xe7   : > { %770 = vrot.lane.b32.xlu0 %v766_v52, %s3337_s28 }
  0xe9   : > { %872 = vrot.lane.b32.xlu1 %v867_v53, %s3337_s28 }
  0xeb   : > { %784 = vrot.lane.b32.xlu0 %v780_v56, %s3337_s28 }
  0xed   : > { %1003 = vrot.lane.b32.xlu1 %v1000_v58, %s3337_s28 }
  0xef   : > { %870 = vrot.lane.b32.xlu0 %v866_v60, %s3337_s28 }
  0xf1   : > { %1139 = vrot.lane.b32.xlu1 %v1134_v63, %s3337_s28 }
  0xf3   : > { %1001 = vrot.lane.b32.xlu0 %v998_v1, %s3337_s28 }
  0xf5   : > { %886 = vrot.lane.b32.xlu1 %v881_v2, %s3337_s28  ;;  %v1010_v2 = vstv %s2933_s13  ;;  %s2953_s13 = sld [smem:[#allocation8 + $0x17]] }
  0xf7   : > { %1137 = vrot.lane.b32.xlu0 %v1133_v3, %s3337_s28 }
  0xfb   : > { %884 = vrot.lane.b32.xlu0 %v880_v4, %s3337_s28  ;;  %v1011_v4 = vmul.f32 %v1010_v2, %v3626_v25 }
 0x109   : > { %v345_v5 = vpop.permute.xlu0 %344 }
 0x10a   : > { %v346_v46 = vsel %vm343_vm6, %v345_v5, %v3604_v13 }
 0x10b   : > { %v3787_v6 = vpop.permute.xlu1 %376 }
 0x10d   : > { %v348_v8 = vpop.permute.xlu0 %347 }
 0x10e   : > { %v349_v51 = vsel %vm343_vm6, %v348_v8, %v3607_v14 }
 0x10f   : > { %v3789_v10 = vpop.permute.xlu1 %390 }
 0x111   : > { %v3791_v11 = vpop.permute.xlu0 %374 }
 0x113   : > { %v3793_v12 = vpop.permute.xlu1 %404 }
 0x115   : > { %v3795_v15 = vpop.permute.xlu0 %388 }
 0x117   : > { %v456_v16 = vpop.permute.xlu1 %455 }
 0x118   : > { %v457_v17 = vsel %vm343_vm6, %v456_v16, %v3598_v9  ;;  %v1246_v16 = vstv %s2950_s15  ;;  %s2928_s15 = sld [smem:[#allocation8 + $0x44]] }
 0x119   : > { %460 = vrot.lane.b32.xlu1 %v457_v17, %s3336_s26  ;;  %v3800_v18 = vpop.permute.xlu0 %402  ;;  %v1012_v17 = vmul.f32 %v1010_v2, %v3628_v26 }
 0x11b   : > { %v578_v19 = vpop.permute.xlu1 %577 }
 0x11c   : > { %v579_v54 = vsel %vm343_vm6, %v578_v19, %v3633_v27  ;;  %v1013_v19 = vmul.f32 %v1010_v2, %v3647_v33  ;;  %v1260_v2 = vstv %s2951_s7  ;;  %s2892_s7 = sld [smem:[#allocation8 + $0x38]] }
 0x11d   : > { %v453_v20 = vpop.permute.xlu0 %452 }
 0x11e   : > { %v454_v21 = vsel %vm343_vm6, %v453_v20, %v3596_v7  ;;  %v1247_v20 = vmul.f32 %v1246_v16, %v3658_v37 }
 0x11f   : > { %v724_v22 = vpop.permute.xlu1 %723  ;;  %458 = vrot.lane.b32.xlu0 %v454_v21, %s3336_s26  ;;  %v1370_v21 = vstv %s2959_s23  ;;  %s2954_s23 = sld [smem:[#allocation8 + $0x32]] }
 0x120   : > { %v725_v58 = vsel %vm343_vm6, %v724_v22, %v3642_v32 }
 0x121   : > { %v581_v23 = vpop.permute.xlu0 %580 }
 0x122   : > { %v582_v0 = vsel %vm343_vm6, %v581_v23, %v3650_v34  ;;  %v1017_v23 = vrot.slane %v1011_v4, 1 }
 0x123   : > { %v835_v24 = vpop.permute.xlu1 %834 }
 0x124   : > { %v836_v28 = vsel %vm343_vm6, %v835_v24, %v3626_v25  ;;  %v1371_v24 = vmul.f32 %v1370_v21, %v3658_v37 }
 0x125   : > { %v721_v29 = vpop.permute.xlu0 %720  ;;  %840 = vrot.lane.b32.xlu1 %v836_v28, %s3336_s26  ;;  %v1248_v28 = vmul.f32 %v1246_v16, %v3671_v42 }
 0x126   : > { %v722_v53 = vsel %vm343_vm6, %v721_v29, %v3647_v33  ;;  %v1018_v29 = vrot.slane %v1012_v17, 1  ;;  %v1262_v17 = vmul.f32 %v1260_v2, %v3671_v42 }
 0x127   : > { %v962_v30 = vpop.permute.xlu1 %961 }
 0x128   : > { %v963_v22 = vsel %vm343_vm6, %v962_v30, %v3663_v38  ;;  %v1019_v30 = vsel %vm569_vm5, %v1017_v23, %v1018_v29 }
 0x129   : > { %v838_v31 = vpop.permute.xlu0 %837 }
 0x12a   : > { %v839_v35 = vsel %vm343_vm6, %v838_v31, %v3628_v26  ;;  %v1020_v31 = vrot.slane %v1013_v19, 1 }
 0x12b   : > { %v1102_v36 = vpop.permute.xlu1 %1101  ;;  %842 = vrot.lane.b32.xlu0 %v839_v35, %s3336_s26  ;;  %v1372_v35 = vmul.f32 %v1370_v21, %v3671_v42 }
 0x12c   : > { %v1103_v63 = vsel %vm343_vm6, %v1102_v36, %v3674_v43  ;;  %v1373_v36 = vmul.f32 %v1370_v21, %v3674_v43 }
 0x12d   : > { %v959_v39 = vpop.permute.xlu0 %958 }
 0x12e   : > { %v960_v57 = vsel %vm343_vm6, %v959_v39, %v3679_v44 }
 0x12f   : > { %v1219_v40 = vpop.permute.xlu1 %1218 }
 0x130   : > { %v1220_v41 = vsel %vm343_vm6, %v1219_v40, %v3671_v42 }
 0x131   : > { %1223 = vrot.lane.b32.xlu1 %v1220_v41, %s3336_s26  ;;  %v1105_v45 = vpop.permute.xlu0 %1104  ;;  %v1377_v41 = vrot.slane %v1371_v24, 1 }
 0x132   : > { %v1106_v59 = vsel %vm343_vm6, %v1105_v45, %v3691_v48  ;;  %v1021_v45 = vsel %vm569_vm5, %v1018_v29, %v1020_v31 }
 0x133   : > { %v1340_v52 = vpop.permute.xlu1 %1339 }
 0x134   : > { %v1341_v1 = vsel %vm343_vm6, %v1340_v52, %v3696_v49 }
 0x135   : > { %350 = vrot.lane.b32.xlu1 %v346_v46, %s3336_s26  ;;  %v1216_v47 = vpop.permute.xlu0 %1215  ;;  %v1378_v46 = vrot.slane %v1372_v35, 1 }
 0x136   : > { %v1217_v50 = vsel %vm343_vm6, %v1216_v47, %v3658_v37  ;;  %v1380_v47 = vrot.slane %v1373_v36, 1 }
 0x137   : > { %1221 = vrot.lane.b32.xlu0 %v1217_v50, %s3336_s26  ;;  %v3829_v55 = vpop.permute.xlu1 %490  ;;  %v1379_v50 = vsel %vm569_vm5, %v1377_v41, %v1378_v46  ;;  %v525_v41 = vstv %s2899_s14  ;;  %s4001_s14 = sld [smem:[#allocation8 + $0xb]] }
 0x139   : > { %352 = vrot.lane.b32.xlu1 %v349_v51, %s3336_s26  ;;  %v3831_v56 = vpop.permute.xlu0 %488 }
 0x13b   : > { %726 = vrot.lane.b32.xlu0 %v722_v53, %s3336_s26  ;;  %v3842_v60 = vpop.permute.xlu1 %504  ;;  %v1381_v53 = vsel %vm569_vm5, %v1378_v46, %v1380_v47 }
 0x13d   : > { %583 = vrot.lane.b32.xlu1 %v579_v54, %s3336_s26  ;;  %v1343_v62 = vpop.permute.xlu0 %1342  ;;  %v1146_v54 = vstv %s2942_s27  ;;  %s2890_s27 = sld [smem:[#allocation8 + $0x2]] }
 0x13e   : > { %v1344_v3 = vsel %vm343_vm6, %v1343_v62, %v3717_v61 }
 0x13f   : > { %964 = vrot.lane.b32.xlu0 %v960_v57, %s3336_s26  ;;  %v3856_v5 = vpop.permute.xlu1 %518  ;;  %v1147_v57 = vmul.f32 %v1146_v54, %v3674_v43 }
 0x141   : > { %728 = vrot.lane.b32.xlu1 %v725_v58, %s3336_s26  ;;  %v3858_v8 = vpop.permute.xlu0 %502  ;;  %v1148_v58 = vmul.f32 %v1146_v54, %v3691_v48 }
 0x143   : > { %1109 = vrot.lane.b32.xlu0 %v1106_v59, %s3336_s26  ;;  %v3871_v39 = vpop.permute.xlu1 %622  ;;  %v893_v59 = vstv %s2925_s6  ;;  %s2891_s6 = sld [smem:[#allocation8 + $0x1d]] }
 0x145   : > { %1107 = vrot.lane.b32.xlu1 %v1103_v63, %s3336_s26  ;;  %v3873_v40 = vpop.permute.xlu0 %516 }
 0x147   : > { %585 = vrot.lane.b32.xlu0 %v582_v0, %s3336_s26  ;;  %v3881_v51 = vpop.permute.xlu1 %643  ;;  %v894_v0 = vmul.f32 %v893_v59, %v3626_v25 }
 0x148   : > { %5724 = vst [vmem:[#allocation20_spill] sm:$0xff] %v3881_v51 }
 0x149   : > { %1345 = vrot.lane.b32.xlu1 %v1341_v1, %s3336_s26  ;;  %v3883_v52 = vpop.permute.xlu0 %620  ;;  %v895_v1 = vmul.f32 %v893_v59, %v3628_v26  ;;  %v553_v59 = vstv %s2901_s24  ;;  %s4009_s24 = sld [smem:[#allocation8 + $0x26]] }
 0x14b   : > { %1347 = vrot.lane.b32.xlu0 %v1344_v3, %s3336_s26  ;;  %v3891_v62 = vpop.permute.xlu1 %664  ;;  %v1261_v3 = vmul.f32 %v1260_v2, %v3658_v37 }
 0x14c   : > { %5725 = vst [vmem:[#allocation21_spill] sm:$0xff] %v3891_v62 }
 0x14d   : > { %966 = vrot.lane.b32.xlu1 %v963_v22, %s3336_s26  ;;  %v3893_v63 = vpop.permute.xlu0 %641 }
 0x14f   : > { %1251 = vrot.lane.b32.xlu0 %v1247_v20, %s3337_s28  ;;  %v3901_v4 = vpop.permute.xlu1 %758 }
 0x150   : > { %5726 = vst [vmem:[#allocation22_spill] sm:$0xff] %v3901_v4 }
 0x151   : > { %1253 = vrot.lane.b32.xlu1 %v1248_v28, %s3337_s28  ;;  %v3903_v16 = vpop.permute.xlu0 %662 }
 0x153   : > { %1022 = vrot.lane.b32.xlu0 %v1019_v30, %s3337_s28  ;;  %v3909_v19 = vpop.permute.xlu1 %772 }
 0x154   : > { %5727 = vst [vmem:[#allocation23_spill] sm:$0xff] %v3909_v19 }
 0x155   : > { %1024 = vrot.lane.b32.xlu1 %v1021_v45, %s3337_s28  ;;  %v3911_v20 = vpop.permute.xlu0 %756 }
 0x157   : > { %1382 = vrot.lane.b32.xlu0 %v1379_v50, %s3337_s28  ;;  %v3913_v21 = vpop.permute.xlu1 %786 }
 0x158   : > { %5728 = vst [vmem:[#allocation24_spill] sm:$0xff] %v3913_v21 }
 0x159   : > { %1384 = vrot.lane.b32.xlu1 %v1381_v53, %s3337_s28  ;;  %v3915_v22 = vpop.permute.xlu0 %770  ;;  %v539_v53 = vstv %s2900_s17  ;;  %s4005_s17 = sld [smem:[#allocation8 + $0x8]] }
 0x15b   : > { %1151 = vrot.lane.b32.xlu0 %v1147_v57, %s3337_s28  ;;  %v3917_v23 = vpop.permute.xlu1 %872 }
 0x15c   : > { %5729 = vst [vmem:[#allocation25_spill] sm:$0xff] %v3917_v23 }
 0x15d   : > { %1153 = vrot.lane.b32.xlu1 %v1148_v58, %s3337_s28  ;;  %v3919_v24 = vpop.permute.xlu0 %784 }
 0x15e   : > { %5730 = vst [vmem:[#allocation26_spill] sm:$0xff] %v3919_v24 }
 0x15f   : > { %898 = vrot.lane.b32.xlu0 %v894_v0, %s3337_s28  ;;  %v3921_v28 = vpop.permute.xlu1 %1003 }
 0x160   : > { %5731 = vst [vmem:[#allocation27_spill] sm:$0xff] %v3921_v28 }
 0x161   : > { %900 = vrot.lane.b32.xlu1 %v895_v1, %s3337_s28  ;;  %v3923_v29 = vpop.permute.xlu0 %870 }
 0x163   : > { %1265 = vrot.lane.b32.xlu0 %v1261_v3, %s3337_s28  ;;  %v3925_v31 = vpop.permute.xlu1 %1139 }
 0x164   : > { %5732 = vst [vmem:[#allocation28_spill] sm:$0xff] %v3925_v31  ;;  %v411_v31 = vstv %s2890_s27  ;;  %s4059_s27 = sld [smem:[#allocation8 + $0x11]] }
 0x165   : > { %1267 = vrot.lane.b32.xlu1 %v1262_v17, %s3337_s28  ;;  %v3927_v35 = vpop.permute.xlu0 %1001  ;;  %v907_v17 = vstv %s2926_s16  ;;  %s2934_s16 = sld [smem:[#allocation8 + $0x46]] }
 0x167   : > { %v3929_v36 = vpop.permute.xlu1 %886 }
 0x168   : > { %5733 = vst [vmem:[#allocation29_spill] sm:$0xff] %v3929_v36 }
 0x169   : > { %v3931_v30 = vpop.permute.xlu0 %1137 }
 0x16a   : > { %5734 = vst [vmem:[#allocation30_spill] sm:$0xff] %v3931_v30 }
 0x16b   : > { %v4040_v24 = vstv %s2934_s16  ;;  %s2963_s16 = sld [smem:[#allocation8 + $0x35]] }
 0x16d   : > { %v3933_v46 = vpop.permute.xlu0 %884 }
 0x16e   : > { %5735 = vst [vmem:[#allocation31_spill] sm:$0xff] %v3933_v46  ;;  %v1052_v46 = vstv %s4059_s27  ;;  %s4187_s27 = sld [smem:[#allocation8 + $0x4d]] }
 0x18b   : > { %v461_v45 = vpop.permute.xlu1 %460 }
 0x18c   : > { %v3937_v47 = vsel %vm343_vm6, %v461_v45, %v3598_v9 }
 0x18d   : > { %v527_v50 = vmul.f32 %v525_v41, %v3937_v47  ;;  %v541_v57 = vmul.f32 %v539_v53, %v3937_v47  ;;  %v555_v9 = vmul.f32 %v553_v59, %v3937_v47 }
 0x18f   : > { %532 = vrot.lane.b32.xlu1 %v527_v50, %s3338_s29 }
 0x191   : > { %v459_v54 = vpop.permute.xlu0 %458 }
 0x192   : > { %v3944_v58 = vsel %vm343_vm6, %v459_v54, %v3596_v7  ;;  %v921_v54 = vstv %s2927_s30  ;;  %s4017_s30 = sld [smem:[#allocation8 + $0x23]] }
 0x193   : > { %546 = vrot.lane.b32.xlu1 %v541_v57, %s3338_s29  ;;  %v526_v0 = vmul.f32 %v525_v41, %v3944_v58  ;;  %v540_v1 = vmul.f32 %v539_v53, %v3944_v58  ;;  %v554_v7 = vmul.f32 %v553_v59, %v3944_v58  ;;  %v1288_v57 = vstv %s2953_s13  ;;  %s4019_s13 = sld [smem:[#allocation8 + $0x14]] }
 0x195   : > { %530 = vrot.lane.b32.xlu0 %v526_v0, %s3338_s29 }
 0x197   : > { %560 = vrot.lane.b32.xlu1 %v555_v9, %s3338_s29  ;;  %v841_v2 = vpop.permute.xlu1 %840 }
 0x198   : > { %v3956_v3 = vsel %vm343_vm6, %v841_v2, %v3626_v25 }
 0x199   : > { %544 = vrot.lane.b32.xlu0 %v540_v1, %s3338_s29  ;;  %v908_v50 = vmul.f32 %v907_v17, %v3956_v3  ;;  %v922_v0 = vmul.f32 %v921_v54, %v3956_v3  ;;  %v1174_v36 = vstv %s4019_s13  ;;  %s4168_s13 = sld [smem:[#allocation8 + $0x4a]] }
 0x19d   : > { %558 = vrot.lane.b32.xlu0 %v554_v7, %s3338_s29  ;;  %v843_v41 = vpop.permute.xlu0 %842 }
 0x19e   : > { %v3961_v45 = vsel %vm343_vm6, %v843_v41, %v3628_v26 }
 0x19f   : > { %5736 = vst [vmem:[#allocation32_spill] sm:$0xff] %v3961_v45  ;;  %v909_v53 = vmul.f32 %v907_v17, %v3961_v45  ;;  %v923_v9 = vmul.f32 %v921_v54, %v3961_v45 }
 0x1a1   : > { %912 = vrot.lane.b32.xlu0 %v908_v50, %s3338_s29  ;;  %914 = vrot.lane.b32.xlu1 %v909_v53, %s3338_s29  ;;  %v935_v50 = vstv %s2928_s15  ;;  %s4031_s15 = sld [smem:[#allocation8 + $0x3e]] }
 0x1a2   : > { %v937_v53 = vmul.f32 %v935_v50, %v3961_v45 }
 0x1a3   : > { %v1224_v59 = vpop.permute.xlu1 %1223 }
 0x1a4   : > { %v3971_v1 = vsel %vm343_vm6, %v1224_v59, %v3671_v42  ;;  %v1302_v59 = vstv %s2954_s23  ;;  %s4036_s23 = sld [smem:[#allocation8 + $0x41]] }
 0x1a5   : > { %5737 = vst [vmem:[#allocation33_spill] sm:$0xff] %v3971_v1  ;;  %926 = vrot.lane.b32.xlu0 %v922_v0, %s3338_s29  ;;  %928 = vrot.lane.b32.xlu1 %v923_v9, %s3338_s29  ;;  %v1290_v2 = vmul.f32 %v1288_v57, %v3971_v1  ;;  %v1304_v9 = vmul.f32 %v1302_v59, %v3971_v1 }
 0x1a7   : > { %v351_v7 = vpop.permute.xlu1 %350  ;;  %v699_v30 = vstv %s4031_s15  ;;  %s4174_s15 = sld [smem:[#allocation8 + $0x4c]] }
 0x1a8   : > { %v3997_v28 = vsel %vm343_vm6, %v351_v7, %v3604_v13  ;;  %v439_v13 = vstv %s2892_s7  ;;  %s4093_s7 = sld [smem:[#allocation8 + $0x2c]] }
 0x1a9   : > { %1295 = vrot.lane.b32.xlu1 %v1290_v2, %s3338_s29  ;;  %v1222_v17 = vpop.permute.xlu0 %1221  ;;  %v936_v2 = vmul.f32 %v935_v50, %v3956_v3 }
 0x1aa   : > { %v3979_v41 = vsel %vm343_vm6, %v1222_v17, %v3658_v37 }
 0x1ab   : > { %v1289_v54 = vmul.f32 %v1288_v57, %v3979_v41  ;;  %v353_v0 = vpop.permute.xlu1 %352  ;;  %v1303_v57 = vmul.f32 %v1302_v59, %v3979_v41  ;;  %v412_v59 = vmul.f32 %v411_v31, %v3997_v28 }
 0x1ac   : > { %v3989_v17 = vsel %vm343_vm6, %v353_v0, %v3607_v14  ;;  %v425_v14 = vstv %s2891_s6  ;;  %s4061_s6 = sld [smem:[#allocation8 + $0x2f]] }
 0x1ad   : > { %942 = vrot.lane.b32.xlu1 %v937_v53, %s3338_s29  ;;  %1293 = vrot.lane.b32.xlu0 %v1289_v54, %s3338_s29  ;;  %v413_v54 = vmul.f32 %v411_v31, %v3989_v17  ;;  %v727_v50 = vpop.permute.xlu0 %726  ;;  %v427_v0 = vmul.f32 %v425_v14, %v3989_v17 }
 0x1ae   : > { %v4071_v62 = vsel %vm343_vm6, %v727_v50, %v3647_v33 }
 0x1af   : > { %v584_v53 = vpop.permute.xlu1 %583 }
 0x1b1   : > { %1309 = vrot.lane.b32.xlu1 %v1304_v9, %s3338_s29  ;;  %940 = vrot.lane.b32.xlu0 %v936_v2, %s3338_s29  ;;  %v965_v7 = vpop.permute.xlu0 %964  ;;  %v441_v2 = vmul.f32 %v439_v13, %v3989_v17 }
 0x1b2   : > { %v1188_v4 = vstv %s4061_s6  ;;  %s2964_s6 = sld [smem:[#allocation8 + $0x50]] }
 0x1b3   : > { %v729_v9 = vpop.permute.xlu1 %728 }
 0x1b4   : > { %v4015_v31 = vsel %vm343_vm6, %v729_v9, %v3642_v32  ;;  %v671_v32 = vstv %s4005_s17  ;;  %s2960_s17 = sld [smem:[#allocation8 + $0x34]] }
 0x1b5   : > { %418 = vrot.lane.b32.xlu1 %v413_v54, %s3338_s29  ;;  %1307 = vrot.lane.b32.xlu0 %v1303_v57, %s3338_s29  ;;  %v426_v57 = vmul.f32 %v425_v14, %v3997_v28  ;;  %v793_v54 = vstv %s4001_s14  ;;  %v440_v14 = vmul.f32 %v439_v13, %v3997_v28  ;;  %v1110_v9 = vpop.permute.xlu0 %1109  ;;  %s4103_s14 = sld [smem:[#allocation8 + $0x1a]] }
 0x1b6   : > { %v794_v45 = vmul.f32 %v793_v54, %v4071_v62 }
 0x1b9   : > { %432 = vrot.lane.b32.xlu1 %v427_v0, %s3338_s29  ;;  %416 = vrot.lane.b32.xlu0 %v412_v59, %s3338_s29  ;;  %v795_v0 = vmul.f32 %v793_v54, %v4015_v31  ;;  %v4028_v59 = vsel %vm343_vm6, %v584_v53, %v3633_v27  ;;  %v4044_v27 = vsel %vm343_vm6, %v1110_v9, %v3691_v48  ;;  %v685_v53 = vstv %s4017_s30  ;;  %v586_v51 = vpop.permute.xlu0 %585  ;;  %s2943_s30 = sld [smem:[#allocation8 + $0x49]] }
 0x1ba   : > { %v672_v13 = vmul.f32 %v671_v32, %v4028_v59  ;;  %5738 = vst [vmem:[#allocation34_spill] sm:$0xff] %v4044_v27  ;;  %v686_v21 = vmul.f32 %v685_v53, %v4028_v59  ;;  %v1176_v23 = vmul.f32 %v1174_v36, %v4044_v27  ;;  %v4091_v50 = vsel %vm343_vm6, %v586_v51, %v3650_v34 }
 0x1bd   : > { %446 = vrot.lane.b32.xlu1 %v441_v2, %s3338_s29  ;;  %430 = vrot.lane.b32.xlu0 %v426_v57, %s3338_s29  ;;  %v807_v2 = vstv %s4009_s24  ;;  %s2937_s24 = sld [smem:[#allocation8 + $0x47]] }
 0x1be   : > { %v809_v57 = vmul.f32 %v807_v2, %v4015_v31 }
 0x1c1   : > { %800 = vrot.lane.b32.xlu1 %v795_v0, %s3338_s29  ;;  %444 = vrot.lane.b32.xlu0 %v440_v14, %s3338_s29  ;;  %v4052_v0 = vmul.f32 %v4040_v24, %v3628_v26  ;;  %v1034_v14 = vmul.f32 %v4040_v24, %v3647_v33  ;;  %v821_v26 = vstv %s4036_s23  ;;  %s2961_s23 = sld [smem:[#allocation8 + $0x4f]] }
 0x1c2   : > { %v823_v19 = vmul.f32 %v821_v26, %v4015_v31 }
 0x1c3   : > { %v1039_v9 = vrot.slane %v4052_v0, 1 }
 0x1c5   : > { %814 = vrot.lane.b32.xlu1 %v809_v57, %s3338_s29  ;;  %676 = vrot.lane.b32.xlu0 %v672_v13, %s3338_s29  ;;  %v1041_v57 = vrot.slane %v1034_v14, 1  ;;  %v700_v13 = vmul.f32 %v699_v30, %v4028_v59  ;;  %v4081_v14 = vsel %vm343_vm6, %v965_v7, %v3679_v44  ;;  %v673_v7 = vmul.f32 %v671_v32, %v4091_v50  ;;  %v1348_v32 = vpop.permute.xlu0 %1347 }
 0x1c6   : > { %v1053_v33 = vmul.f32 %v1052_v46, %v4081_v14 }
 0x1c9   : > { %690 = vrot.lane.b32.xlu0 %v686_v21, %s3338_s29  ;;  %1181 = vrot.lane.b32.xlu1 %v1176_v23, %s3338_s29  ;;  %v1042_v21 = vsel %vm569_vm5, %v1039_v9, %v1041_v57  ;;  %v1108_v23 = vpop.permute.xlu1 %1107  ;;  %v687_v57 = vmul.f32 %v685_v53, %v4091_v50  ;;  %v1433_v53 = vstv %s4103_s14  ;;  %s4244_s14 = sld [smem:[#allocation8 + $0x3]] }
 0x1ca   : > { %v4101_v54 = vsel %vm343_vm6, %v1108_v23, %v3674_v43 }
 0x1cb   : > { %v1175_v51 = vmul.f32 %v1174_v36, %v4101_v54 }
 0x1cd   : > { %704 = vrot.lane.b32.xlu0 %v700_v13, %s3338_s29  ;;  %828 = vrot.lane.b32.xlu1 %v823_v19, %s3338_s29  ;;  %v1190_v19 = vmul.f32 %v1188_v4, %v4044_v27  ;;  %v1346_v44 = vpop.permute.xlu1 %1345 }
 0x1d1   : > { %798 = vrot.lane.b32.xlu0 %v794_v45, %s3338_s29  ;;  %1045 = vrot.lane.b32.xlu1 %v1042_v21, %s3337_s28  ;;  %v808_v45 = vmul.f32 %v807_v2, %v4071_v62  ;;  %v967_v34 = vpop.permute.xlu1 %966  ;;  %v1066_v2 = vstv %s4093_s7  ;;  %v701_v21 = vmul.f32 %v699_v30, %v4091_v50  ;;  %v4129_v30 = vpop.permute.xlu0 %1251  ;;  %s356_s7 = sld [smem:[#allocation8]] }
 0x1d2   : > { %v1067_v13 = vmul.f32 %v1066_v2, %v4081_v14  ;;  %v4122_v36 = vsel %vm343_vm6, %v967_v34, %v3663_v38  ;;  %5741 = vst [vmem:[#allocation37_spill] sm:$0xff] %v4129_v30  ;;  %v1032_v38 = vmul.f32 %v4040_v24, %v3626_v25 }
 0x1d5   : > { %1057 = vrot.lane.b32.xlu0 %v1053_v33, %s3338_s29  ;;  %1195 = vrot.lane.b32.xlu1 %v1190_v19, %s3338_s29  ;;  %v4114_v23 = vpop.permute.xlu1 %1253  ;;  %v4118_v33 = vsel %vm343_vm6, %v1346_v44, %v3696_v49 }
 0x1d6   : > { %5739 = vst [vmem:[#allocation35_spill] sm:$0xff] %v4114_v23  ;;  %5740 = vst [vmem:[#allocation36_spill] sm:$0xff] %v4118_v33  ;;  %v1434_v19 = vmul.f32 %v1433_v53, %v4118_v33 }
 0x1d9   : > { %812 = vrot.lane.b32.xlu0 %v808_v45, %s3338_s29  ;;  %678 = vrot.lane.b32.xlu1 %v673_v7, %s3338_s29  ;;  %v1054_v45 = vmul.f32 %v1052_v46, %v4122_v36  ;;  %v1391_v7 = vstv %s2960_s17  ;;  %v4133_v49 = vpop.permute.xlu1 %1024  ;;  %v1068_v46 = vmul.f32 %v1066_v2, %v4122_v36  ;;  %s2885_s17 = sld [smem:[#allocation8 + $0x1b]] }
 0x1da   : > { %5742 = vst [vmem:[#allocation38_spill] sm:$0xff] %v4133_v49  ;;  %v1393_v44 = vmul.f32 %v1391_v7, %v3671_v42  ;;  %v1394_v34 = vmul.f32 %v1391_v7, %v3674_v43 }
 0x1dc   : > { %v1399_v25 = vrot.slane %v1393_v44, 1  ;;  %v1401_v24 = vrot.slane %v1394_v34, 1  ;;  %v1080_v44 = vstv %s2937_s24  ;;  %v1447_v34 = vstv %s2963_s16  ;;  %s4250_s24 = sld [smem:[#allocation8 + $0x1e]] }
 0x1dd   : > { %1179 = vrot.lane.b32.xlu0 %v1175_v51, %s3338_s29  ;;  %692 = vrot.lane.b32.xlu1 %v687_v57, %s3338_s29  ;;  %v822_v51 = vmul.f32 %v821_v26, %v4071_v62  ;;  %v4143_v57 = vsel %vm343_vm6, %v1348_v32, %v3717_v61  ;;  %v1189_v26 = vmul.f32 %v1188_v4, %v4101_v54  ;;  %s4252_s16 = sld [smem:[#allocation8 + $0x36]] }
 0x1de   : > { %5743 = vst [vmem:[#allocation39_spill] sm:$0xff] %v4143_v57  ;;  %v1435_v2 = vmul.f32 %v1433_v53, %v4143_v57  ;;  %v1402_v32 = vsel %vm569_vm5, %v1399_v25, %v1401_v24  ;;  %v1082_v0 = vmul.f32 %v1080_v44, %v4122_v36 }
 0x1e1   : > { %1071 = vrot.lane.b32.xlu0 %v1067_v13, %s3338_s29  ;;  %706 = vrot.lane.b32.xlu1 %v701_v21, %s3338_s29  ;;  %v4147_v13 = vpop.permute.xlu0 %1022  ;;  %v1038_v21 = vrot.slane %v1032_v38, 1 }
 0x1e3   : > { %v1040_v61 = vsel %vm569_vm5, %v1038_v21, %v1039_v9  ;;  %v1081_v21 = vmul.f32 %v1080_v44, %v4081_v14  ;;  %v365_v49 = vstv %s4252_s16  ;;  %s4357_s16 = sld [smem:[#allocation8 + $0x12]] }
 0x1e5   : > { %1438 = vrot.lane.b32.xlu0 %v1434_v19, %s3338_s29  ;;  %1059 = vrot.lane.b32.xlu1 %v1054_v45, %s3338_s29  ;;  %v1392_v19 = vmul.f32 %v1391_v7, %v3658_v37  ;;  %v4152_v45 = vpop.permute.xlu1 %1384  ;;  %v4160_v7 = vpop.permute.xlu0 %1382 }
 0x1e6   : > { %5744 = vst [vmem:[#allocation40_spill] sm:$0xff] %v4152_v45  ;;  %5745 = vst [vmem:[#allocation41_spill] sm:$0xff] %v4160_v7 }
 0x1e7   : > { %v1398_v38 = vrot.slane %v1392_v19, 1  ;;  %v1448_v19 = vmul.f32 %v1447_v34, %v4118_v33 }
 0x1e9   : > { %826 = vrot.lane.b32.xlu0 %v822_v51, %s3338_s29  ;;  %1073 = vrot.lane.b32.xlu1 %v1068_v46, %s3338_s29  ;;  %v4164_v4 = vpop.permute.xlu1 %1153  ;;  %v1400_v53 = vsel %vm569_vm5, %v1398_v38, %v1399_v25  ;;  %v4172_v9 = vpop.permute.xlu0 %1151  ;;  %v1160_v51 = vstv %s2943_s30  ;;  %v1449_v25 = vmul.f32 %v1447_v34, %v4143_v57  ;;  %v1274_v38 = vstv %s4174_s15  ;;  %s4259_s30 = sld [smem:[#allocation8 + $0x39]] }
 0x1ea   : > { %5746 = vst [vmem:[#allocation42_spill] sm:$0xff] %v4164_v4  ;;  %5747 = vst [vmem:[#allocation43_spill] sm:$0xff] %v4172_v9  ;;  %v1162_v24 = vmul.f32 %v1160_v51, %v3691_v48  ;;  %v1412_v48 = vstv %s2961_s23  ;;  %s4273_s15 = sld [smem:[#allocation8 + $0x21]] }
 0x1eb   : > { %v1414_v34 = vmul.f32 %v1412_v48, %v3671_v42  ;;  %v1413_v45 = vmul.f32 %v1412_v48, %v3658_v37  ;;  %s4280_s23 = sld [smem:[#allocation8 + $0x9]] }
 0x1ed   : > { %1193 = vrot.lane.b32.xlu0 %v1189_v26, %s3338_s29  ;;  %1440 = vrot.lane.b32.xlu1 %v1435_v2, %s3338_s29  ;;  %v4176_v46 = vpop.permute.xlu1 %900  ;;  %v4184_v26 = vpop.permute.xlu0 %898  ;;  %v1202_v2 = vstv %s4168_s13  ;;  %s4262_s13 = sld [smem:[#allocation8 + $0x6]] }
 0x1ee   : > { %5748 = vst [vmem:[#allocation44_spill] sm:$0xff] %v4176_v46  ;;  %5749 = vst [vmem:[#allocation45_spill] sm:$0xff] %v4184_v26 }
 0x1f1   : > { %1043 = vrot.lane.b32.xlu0 %v1040_v61, %s3337_s28  ;;  %1405 = vrot.lane.b32.xlu1 %v1402_v32, %s3337_s28  ;;  %v4189_v61 = vpop.permute.xlu1 %1267  ;;  %v1161_v32 = vmul.f32 %v1160_v51, %v3674_v43  ;;  %v4198_v44 = vpop.permute.xlu0 %1265  ;;  %v1203_v51 = vmul.f32 %v1202_v2, %v4101_v54 }
 0x1f2   : > { %5750 = vst [vmem:[#allocation46_spill] sm:$0xff] %v4189_v61  ;;  %5751 = vst [vmem:[#allocation47_spill] sm:$0xff] %v4198_v44 }
 0x1f5   : > { %1403 = vrot.lane.b32.xlu0 %v1400_v53, %s3337_s28  ;;  %1087 = vrot.lane.b32.xlu1 %v1082_v0, %s3338_s29  ;;  %v1204_v53 = vmul.f32 %v1202_v2, %v4044_v27  ;;  %v1276_v0 = vmul.f32 %v1274_v38, %v3671_v42 }
 0x1f9   : > { %1085 = vrot.lane.b32.xlu0 %v1081_v21, %s3338_s29  ;;  %1454 = vrot.lane.b32.xlu1 %v1449_v25, %s3338_s29  ;;  %v1415_v21 = vmul.f32 %v1412_v48, %v3674_v43  ;;  %v1461_v48 = vstv %s2964_s6  ;;  %s4299_s6 = sld [smem:[#allocation8 + $0x24]] }
 0x1fd   : > { %1452 = vrot.lane.b32.xlu0 %v1448_v19, %s3338_s29  ;;  %1167 = vrot.lane.b32.xlu1 %v1162_v24, %s3337_s28  ;;  %v1316_v24 = vstv %s4187_s27  ;;  %v1275_v19 = vmul.f32 %v1274_v38, %v3658_v37  ;;  %s4282_s27 = sld [smem:[#allocation8 + $0x3c]] }
 0x1fe   : > { %v1318_v42 = vmul.f32 %v1316_v24, %v3971_v1  ;;  %v1317_v38 = vmul.f32 %v1316_v24, %v3979_v41  ;;  %v1462_v24 = vmul.f32 %v1461_v48, %v4118_v33 }
 0x201   : > { %1165 = vrot.lane.b32.xlu0 %v1161_v32, %s3337_s28  ;;  %1209 = vrot.lane.b32.xlu1 %v1204_v53, %s3338_s29  ;;  %v4203_v25 = vpop.permute.xlu1 %532  ;;  %v1420_v32 = vrot.slane %v1414_v34, 1  ;;  %v1422_v53 = vrot.slane %v1415_v21, 1 }
 0x203   : > { %v1423_v2 = vsel %vm569_vm5, %v1420_v32, %v1422_v53 }
 0x205   : > { %1207 = vrot.lane.b32.xlu0 %v1203_v51, %s3338_s29  ;;  %1281 = vrot.lane.b32.xlu1 %v1276_v0, %s3337_s28  ;;  %v4214_v43 = vpop.permute.xlu1 %546  ;;  %v1419_v0 = vrot.slane %v1413_v45, 1 }
 0x207   : > { %v4211_v61 = vpop.permute.xlu0 %530  ;;  %v1421_v37 = vsel %vm569_vm5, %v1419_v0, %v1420_v32 }
 0x209   : > { %1279 = vrot.lane.b32.xlu0 %v1275_v19, %s3337_s28  ;;  %1323 = vrot.lane.b32.xlu1 %v1318_v42, %s3338_s29  ;;  %v4225_v34 = vpop.permute.xlu1 %560  ;;  %v1463_v19 = vmul.f32 %v1461_v48, %v4143_v57  ;;  %v361_v57 = vstv %s2885_s17  ;;  %s4343_s17 = sld [smem:[#allocation8 + $0xf]] }
 0x20a   : > { %v363_v4 = vmul.f32 %v361_v57, %v3989_v17  ;;  %v362_v7 = vmul.f32 %v361_v57, %v3997_v28 }
 0x20b   : > { %v4219_v51 = vpop.permute.xlu0 %544 }
 0x20d   : > { %1321 = vrot.lane.b32.xlu0 %v1317_v38, %s3338_s29  ;;  %1426 = vrot.lane.b32.xlu1 %v1423_v2, %s3337_s28 }
 0x20f   : > { %v4227_v21 = vpop.permute.xlu0 %558 }
 0x211   : > { %1424 = vrot.lane.b32.xlu0 %v1421_v37, %s3337_s28  ;;  %1468 = vrot.lane.b32.xlu1 %v1463_v19, %s3338_s29  ;;  %v357_v37 = vstv %s356_s7  ;;  %s4314_s7 = sld [smem:[#allocation8 + $0x3f]] }
 0x212   : > { %v359_v48 = vmul.f32 %v357_v37, %v3989_v17  ;;  %v358_v44 = vmul.f32 %v357_v37, %v3997_v28  ;;  %v367_v37 = vmul.f32 %v365_v49, %v3989_v17  ;;  %v590_v17 = vstv %s4262_s13  ;;  %s4366_s13 = sld [smem:[#allocation8 + $0x42]] }
 0x213   : > { %v4232_v45 = vpop.permute.xlu1 %914  ;;  %v4235_v53 = vpop.permute.xlu0 %912 }
 0x214   : > { %v381_v23 = vadd.f32 %v3787_v6, %v359_v48  ;;  %v395_v6 = vadd.f32 %v3789_v10, %v363_v4  ;;  %v380_v48 = vadd.f32 %v3791_v11, %v358_v44  ;;  %v394_v10 = vadd.f32 %v3795_v15, %v362_v7 }
 0x215   : > { %1466 = vrot.lane.b32.xlu0 %v1462_v24, %s3338_s29  ;;  %v366_v11 = vmul.f32 %v365_v49, %v3997_v28 }
 0x217   : > { %v4238_v32 = vpop.permute.xlu1 %928  ;;  %v4240_v42 = vpop.permute.xlu0 %926 }
 0x218   : > { %5752 = vst [vmem:[#allocation48_spill] sm:$0xff] %v4238_v32  ;;  %v477_v32 = vstv %s4259_s30  ;;  %s4362_s30 = sld [smem:[#allocation8 + $0x2a]] }
 0x219   : > { %v479_v33 = vmul.f32 %v477_v32, %v3937_v47 }
 0x21b   : > { %v4242_v2 = vpop.permute.xlu1 %1295 }
 0x21c   : > { %5753 = vst [vmem:[#allocation49_spill] sm:$0xff] %v4242_v2  ;;  %v465_v2 = vstv %s4244_s14  ;;  %s4331_s14 = sld [smem:[#allocation8 + $0xc]] }
 0x21d   : > { %v466_v57 = vmul.f32 %v465_v2, %v3944_v58 }
 0x21f   : > { %v4246_v0 = vpop.permute.xlu1 %942  ;;  %v4248_v38 = vpop.permute.xlu0 %1293 }
 0x220   : > { %5754 = vst [vmem:[#allocation50_spill] sm:$0xff] %v4246_v0  ;;  %5755 = vst [vmem:[#allocation51_spill] sm:$0xff] %v4248_v38 }
 0x223   : > { %v4255_v19 = vpop.permute.xlu1 %1309  ;;  %v4257_v24 = vpop.permute.xlu0 %940 }
 0x224   : > { %5756 = vst [vmem:[#allocation52_spill] sm:$0xff] %v4255_v19  ;;  %5757 = vst [vmem:[#allocation53_spill] sm:$0xff] %v4257_v24  ;;  %v467_v19 = vmul.f32 %v465_v2, %v3937_v47  ;;  %v471_v24 = vstv %s4250_s24  ;;  %s4348_s24 = sld [smem:[#allocation8 + $0x27]] }
 0x225   : > { %v473_v9 = vmul.f32 %v471_v24, %v3937_v47 }
 0x227   : > { %v419_v1 = vpop.permute.xlu1 %418  ;;  %v4267_v0 = vpop.permute.xlu0 %1307 }
 0x228   : > { %5758 = vst [vmem:[#allocation54_spill] sm:$0xff] %v4267_v0  ;;  %v423_v26 = vadd.f32 %v419_v1, %v381_v23 }
 0x22a   : > { %v469_v46 = vadd.f32 %v467_v19, %v423_v26  ;;  %v409_v19 = vadd.f32 %v3793_v12, %v367_v37  ;;  %v408_v12 = vadd.f32 %v3800_v18, %v366_v11  ;;  %v602_v18 = vstv %s4282_s27  ;;  %s4378_s27 = sld [smem:[#allocation8 + $0x30]] }
 0x22b   : > { %v433_v0 = vpop.permute.xlu1 %432  ;;  %v417_v27 = vpop.permute.xlu0 %416 }
 0x22c   : > { %v495_v1 = vadd.f32 %v3829_v55, %v469_v46  ;;  %v437_v23 = vadd.f32 %v433_v0, %v395_v6  ;;  %v422_v26 = vadd.f32 %v417_v27, %v380_v48  ;;  %v472_v55 = vmul.f32 %v471_v24, %v3944_v58 }
 0x22d   : > { %v592_v27 = vmul.f32 %v590_v17, %v4091_v50  ;;  %v733_v48 = vstv %s4280_s23  ;;  %s4394_s23 = sld [smem:[#allocation8 + $0x2d]] }
 0x22e   : > { %v475_v4 = vadd.f32 %v473_v9, %v437_v23  ;;  %v468_v44 = vadd.f32 %v466_v57, %v422_v26  ;;  %v537_v38 = vadd.f32 %v4203_v25, %v495_v1  ;;  %v591_v9 = vmul.f32 %v590_v17, %v4028_v59 }
 0x22f   : > { %v447_v30 = vpop.permute.xlu1 %446  ;;  %v431_v46 = vpop.permute.xlu0 %430  ;;  %v596_v25 = vstv %s4273_s15  ;;  %s4376_s15 = sld [smem:[#allocation8 + $0x15]] }
 0x230   : > { %v509_v15 = vadd.f32 %v3842_v60, %v475_v4  ;;  %v494_v28 = vadd.f32 %v3831_v56, %v468_v44  ;;  %v451_v49 = vadd.f32 %v447_v30, %v409_v19  ;;  %v436_v7 = vadd.f32 %v431_v46, %v394_v10 }
 0x231   : > { %v4301_v47 = vadd.f32 %v592_v27, %v537_v38  ;;  %v478_v56 = vmul.f32 %v477_v32, %v3944_v58  ;;  %v598_v37 = vmul.f32 %v596_v25, %v4091_v50  ;;  %v604_v58 = vmul.f32 %v602_v18, %v4091_v50 }
 0x232   : > { %v481_v2 = vadd.f32 %v479_v33, %v451_v49  ;;  %v474_v0 = vadd.f32 %v472_v55, %v436_v7  ;;  %v536_v24 = vadd.f32 %v4211_v61, %v494_v28  ;;  %v551_v60 = vadd.f32 %v4214_v43, %v509_v15 }
 0x233   : > { %v4305_v6 = vpop.permute.xlu1 %800  ;;  %v445_v30 = vpop.permute.xlu0 %444  ;;  %v597_v61 = vmul.f32 %v596_v25, %v4028_v59  ;;  %v739_v50 = vstv %s4299_s6  ;;  %v603_v55 = vmul.f32 %v602_v18, %v4028_v59  ;;  %v745_v49 = vstv %s4314_s7  ;;  %s4384_s6 = sld [smem:[#allocation8 + $0x45]]  ;;  %s4429_s7 = sld [smem:[#allocation8 + $0x33]] }
 0x234   : > { %v523_v1 = vadd.f32 %v3856_v5, %v481_v2  ;;  %v508_v38 = vadd.f32 %v3858_v8, %v474_v0  ;;  %v450_v33 = vadd.f32 %v445_v30, %v408_v12  ;;  %v593_v23 = vadd.f32 %v591_v9, %v536_v24 }
 0x235   : > { %v4316_v43 = vadd.f32 %v598_v37, %v551_v60  ;;  %v734_v8 = vmul.f32 %v733_v48, %v4071_v62  ;;  %v971_v18 = vstv %s4343_s17  ;;  %s4488_s17 = sld [smem:[#allocation9 + $0x1]] }
 0x236   : > { %v480_v32 = vadd.f32 %v478_v56, %v450_v33  ;;  %v626_v57 = vadd.f32 %v3883_v52, %v593_v23  ;;  %v550_v26 = vadd.f32 %v4219_v51, %v508_v38  ;;  %v565_v5 = vadd.f32 %v4225_v34, %v523_v1 }
 0x237   : > { %v4322_v10 = vpop.permute.xlu1 %814  ;;  %v677_v11 = vpop.permute.xlu0 %676  ;;  %v972_v33 = vmul.f32 %v971_v18, %v4081_v14  ;;  %v627_v23 = vadd.f32 %v3871_v39, %v4301_v47 }
 0x238   : > { %v522_v17 = vadd.f32 %v3873_v40, %v480_v32  ;;  %v682_v4 = vadd.f32 %v677_v11, %v626_v57  ;;  %v599_v44 = vadd.f32 %v597_v61, %v550_v26  ;;  %v4328_v19 = vadd.f32 %v604_v58, %v565_v5  ;;  %v5759_v11 = vld [vmem:[#allocation20_spill] sm:$0xff] }
 0x239   : > { %v740_v40 = vmul.f32 %v739_v50, %v4071_v62 }
 0x23a   : > { %v736_v52 = vadd.f32 %v734_v8, %v682_v4  ;;  %v647_v51 = vadd.f32 %v3893_v63, %v599_v44  ;;  %v564_v34 = vadd.f32 %v4227_v21, %v522_v17  ;;  %v746_v63 = vmul.f32 %v745_v49, %v4071_v62 }
 0x23b   : > { %v4336_v46 = vpop.permute.xlu1 %1181  ;;  %v691_v27 = vpop.permute.xlu0 %690  ;;  %v847_v21 = vstv %s4331_s14  ;;  %v1114_v8 = vstv %s4357_s16  ;;  %v648_v17 = vadd.f32 %v5759_v11, %v4316_v43  ;;  %v741_v44 = vmul.f32 %v739_v50, %v4015_v31  ;;  %s4396_s14 = sld [smem:[#allocation8 + $0x18]]  ;;  %v5763_v50 = vld [vmem:[#allocation21_spill] sm:$0xff]  ;;  %s5705_s16 = smov 112  }
 0x23c   : > { %v696_v15 = vadd.f32 %v691_v27, %v647_v51  ;;  %v605_v28 = vadd.f32 %v603_v55, %v564_v34  ;;  %v762_v0 = vadd.f32 %v3911_v20, %v736_v52  ;;  %v848_v60 = vmul.f32 %v847_v21, %v3956_v3  ;;  %v5760_v34 = vld [vmem:[#allocation22_spill] sm:$0xff]  ;;  %v5761_v27 = vld [vmem:[#allocation31_spill] sm:$0xff] }
 0x23d   : > { %v853_v20 = vstv %s4348_s24  ;;  %v1115_v4 = vmul.f32 %v1114_v8, %v4101_v54  ;;  %v977_v51 = vstv %s4362_s30  ;;  %s4404_s24 = sld [smem:[#allocation8 + $0x48]] }
 0x23e   : > { %v742_v7 = vadd.f32 %v740_v40, %v696_v15  ;;  %v668_v12 = vadd.f32 %v3903_v16, %v605_v28  ;;  %v854_v32 = vmul.f32 %v853_v20, %v3956_v3  ;;  %v5762_v15 = vld [vmem:[#allocation32_spill] sm:$0xff]  ;;  %s4434_s30 = sld [smem:[#allocation9]] }
 0x23f   : > { %v4341_v9 = vpop.permute.xlu1 %828  ;;  %v705_v25 = vpop.permute.xlu0 %704  ;;  %v849_v28 = vmul.f32 %v847_v21, %v5762_v15  ;;  %v978_v21 = vmul.f32 %v977_v51, %v4081_v14 }
 0x240   : > { %v710_v59 = vadd.f32 %v705_v25, %v668_v12  ;;  %v776_v61 = vadd.f32 %v3915_v22, %v742_v7  ;;  %v669_v7 = vadd.f32 %v5763_v50, %v4328_v19  ;;  %v859_v12 = vstv %s4366_s13  ;;  %v5770_v50 = vld [vmem:[#allocation36_spill] sm:$0xff]  ;;  %s4496_s13 = sld [smem:[#allocation8 + $0x4b]] }
 0x242   : > { %v4351_v2 = vadd.f32 %v746_v63, %v710_v59 }
 0x243   : > { %v4354_v16 = vpop.permute.xlu1 %1045  ;;  %v799_v24 = vpop.permute.xlu0 %798 }
 0x244   : > { %v804_v56 = vadd.f32 %v799_v24, %v762_v0  ;;  %v1228_v24 = vstv %s4376_s15  ;;  %s2958_s15 = sld [smem:[#allocation8 + $0x4e]] }
 0x246   : > { %v850_v30 = vadd.f32 %v848_v60, %v804_v56  ;;  %v747_v60 = vmul.f32 %v745_v49, %v4015_v31  ;;  %v983_v49 = vstv %s4384_s6  ;;  %s2978_s6 = sld [smem:[#allocation11 + $0x4]] }
 0x247   : > { %v4359_v62 = vpop.permute.xlu1 %1195  ;;  %v1058_v37 = vpop.permute.xlu0 %1057 }
 0x248   : > { %v876_v1 = vadd.f32 %v3923_v29, %v850_v30  ;;  %v1234_v30 = vstv %s4378_s27  ;;  %s2966_s27 = sld [smem:[#allocation9 + $0x2]] }
 0x24a   : > { %v918_v38 = vadd.f32 %v4235_v53, %v876_v1  ;;  %v735_v53 = vmul.f32 %v733_v48, %v4015_v31  ;;  %v5764_v1 = vld [vmem:[#allocation23_spill] sm:$0xff] }
 0x24b   : > { %v679_v58 = vpop.permute.xlu1 %678  ;;  %v813_v57 = vpop.permute.xlu0 %812 }
 0x24c   : > { %v974_v29 = vadd.f32 %v972_v33, %v918_v38  ;;  %v683_v26 = vadd.f32 %v679_v58, %v627_v23  ;;  %v818_v5 = vadd.f32 %v813_v57, %v776_v61  ;;  %v1229_v61 = vmul.f32 %v1228_v24, %v3979_v41 }
 0x24e   : > { %v1007_v39 = vadd.f32 %v3927_v35, %v974_v29  ;;  %v737_v22 = vadd.f32 %v735_v53, %v683_v26  ;;  %v856_v47 = vadd.f32 %v854_v32, %v818_v5  ;;  %v5766_v29 = vld [vmem:[#allocation25_spill] sm:$0xff]  ;;  %v1120_v5 = vstv %s4394_s23  ;;  %s2979_s23 = sld [smem:[#allocation11 + $0x1f]] }
 0x24f   : > { %v693_v52 = vpop.permute.xlu1 %692  ;;  %v1180_v48 = vpop.permute.xlu0 %1179 }
 0x250   : > { %v1063_v35 = vadd.f32 %v1058_v37, %v1007_v39  ;;  %v763_v55 = vadd.f32 %v5760_v34, %v737_v22  ;;  %v890_v43 = vadd.f32 %v5761_v27, %v856_v47  ;;  %v697_v40 = vadd.f32 %v693_v52, %v648_v17 }
 0x251   : > { %v973_v39 = vmul.f32 %v971_v18, %v4122_v36  ;;  %v1121_v52 = vmul.f32 %v1120_v5, %v4101_v54  ;;  %v1126_v18 = vstv %s4404_s24  ;;  %s2980_s24 = sld [smem:[#allocation11 + $0x3a]] }
 0x252   : > { %v1117_v25 = vadd.f32 %v1115_v4, %v1063_v35  ;;  %v805_v63 = vadd.f32 %v4305_v6, %v763_v55  ;;  %v743_v59 = vadd.f32 %v741_v44, %v697_v40  ;;  %v932_v0 = vadd.f32 %v4240_v42, %v890_v43  ;;  %v5765_v6 = vld [vmem:[#allocation30_spill] sm:$0xff]  ;;  %v5768_v35 = vld [vmem:[#allocation37_spill] sm:$0xff] }
 0x253   : > { %v707_v56 = vpop.permute.xlu1 %706  ;;  %v1072_v19 = vpop.permute.xlu0 %1071  ;;  %v855_v42 = vmul.f32 %v853_v20, %v5762_v15  ;;  %v1352_v20 = vstv %s4396_s14  ;;  %v5769_v43 = vld [vmem:[#allocation29_spill] sm:$0xff]  ;;  %s3042_s14 = sld [smem:[#allocation11 + $0x34]] }
 0x254   : > { %v851_v37 = vadd.f32 %v849_v28, %v805_v63  ;;  %v777_v38 = vadd.f32 %v5764_v1, %v743_v59  ;;  %v1143_v33 = vadd.f32 %v5765_v6, %v1117_v25  ;;  %v711_v23 = vadd.f32 %v707_v56, %v669_v7  ;;  %v5771_v63 = vld [vmem:[#allocation26_spill] sm:$0xff]  ;;  %v5773_v56 = vld [vmem:[#allocation51_spill] sm:$0xff] }
 0x255   : > { %v980_v31 = vadd.f32 %v978_v21, %v932_v0  ;;  %v979_v7 = vmul.f32 %v977_v51, %v4122_v36  ;;  %v790_v59 = vadd.f32 %v5771_v63, %v4351_v2  ;;  %v5772_v0 = vld [vmem:[#allocation27_spill] sm:$0xff]  ;;  %v5775_v1 = vld [vmem:[#allocation34_spill] sm:$0xff]  ;;  %v860_v6 = vmul.f32 %v859_v12, %v3956_v3 }
 0x256   : > { %v819_v58 = vadd.f32 %v4322_v10, %v777_v38  ;;  %v1185_v32 = vadd.f32 %v1180_v48, %v1143_v33  ;;  %v749_v57 = vadd.f32 %v747_v60, %v711_v23  ;;  %v877_v53 = vadd.f32 %v5766_v29, %v851_v37  ;;  %v5767_v10 = vld [vmem:[#allocation24_spill] sm:$0xff]  ;;  %v5776_v33 = vld [vmem:[#allocation43_spill] sm:$0xff] }
 0x257   : > { %v1028_v26 = vadd.f32 %v4147_v13, %v980_v31  ;;  %v1060_v22 = vpop.permute.xlu1 %1059  ;;  %v1439_v47 = vpop.permute.xlu0 %1438  ;;  %v861_v13 = vmul.f32 %v859_v12, %v5762_v15  ;;  %v1116_v38 = vmul.f32 %v1114_v8, %v5775_v1  ;;  %v5777_v31 = vld [vmem:[#allocation44_spill] sm:$0xff]  ;;  %v1235_v8 = vmul.f32 %v1234_v30, %v3979_v41 }
 0x258   : > { %v857_v11 = vadd.f32 %v855_v42, %v819_v58  ;;  %v1231_v17 = vadd.f32 %v1229_v61, %v1185_v32  ;;  %v791_v4 = vadd.f32 %v5767_v10, %v749_v57  ;;  %v919_v44 = vadd.f32 %v4232_v45, %v877_v53 }
 0x259   : > { %v1077_v48 = vadd.f32 %v1072_v19, %v1028_v26  ;;  %v1353_v45 = vmul.f32 %v1352_v20, %v5770_v50  ;;  %v1122_v32 = vmul.f32 %v1120_v5, %v5775_v1  ;;  %v1358_v12 = vstv %s4429_s7  ;;  %v5778_v26 = vld [vmem:[#allocation41_spill] sm:$0xff]  ;;  %v5781_v5 = vld [vmem:[#allocation50_spill] sm:$0xff]  ;;  %s4550_s7 = sld [smem:[#allocation11 + $0xd]] }
 0x25a   : > { %v1257_v34 = vadd.f32 %v5768_v35, %v1231_v17  ;;  %v833_v55 = vadd.f32 %v4341_v9, %v791_v4  ;;  %v975_v27 = vadd.f32 %v973_v39, %v919_v44  ;;  %v891_v40 = vadd.f32 %v5769_v43, %v857_v11  ;;  %v5774_v9 = vld [vmem:[#allocation48_spill] sm:$0xff]  ;;  %v5780_v4 = vld [vmem:[#allocation45_spill] sm:$0xff] }
 0x25b   : > { %v1123_v28 = vadd.f32 %v1121_v52, %v1077_v48  ;;  %v1074_v25 = vpop.permute.xlu1 %1073  ;;  %v827_v15 = vpop.permute.xlu0 %826  ;;  %v1475_v10 = vstv %s4434_s30  ;;  %v985_v48 = vmul.f32 %v983_v49, %v4122_v36  ;;  %v5783_v43 = vld [vmem:[#allocation33_spill] sm:$0xff]  ;;  %v984_v63 = vmul.f32 %v983_v49, %v4081_v14  ;;  %v5787_v14 = vld [vmem:[#allocation54_spill] sm:$0xff]  ;;  %s3006_s30 = sld [smem:[#allocation11 + $0x28]] }
 0x25c   : > { %v1008_v60 = vadd.f32 %v5772_v0, %v975_v27  ;;  %v1299_v21 = vadd.f32 %v5773_v56, %v1257_v34  ;;  %v933_v19 = vadd.f32 %v5774_v9, %v891_v40  ;;  %v863_v37 = vadd.f32 %v861_v13, %v833_v55  ;;  %v5782_v13 = vld [vmem:[#allocation28_spill] sm:$0xff] }
 0x25d   : > { %v832_v51 = vadd.f32 %v827_v15, %v790_v59  ;;  %v1157_v23 = vadd.f32 %v5776_v33, %v1123_v28  ;;  %v1230_v40 = vmul.f32 %v1228_v24, %v5783_v43  ;;  %v1359_v24 = vmul.f32 %v1358_v12, %v5770_v50 }
 0x25e   : > { %v1064_v2 = vadd.f32 %v1060_v22, %v1008_v60  ;;  %v1355_v42 = vadd.f32 %v1353_v45, %v1299_v21  ;;  %v981_v61 = vadd.f32 %v979_v7, %v933_v19  ;;  %v905_v58 = vadd.f32 %v5777_v31, %v863_v37  ;;  %v5779_v22 = vld [vmem:[#allocation38_spill] sm:$0xff]  ;;  %v5784_v45 = vld [vmem:[#allocation53_spill] sm:$0xff] }
 0x25f   : > { %v862_v57 = vadd.f32 %v860_v6, %v832_v51  ;;  %v4457_v29 = vpop.permute.xlu1 %1440  ;;  %v1194_v3 = vpop.permute.xlu0 %1193  ;;  %v5786_v37 = vld [vmem:[#allocation42_spill] sm:$0xff]  ;;  %v1236_v6 = vmul.f32 %v1234_v30, %v5783_v43  ;;  %v1128_v33 = vmul.f32 %v1126_v18, %v5775_v1  ;;  %v5789_v30 = vld [vmem:[#allocation39_spill] sm:$0xff] }
 0x260   : > { %v1118_v53 = vadd.f32 %v1116_v38, %v1064_v2  ;;  %v1388_v39 = vadd.f32 %v5778_v26, %v1355_v42  ;;  %v1029_v11 = vadd.f32 %v5779_v22, %v981_v61  ;;  %v1199_v17 = vadd.f32 %v1194_v3, %v1157_v23  ;;  %v5788_v23 = vld [vmem:[#allocation35_spill] sm:$0xff]  ;;  %v5791_v26 = vld [vmem:[#allocation46_spill] sm:$0xff] }
 0x261   : > { %v904_v44 = vadd.f32 %v5780_v4, %v862_v57  ;;  %v947_v52 = vadd.f32 %v5781_v5, %v905_v58  ;;  %v1354_v31 = vmul.f32 %v1352_v20, %v5789_v30  ;;  %v5790_v58 = vld [vmem:[#allocation49_spill] sm:$0xff]  ;;  %v5792_v4 = vld [vmem:[#allocation40_spill] sm:$0xff] }
 0x262   : > { %v1144_v35 = vadd.f32 %v5782_v13, %v1118_v53  ;;  %v1444_v34 = vadd.f32 %v1439_v47, %v1388_v39  ;;  %v1078_v55 = vadd.f32 %v1074_v25, %v1029_v11  ;;  %v1237_v27 = vadd.f32 %v1235_v8, %v1199_v17  ;;  %v5785_v47 = vld [vmem:[#allocation47_spill] sm:$0xff] }
 0x263   : > { %v1406_v28 = vpop.permute.xlu1 %1405  ;;  %v946_v7 = vadd.f32 %v5784_v45, %v904_v44  ;;  %v1044_v59 = vpop.permute.xlu0 %1043  ;;  %v987_v15 = vadd.f32 %v985_v48, %v947_v52  ;;  %v1127_v11 = vmul.f32 %v1126_v18, %v4101_v54  ;;  %v1360_v17 = vmul.f32 %v1358_v12, %v5789_v30  ;;  %v5793_v44 = vld [vmem:[#allocation52_spill] sm:$0xff] }
 0x264   : > { %v1186_v36 = vadd.f32 %v4336_v46, %v1144_v35  ;;  %v1476_v0 = vadd.f32 %v1475_v10, %v1444_v34  ;;  %v1124_v60 = vadd.f32 %v1122_v32, %v1078_v55  ;;  %v1271_v25 = vadd.f32 %v5785_v47, %v1237_v27 }
 0x265   : > { %v986_v56 = vadd.f32 %v984_v63, %v946_v7  ;;  %v1050_v21 = vadd.f32 %v4354_v16, %v987_v15  ;;  %v1479_v13 = vstv %s4488_s17  ;;  %v1240_v45 = vstv %s4496_s13  ;;  %s3007_s17 = sld [smem:[#allocation11 + $0x43]]  ;;  %s3032_s13 = sld [smem:[#allocation11 + $0x16]] }
 0x266   : > { %v1232_v9 = vadd.f32 %v1230_v40, %v1186_v36  ;;  %v1486_v19 = vmax.f32 %v1476_v0, 0.0  ;;  %v1158_v38 = vadd.f32 %v5786_v37, %v1124_v60  ;;  %v1313_v49 = vadd.f32 %v5787_v14, %v1271_v25 }
 0x267   : > { %v1088_v46 = vpop.permute.xlu1 %1087  ;;  %v1404_v51 = vpop.permute.xlu0 %1403  ;;  %v1049_v1 = vadd.f32 %v1044_v59, %v986_v56  ;;  %v1242_v15 = vmul.f32 %v1240_v45, %v5783_v43  ;;  %v1364_v14 = vstv %s2958_s15  ;;  %s3033_s15 = sld [smem:[#allocation11 + $0x31]] }
 0x268   : > { %v1200_v16 = vadd.f32 %v4359_v62, %v1158_v38  ;;  %v1258_v2 = vadd.f32 %v5788_v23, %v1232_v9  ;;  %v1092_v42 = vadd.f32 %v1088_v46, %v1050_v21  ;;  %v1361_v61 = vadd.f32 %v1359_v24, %v1313_v49  ;;  %1490 = vrot.lane.b32.xlu0 %v1486_v19, %s5705_s16 }
 0x269   : > { %v1241_v9 = vmul.f32 %v1240_v45, %v3979_v41 }
 0x26a   : > { %v1300_v32 = vadd.f32 %v5790_v58, %v1258_v2  ;;  %v1238_v57 = vadd.f32 %v1236_v6, %v1200_v16  ;;  %v1130_v8 = vadd.f32 %v1128_v33, %v1092_v42  ;;  %v1409_v52 = vadd.f32 %v1404_v51, %v1361_v61 }
 0x26b   : > { %v1455_v62 = vpop.permute.xlu1 %1454  ;;  %v1086_v3 = vpop.permute.xlu0 %1085  ;;  %v1366_v6 = vmul.f32 %v1364_v14, %v5789_v30  ;;  %v1365_v2 = vmul.f32 %v1364_v14, %v5770_v50  ;;  %v1483_v61 = vstv %s2966_s27  ;;  %s3034_s27 = sld [smem:[#allocation11 + $0x4c]] }
 0x26c   : > { %v1356_v53 = vadd.f32 %v1354_v31, %v1300_v32  ;;  %v1272_v39 = vadd.f32 %v5791_v26, %v1238_v57  ;;  %v1091_v22 = vadd.f32 %v1086_v3, %v1049_v1 }
 0x26e   : > { %v1389_v20 = vadd.f32 %v5792_v4, %v1356_v53  ;;  %v1314_v5 = vadd.f32 %v5793_v44, %v1272_v39  ;;  %v1129_v48 = vadd.f32 %v1127_v11, %v1091_v22 }
 0x26f   : > { %v1168_v35 = vpop.permute.xlu1 %1167  ;;  %v1453_v34 = vpop.permute.xlu0 %1452 }
 0x270   : > { %v1445_v55 = vadd.f32 %v4457_v29, %v1389_v20  ;;  %v1362_v27 = vadd.f32 %v1360_v17, %v1314_v5  ;;  %v1458_v40 = vadd.f32 %v1453_v34, %v1409_v52  ;;  %v1172_v59 = vadd.f32 %v1168_v35, %v1130_v8 }
 0x271   : > { %v1684_v34 = vstv %s2979_s23  ;;  %s2970_s23 = sld [smem:[#allocation11 + $0x1c]] }
 0x272   : > { %v1477_v7 = vadd.f32 %v1475_v10, %v1445_v55  ;;  %v1410_v63 = vadd.f32 %v1406_v28, %v1362_v27  ;;  %v1480_v54 = vadd.f32 %v1479_v13, %v1458_v40  ;;  %v2280_v55 = vld [vmem:[#allocation3 + $0x40] sm:$0x1]  ;;  %v4556_v40 = vstv %s3042_s14  ;;  %s2987_s14 = sld [smem:[#allocation11 + $0x7]] }
 0x273   : > { %v1210_v18 = vpop.permute.xlu1 %1209  ;;  %v1166_v12 = vpop.permute.xlu0 %1165 }
 0x274   : > { %v1487_v36 = vmax.f32 %v1477_v7, 0.0  ;;  %v1459_v0 = vadd.f32 %v1455_v62, %v1410_v63  ;;  %v1498_v60 = vmax.f32 %v1480_v54, 0.0  ;;  %v1214_v47 = vadd.f32 %v1210_v18, %v1172_v59 }
 0x275   : > { %v1171_v56 = vadd.f32 %v1166_v12, %v1129_v48  ;;  %v1670_v48 = vstv %s2978_s6  ;;  %v1698_v59 = vstv %s2980_s24  ;;  %s2969_s6 = sld [smem:[#allocation11 + $0x1]]  ;;  %s2971_s24 = sld [smem:[#allocation11 + $0x37]] }
 0x276   : > { %v1481_v25 = vadd.f32 %v1479_v13, %v1459_v0  ;;  %1492 = vrot.lane.b32.xlu1 %v1487_v36, %s5705_s16  ;;  %1502 = vrot.lane.b32.xlu0 %v1498_v60, %s5705_s16  ;;  %v1244_v29 = vadd.f32 %v1242_v15, %v1214_v47  ;;  %v2050_v36 = vstv %s4550_s7  ;;  %s2988_s7 = sld [smem:[#allocation11 + $0x22]] }
 0x277   : > { %v1282_v10 = vpop.permute.xlu1 %1281  ;;  %v1208_v28 = vpop.permute.xlu0 %1207 }
 0x278   : > { %v1499_v21 = vmax.f32 %v1481_v25, 0.0  ;;  %v1213_v24 = vadd.f32 %v1208_v28, %v1171_v56  ;;  %v1286_v19 = vadd.f32 %v1282_v10, %v1244_v29  ;;  %v2064_v29 = vstv %s3006_s30  ;;  %s4675_s30 = sld [smem:[#allocation11 + $0xa]] }
 0x27a   : > { %1504 = vrot.lane.b32.xlu1 %v1499_v21, %s5705_s16  ;;  %v1243_v43 = vadd.f32 %v1241_v9, %v1213_v24  ;;  %v2078_v21 = vstv %s3007_s17  ;;  %s2989_s17 = sld [smem:[#allocation11 + $0x3d]] }
 0x27b   : > { %v1324_v37 = vpop.permute.xlu1 %1323  ;;  %v1280_v38 = vpop.permute.xlu0 %1279 }
 0x27c   : > { %v1328_v49 = vadd.f32 %v1324_v37, %v1286_v19  ;;  %v1285_v46 = vadd.f32 %v1280_v38, %v1243_v43  ;;  %v2430_v19 = vstv %s3032_s13  ;;  %v2444_v38 = vstv %s3033_s15  ;;  %s4689_s13 = sld [smem:[#allocation11 + $0x25]]  ;;  %s4705_s15 = sld [smem:[#allocation11 + $0x40]] }
 0x27e   : > { %v1368_v51 = vadd.f32 %v1366_v6, %v1328_v49  ;;  %v2458_v6 = vstv %s3034_s27  ;;  %s4718_s27 = sld [smem:[#allocation11 + $0x13]] }
 0x27f   : > { %v1427_v33 = vpop.permute.xlu1 %1426  ;;  %v1322_v16 = vpop.permute.xlu0 %1321 }
 0x280   : > { %v1327_v23 = vadd.f32 %v1322_v16, %v1285_v46  ;;  %v1431_v42 = vadd.f32 %v1427_v33, %v1368_v51  ;;  %v1526_v16 = vld [vmem:[#allocation3 + $0x10] sm:$0x1] }
 0x282   : > { %v1367_v41 = vadd.f32 %v1365_v2, %v1327_v23 }
 0x283   : > { %v1469_v31 = vpop.permute.xlu1 %1468  ;;  %v1425_v58 = vpop.permute.xlu0 %1424 }
 0x284   : > { %v1473_v32 = vadd.f32 %v1469_v31, %v1431_v42  ;;  %v1430_v1 = vadd.f32 %v1425_v58, %v1367_v41 }
 0x286   : > { %v1485_v57 = vadd.f32 %v1483_v61, %v1473_v32 }
 0x287   : > { %v1467_v8 = vpop.permute.xlu0 %1466 }
 0x288   : > { %v1512_v62 = vmax.f32 %v1485_v57, 0.0  ;;  %v1472_v3 = vadd.f32 %v1467_v8, %v1430_v1  ;;  %v1900_v1 = vld [vmem:[#allocation3 + $0x28] sm:$0x1] }
 0x28a   : > { %v1484_v53 = vadd.f32 %v1483_v61, %v1472_v3  ;;  %1517 = vrot.lane.b32.xlu1 %v1512_v62, %s5705_s16 }
 0x28c   : > { %v1511_v30 = vmax.f32 %v1484_v53, 0.0 }
 0x28e   : > { %1515 = vrot.lane.b32.xlu0 %v1511_v30, %s5705_s16  ;;  %s5442_s16 = sld [smem:[#allocation11 + $0x18]] }
 0x2da   : > { %v1491_v26 = vpop.permute.xlu0 %1490 }
 0x2db   : > { %1496 = vst.msk [vmem:[#allocation3] sm:$0xff] %vm328_vm3, %v1491_v26 }
 0x2e2   : > { %v4522_v50 = vld [vmem:[#allocation3] sm:$0xff] }
 0x2e3   : > { %1639 = vrot.lane.b32.xlu1 %v4522_v50, %s3336_s26  ;;  %v1671_v13 = vmul.f32 %v1670_v48, %v4522_v50  ;;  %v1685_v45 = vmul.f32 %v1684_v34, %v4522_v50  ;;  %v1699_v12 = vmul.f32 %v1698_v59, %v4522_v50  ;;  %v1527_v33 = vrot.slane %v4522_v50, 7 }
 0x2e4   : > { %v1756_v61 = vrot.slane %v4522_v50, 1 }
 0x2e5   : > { %v4611_v2 = vsel %vm338_vm4, %v1527_v33, %v1526_v16 }
 0x2e8   : > { %v1493_v39 = vpop.permute.xlu1 %1492  ;;  %v1503_v22 = vpop.permute.xlu0 %1502 }
 0x2e9   : > { %1497 = vst.msk [vmem:[#allocation3 + $0x8] sm:$0xff] %vm328_vm3, %v1493_v39  ;;  %1509 = vst.msk [vmem:[#allocation3 + $0x18] sm:$0xff] %vm328_vm3, %v1503_v22 }
 0x2ec   : > { %v1505_v11 = vpop.permute.xlu1 %1504 }
 0x2ed   : > { %1510 = vst.msk [vmem:[#allocation3 + $0x20] sm:$0xff] %vm328_vm3, %v1505_v11 }
 0x2f0   : > { %v4529_v17 = vld [vmem:[#allocation3 + $0x8] sm:$0xff]  ;;  %v4535_v20 = vld [vmem:[#allocation3 + $0x18] sm:$0xff] }
 0x2f1   : > { %1642 = vrot.lane.b32.xlu0 %v4529_v17, %s3336_s26  ;;  %v1672_v7 = vmul.f32 %v1670_v48, %v4529_v17  ;;  %v1686_v15 = vmul.f32 %v1684_v34, %v4529_v17  ;;  %v2051_v25 = vmul.f32 %v2050_v36, %v4535_v20  ;;  %v1700_v56 = vmul.f32 %v1698_v59, %v4529_v17 }
 0x2f2   : > { %v2065_v10 = vmul.f32 %v2064_v29, %v4535_v20  ;;  %v2079_v24 = vmul.f32 %v2078_v21, %v4535_v20  ;;  %v1528_v42 = vrot.slane %v4529_v17, 7  ;;  %v1757_v41 = vrot.slane %v4529_v17, 1 }
 0x2f3   : > { %v1901_v32 = vrot.slane %v4535_v20, 7  ;;  %v2136_v53 = vrot.slane %v4535_v20, 1  ;;  %v1570_v34 = vstv %s2970_s23  ;;  %s3014_s23 = sld [smem:[#allocation11 + $0x10]] }
 0x2f4   : > { %v4533_v4 = vld [vmem:[#allocation3 + $0x20] sm:$0xff]  ;;  %v4620_v31 = vsel %vm338_vm4, %v1528_v42, %v1527_v33  ;;  %v4625_v58 = vsel %vm569_vm5, %v1756_v61, %v1757_v41 }
 0x2f5   : > { %2022 = vrot.lane.b32.xlu1 %v4533_v4, %s3336_s26  ;;  %2019 = vrot.lane.b32.xlu0 %v4535_v20, %s3336_s26  ;;  %v2052_v28 = vmul.f32 %v2050_v36, %v4533_v4  ;;  %v2066_v9 = vmul.f32 %v2064_v29, %v4533_v4  ;;  %v2080_v43 = vmul.f32 %v2078_v21, %v4533_v4  ;;  %v1902_v57 = vrot.slane %v4533_v4, 7 }
 0x2f6   : > { %v4634_v8 = vsel %vm338_vm4, %v1901_v32, %v1900_v1  ;;  %v2137_v3 = vrot.slane %v4533_v4, 1  ;;  %v4693_v36 = vstv %s2988_s7  ;;  %v4708_v21 = vstv %s2989_s17  ;;  %s3016_s7 = sld [smem:[#allocation11 + $0x46]]  ;;  %s2981_s17 = sld [smem:[#allocation11 + $0x5]] }
 0x2f7   : > { %v4637_v62 = vsel %vm338_vm4, %v1902_v57, %v1901_v32 }
 0x2f8   : > { %v4648_v30 = vsel %vm569_vm5, %v2136_v53, %v2137_v3 }
 0x2f9   : > { %v2174_v53 = vstv %s3014_s23  ;;  %s3035_s23 = sld [smem:[#allocation11 + $0x17]] }
 0x2fc   : > { %v1518_v44 = vpop.permute.xlu1 %1517 }
 0x2fd   : > { %1523 = vst.msk [vmem:[#allocation3 + $0x38] sm:$0xff] %vm328_vm3, %v1518_v44 }
 0x300   : > { %v1516_v5 = vpop.permute.xlu0 %1515 }
 0x301   : > { %1522 = vst.msk [vmem:[#allocation3 + $0x30] sm:$0xff] %vm328_vm3, %v1516_v5  ;;  %v1556_v5 = vstv %s2969_s6  ;;  %s4730_s6 = sld [smem:[#allocation11 + $0x2e]] }
 0x302   : > { %v1558_v48 = vmul.f32 %v1556_v5, %v4620_v31 }
 0x304   : > { %v4543_v52 = vld [vmem:[#allocation3 + $0x38] sm:$0xff] }
 0x305   : > { %2402 = vrot.lane.b32.xlu0 %v4543_v52, %s3336_s26  ;;  %v4567_v54 = vmul.f32 %v4556_v40, %v4543_v52  ;;  %v2432_v14 = vmul.f32 %v2430_v19, %v4543_v52  ;;  %v2446_v46 = vmul.f32 %v2444_v38, %v4543_v52  ;;  %v2460_v23 = vmul.f32 %v2458_v6, %v4543_v52 }
 0x306   : > { %v2282_v39 = vrot.slane %v4543_v52, 7  ;;  %v2517_v22 = vrot.slane %v4543_v52, 1 }
 0x307   : > { %v2583_v0 = vrot.slane %v4567_v54, 1  ;;  %v2330_v32 = vstv %s4730_s6  ;;  %s3010_s6 = sld [smem:[#allocation11 + $0x44]] }
 0x308   : > { %v4548_v35 = vld [vmem:[#allocation3 + $0x30] sm:$0xff] }
 0x309   : > { %1675 = vrot.lane.b32.xlu0 %v1671_v13, %s3337_s28  ;;  %2399 = vrot.lane.b32.xlu1 %v4548_v35, %s3336_s26  ;;  %v2281_v27 = vrot.slane %v4548_v35, 7  ;;  %v2431_v37 = vmul.f32 %v2430_v19, %v4548_v35  ;;  %v2445_v49 = vmul.f32 %v2444_v38, %v4548_v35  ;;  %v2459_v51 = vmul.f32 %v2458_v6, %v4548_v35 }
 0x30a   : > { %v2516_v26 = vrot.slane %v4548_v35, 1  ;;  %v1557_v13 = vmul.f32 %v1556_v5, %v4611_v2  ;;  %v4716_v19 = vmul.f32 %v4708_v21, %v4529_v17  ;;  %v1837_v38 = vmul.f32 %v4708_v21, %v4522_v50 }
 0x30b   : > { %v4563_v63 = vsel %vm338_vm4, %v2281_v27, %v2280_v55  ;;  %v4660_v11 = vsel %vm338_vm4, %v2282_v39, %v2281_v27  ;;  %v1572_v55 = vmul.f32 %v1570_v34, %v4620_v31  ;;  %v1571_v27 = vmul.f32 %v1570_v34, %v4611_v2 }
 0x30c   : > { %v2578_v18 = vmul.f32 %v4556_v40, %v4563_v63  ;;  %v4665_v44 = vsel %vm569_vm5, %v2516_v26, %v2517_v22  ;;  %v1844_v6 = vrot.slane %v4716_v19, 1  ;;  %v2332_v57 = vmul.f32 %v2330_v32, %v4660_v11 }
 0x30d   : > { %1689 = vrot.lane.b32.xlu0 %v1685_v45, %s3337_s28  ;;  %1677 = vrot.lane.b32.xlu1 %v1672_v7, %s3337_s28  ;;  %v4679_v45 = vstv %s2987_s14  ;;  %v1584_v7 = vstv %s2971_s24  ;;  %s4740_s14 = sld [smem:[#allocation11 + $0x49]]  ;;  %s3015_s24 = sld [smem:[#allocation11 + $0x2b]]  ;;  %v4753_v39 = vmul.f32 %v2174_v53, %v4533_v4  ;;  %v2175_v5 = vmul.f32 %v2174_v53, %v4535_v20 }
 0x30e   : > { %v2585_v60 = vrot.slane %v2578_v18, 1  ;;  %v4683_v59 = vmul.f32 %v4679_v45, %v4529_v17  ;;  %v1795_v18 = vmul.f32 %v4679_v45, %v4522_v50 }
 0x310   : > { %v4582_v47 = vsel %vm569_vm5, %v2583_v0, %v2585_v60  ;;  %v1802_v60 = vrot.slane %v4683_v59, 1  ;;  %v1801_v29 = vrot.slane %v1795_v18, 1  ;;  %v2181_v18 = vrot.slane %v2175_v5, 1 }
 0x311   : > { %1703 = vrot.lane.b32.xlu0 %v1699_v12, %s3337_s28  ;;  %1691 = vrot.lane.b32.xlu1 %v1686_v15, %s3337_s28  ;;  %v1586_v12 = vmul.f32 %v1584_v7, %v4620_v31  ;;  %v1585_v15 = vmul.f32 %v1584_v7, %v4611_v2  ;;  %v1759_v7 = vrot.slane %v4611_v2, 1  ;;  %v2331_v5 = vmul.f32 %v2330_v32, %v4563_v63 }
 0x313   : > { %v2344_v26 = vstv %s4740_s14  ;;  %v2195_v34 = vstv %s3015_s24  ;;  %s3036_s14 = sld [smem:[#allocation11 + $0x32]]  ;;  %s3037_s24 = sld [smem:[#allocation11 + $0x4d]] }
 0x314   : > { %v2345_v32 = vmul.f32 %v2344_v26, %v4563_v63 }
 0x315   : > { %2055 = vrot.lane.b32.xlu0 %v2051_v25, %s3337_s28  ;;  %1705 = vrot.lane.b32.xlu1 %v1700_v56, %s3337_s28  ;;  %v4698_v25 = vmul.f32 %v4693_v36, %v4529_v17  ;;  %v1936_v56 = vstv %s4675_s30  ;;  %s3041_s30 = sld [smem:[#allocation11 + $0x19]] }
 0x316   : > { %v1937_v61 = vmul.f32 %v1936_v56, %v4634_v8 }
 0x319   : > { %2069 = vrot.lane.b32.xlu0 %v2065_v10, %s3337_s28  ;;  %2057 = vrot.lane.b32.xlu1 %v2052_v28, %s3337_s28  ;;  %v1816_v10 = vmul.f32 %v4693_v36, %v4522_v50  ;;  %v1938_v28 = vmul.f32 %v1936_v56, %v4637_v62  ;;  %v2216_v56 = vstv %s3016_s7  ;;  %s2972_s7 = sld [smem:[#allocation11 + $0x2]] }
 0x31d   : > { %2083 = vrot.lane.b32.xlu0 %v2079_v24, %s3337_s28  ;;  %2071 = vrot.lane.b32.xlu1 %v2066_v9, %s3337_s28  ;;  %v1803_v24 = vsel %vm569_vm5, %v1801_v29, %v1802_v60  ;;  %v1823_v9 = vrot.slane %v4698_v25, 1  ;;  %v2198_v25 = vmul.f32 %v2195_v34, %v4634_v8 }
 0x321   : > { %2085 = vrot.lane.b32.xlu1 %v2080_v43, %s3337_s28  ;;  %2435 = vrot.lane.b32.xlu0 %v2431_v37, %s3337_s28  ;;  %v1950_v43 = vstv %s4689_s13  ;;  %v1822_v37 = vrot.slane %v1816_v10, 1  ;;  %s2982_s13 = sld [smem:[#allocation11 + $0x20]] }
 0x322   : > { %v1951_v1 = vmul.f32 %v1950_v43, %v4634_v8 }
 0x325   : > { %2437 = vrot.lane.b32.xlu1 %v2432_v14, %s3337_s28  ;;  %2449 = vrot.lane.b32.xlu0 %v2445_v49, %s3337_s28  ;;  %v1952_v14 = vmul.f32 %v1950_v43, %v4637_v62  ;;  %v1824_v49 = vsel %vm569_vm5, %v1822_v37, %v1823_v9  ;;  %v2217_v37 = vmul.f32 %v2216_v56, %v4535_v20 }
 0x329   : > { %2451 = vrot.lane.b32.xlu1 %v2446_v46, %s3337_s28  ;;  %2463 = vrot.lane.b32.xlu0 %v2459_v51, %s3337_s28  ;;  %v1964_v46 = vstv %s4705_s15  ;;  %v1843_v51 = vrot.slane %v1837_v38, 1  ;;  %s2983_s15 = sld [smem:[#allocation11 + $0x3b]] }
 0x32a   : > { %v1966_v33 = vmul.f32 %v1964_v46, %v4637_v62 }
 0x32b   : > { %v1845_v16 = vsel %vm569_vm5, %v1843_v51, %v1844_v6 }
 0x32d   : > { %2465 = vrot.lane.b32.xlu1 %v2460_v23, %s3337_s28  ;;  %1531 = vrot.lane.b32.xlu0 %v4611_v2, %s3336_s26  ;;  %v2316_v23 = vstv %s4718_s27  ;;  %s3008_s27 = sld [smem:[#allocation11 + $0xe]] }
 0x32e   : > { %v2318_v42 = vmul.f32 %v2316_v23, %v4660_v11 }
 0x331   : > { %1534 = vrot.lane.b32.xlu1 %v4620_v31, %s3336_s26  ;;  %1763 = vrot.lane.b32.xlu0 %v4625_v58, %s3336_s26 }
 0x335   : > { %1905 = vrot.lane.b32.xlu1 %v4634_v8, %s3336_s26  ;;  %1908 = vrot.lane.b32.xlu0 %v4637_v62, %s3336_s26 }
 0x339   : > { %2143 = vrot.lane.b32.xlu1 %v4648_v30, %s3336_s26  ;;  %2285 = vrot.lane.b32.xlu0 %v4563_v63, %s3336_s26 }
 0x33d   : > { %2288 = vrot.lane.b32.xlu1 %v4660_v11, %s3336_s26  ;;  %2523 = vrot.lane.b32.xlu0 %v4665_v44, %s3336_s26 }
 0x341   : > { %1563 = vrot.lane.b32.xlu1 %v1558_v48, %s3337_s28  ;;  %1561 = vrot.lane.b32.xlu0 %v1557_v13, %s3337_s28  ;;  %v2346_v48 = vmul.f32 %v2344_v26, %v4660_v11  ;;  %v1965_v13 = vmul.f32 %v1964_v46, %v4634_v8  ;;  %v2223_v46 = vrot.slane %v2217_v37, 1 }
 0x345   : > { %1577 = vrot.lane.b32.xlu1 %v1572_v55, %s3337_s28  ;;  %1575 = vrot.lane.b32.xlu0 %v1571_v27, %s3337_s28  ;;  %v2182_v55 = vrot.slane %v4753_v39, 1  ;;  %v4762_v27 = vmul.f32 %v2195_v34, %v4533_v4 }
 0x347   : > { %v2183_v29 = vsel %vm569_vm5, %v2181_v18, %v2182_v55  ;;  %v2203_v10 = vrot.slane %v4762_v27, 1 }
 0x349   : > { %1591 = vrot.lane.b32.xlu1 %v1586_v12, %s3337_s28  ;;  %1589 = vrot.lane.b32.xlu0 %v1585_v15, %s3337_s28  ;;  %v2196_v12 = vmul.f32 %v2195_v34, %v4535_v20  ;;  %v4771_v15 = vsel %vm569_vm5, %v1757_v41, %v1759_v7  ;;  %v1797_v41 = vmul.f32 %v4679_v45, %v4611_v2 }
 0x34a   : > { %v2219_v7 = vmul.f32 %v2216_v56, %v4634_v8  ;;  %v2576_v34 = vmul.f32 %v4556_v40, %v4548_v35 }
 0x34b   : > { %v2202_v43 = vrot.slane %v2196_v12, 1  ;;  %v1804_v51 = vrot.slane %v1797_v41, 1 }
 0x34d   : > { %1943 = vrot.lane.b32.xlu1 %v1938_v28, %s3337_s28  ;;  %1806 = vrot.lane.b32.xlu0 %v1803_v24, %s3337_s28  ;;  %v2519_v28 = vrot.slane %v4563_v63, 1  ;;  %v4777_v24 = vmul.f32 %v2216_v56, %v4533_v4  ;;  %v2204_v38 = vsel %vm569_vm5, %v2202_v43, %v2203_v10  ;;  %v2582_v43 = vrot.slane %v2576_v34, 1 }
 0x351   : > { %1957 = vrot.lane.b32.xlu1 %v1952_v14, %s3337_s28  ;;  %1827 = vrot.lane.b32.xlu0 %v1824_v49, %s3337_s28  ;;  %v4789_v14 = vsel %vm569_vm5, %v2517_v22, %v2519_v28  ;;  %v2224_v49 = vrot.slane %v4777_v24, 1  ;;  %v1805_v22 = vsel %vm569_vm5, %v1802_v60, %v1804_v51  ;;  %v2226_v24 = vrot.slane %v2219_v7, 1 }
 0x353   : > { %v2225_v45 = vsel %vm569_vm5, %v2223_v46, %v2224_v49  ;;  %v2227_v41 = vsel %vm569_vm5, %v2224_v49, %v2226_v24  ;;  %v2139_v46 = vrot.slane %v4634_v8, 1 }
 0x355   : > { %1971 = vrot.lane.b32.xlu1 %v1966_v33, %s3337_s28  ;;  %1848 = vrot.lane.b32.xlu0 %v1845_v16, %s3337_s28  ;;  %v1818_v33 = vmul.f32 %v4693_v36, %v4611_v2  ;;  %v1640_v60 = vpop.permute.xlu1 %1639  ;;  %v4854_v49 = vsel %vm569_vm5, %v2137_v3, %v2139_v46 }
 0x359   : > { %2323 = vrot.lane.b32.xlu1 %v2318_v42, %s3337_s28  ;;  %1941 = vrot.lane.b32.xlu0 %v1937_v61, %s3337_s28  ;;  %v1825_v42 = vrot.slane %v1818_v33, 1  ;;  %v1839_v61 = vmul.f32 %v4708_v21, %v4611_v2 }
 0x35b   : > { %v1826_v36 = vsel %vm569_vm5, %v1823_v9, %v1825_v42  ;;  %v1846_v59 = vrot.slane %v1839_v61, 1 }
 0x35d   : > { %2337 = vrot.lane.b32.xlu1 %v2332_v57, %s3337_s28  ;;  %1955 = vrot.lane.b32.xlu0 %v1951_v1, %s3337_s28  ;;  %v2317_v57 = vmul.f32 %v2316_v23, %v4563_v63  ;;  %v2177_v1 = vmul.f32 %v2174_v53, %v4634_v8  ;;  %v1847_v21 = vsel %vm569_vm5, %v1844_v6, %v1846_v59  ;;  %v2205_v6 = vrot.slane %v2198_v25, 1 }
 0x35f   : > { %v2184_v23 = vrot.slane %v2177_v1, 1  ;;  %v2206_v26 = vsel %vm569_vm5, %v2203_v10, %v2205_v6 }
 0x361   : > { %2351 = vrot.lane.b32.xlu1 %v2346_v48, %s3337_s28  ;;  %1969 = vrot.lane.b32.xlu0 %v1965_v13, %s3337_s28  ;;  %v2554_v48 = vstv %s3041_s30  ;;  %v2185_v19 = vsel %vm569_vm5, %v2182_v55, %v2184_v23  ;;  %s2973_s30 = sld [smem:[#allocation11 + $0x1d]] }
 0x362   : > { %v2555_v9 = vmul.f32 %v2554_v48, %v4548_v35  ;;  %v2556_v53 = vmul.f32 %v2554_v48, %v4543_v52  ;;  %v2557_v55 = vmul.f32 %v2554_v48, %v4563_v63 }
 0x363   : > { %v1643_v16 = vpop.permute.xlu0 %1642 }
 0x364   : > { %v2561_v18 = vrot.slane %v2555_v9, 1  ;;  %v2562_v12 = vrot.slane %v2556_v53, 1  ;;  %v2564_v10 = vrot.slane %v2557_v55, 1  ;;  %v1644_v42 = vsel %vm343_vm6, %v1643_v16, %v4529_v17 }
 0x365   : > { %1766 = vrot.lane.b32.xlu1 %v4771_v15, %s3336_s26  ;;  %2186 = vrot.lane.b32.xlu0 %v2183_v29, %s3337_s28 }
 0x366   : > { %v2563_v56 = vsel %vm569_vm5, %v2561_v18, %v2562_v12 }
 0x367   : > { %v2020_v39 = vpop.permute.xlu0 %2019  ;;  %v2023_v13 = vpop.permute.xlu1 %2022 }
 0x369   : > { %2207 = vrot.lane.b32.xlu0 %v2204_v38, %s3337_s28  ;;  %2526 = vrot.lane.b32.xlu1 %v4789_v14, %s3336_s26  ;;  %v2584_v38 = vsel %vm569_vm5, %v2582_v43, %v2583_v0 }
 0x36d   : > { %2228 = vrot.lane.b32.xlu0 %v2225_v45, %s3337_s28  ;;  %1808 = vrot.lane.b32.xlu1 %v1805_v22, %s3337_s28  ;;  %v2565_v45 = vsel %vm569_vm5, %v2562_v12, %v2564_v10  ;;  %v1641_v22 = vsel %vm343_vm6, %v1640_v60, %v4522_v50 }
 0x371   : > { %1829 = vrot.lane.b32.xlu1 %v1826_v36, %s3337_s28  ;;  %2321 = vrot.lane.b32.xlu0 %v2317_v57, %s3337_s28  ;;  %v2024_v57 = vsel %vm343_vm6, %v2023_v13, %v4533_v4  ;;  %v2021_v36 = vsel %vm343_vm6, %v2020_v39, %v4535_v20 }
 0x375   : > { %1850 = vrot.lane.b32.xlu1 %v1847_v21, %s3337_s28  ;;  %2335 = vrot.lane.b32.xlu0 %v2331_v5, %s3337_s28 }
 0x377   : > { %v2403_v27 = vpop.permute.xlu0 %2402 }
 0x378   : > { %v2404_v59 = vsel %vm343_vm6, %v2403_v27, %v4543_v52 }
 0x379   : > { %2188 = vrot.lane.b32.xlu1 %v2185_v19, %s3337_s28  ;;  %2349 = vrot.lane.b32.xlu0 %v2345_v32, %s3337_s28 }
 0x37b   : > { %v2400_v29 = vpop.permute.xlu1 %2399  ;;  %v4828_v28 = vpop.permute.xlu0 %1675 }
 0x37c   : > { %v2401_v60 = vsel %vm343_vm6, %v2400_v29, %v4548_v35 }
 0x37d   : > { %2209 = vrot.lane.b32.xlu1 %v2206_v26, %s3337_s28  ;;  %2566 = vrot.lane.b32.xlu0 %v2563_v56, %s3337_s28 }
 0x37f   : > { %v4835_v40 = vpop.permute.xlu1 %1677  ;;  %v4837_v37 = vpop.permute.xlu0 %1689 }
 0x381   : > { %2230 = vrot.lane.b32.xlu1 %v2227_v41, %s3337_s28  ;;  %2587 = vrot.lane.b32.xlu0 %v2584_v38, %s3337_s28 }
 0x383   : > { %v4846_v51 = vpop.permute.xlu1 %1691  ;;  %v4848_v33 = vpop.permute.xlu0 %1703 }
 0x385   : > { %2568 = vrot.lane.b32.xlu1 %v2565_v45, %s3337_s28  ;;  %2146 = vrot.lane.b32.xlu0 %v4854_v49, %s3336_s26 }
 0x387   : > { %v4859_v54 = vpop.permute.xlu1 %1705  ;;  %v4861_v0 = vpop.permute.xlu0 %2055 }
 0x389   : > { %1645 = vrot.lane.b32.xlu0 %v1641_v22, %s3336_s26  ;;  %1647 = vrot.lane.b32.xlu1 %v1644_v42, %s3336_s26 }
 0x38b   : > { %v4869_v3 = vpop.permute.xlu1 %2057  ;;  %v4871_v61 = vpop.permute.xlu0 %2069 }
 0x38c   : > { %5794 = vst [vmem:[#allocation20_spill] sm:$0xff] %v4869_v3 }
 0x38d   : > { %2027 = vrot.lane.b32.xlu0 %v2024_v57, %s3336_s26  ;;  %2025 = vrot.lane.b32.xlu1 %v2021_v36, %s3336_s26 }
 0x38f   : > { %v4879_v1 = vpop.permute.xlu1 %2071  ;;  %v4881_v16 = vpop.permute.xlu0 %2083 }
 0x390   : > { %5795 = vst [vmem:[#allocation22_spill] sm:$0xff] %v4879_v1 }
 0x391   : > { %2405 = vrot.lane.b32.xlu0 %v2401_v60, %s3336_s26  ;;  %2407 = vrot.lane.b32.xlu1 %v2404_v59, %s3336_s26 }
 0x393   : > { %v4889_v5 = vpop.permute.xlu1 %2085  ;;  %v4891_v39 = vpop.permute.xlu0 %2435 }
 0x394   : > { %5796 = vst [vmem:[#allocation31_spill] sm:$0xff] %v4889_v5  ;;  %5797 = vst [vmem:[#allocation32_spill] sm:$0xff] %v4891_v39 }
 0x397   : > { %v4893_v48 = vpop.permute.xlu1 %2437  ;;  %v4895_v21 = vpop.permute.xlu0 %2449 }
 0x398   : > { %5798 = vst [vmem:[#allocation21_spill] sm:$0xff] %v4893_v48  ;;  %5799 = vst [vmem:[#allocation23_spill] sm:$0xff] %v4895_v21  ;;  %v1726_v21 = vstv %s2982_s13  ;;  %s5075_s13 = sld [smem:[#allocation11 + $0x8]] }
 0x39b   : > { %v4897_v23 = vpop.permute.xlu1 %2451  ;;  %v4899_v25 = vpop.permute.xlu0 %2463 }
 0x39c   : > { %5800 = vst [vmem:[#allocation30_spill] sm:$0xff] %v4897_v23  ;;  %5801 = vst [vmem:[#allocation25_spill] sm:$0xff] %v4899_v25 }
 0x39f   : > { %v4901_v9 = vpop.permute.xlu1 %2465  ;;  %v1532_v53 = vpop.permute.xlu0 %1531 }
 0x3a0   : > { %5802 = vst [vmem:[#allocation24_spill] sm:$0xff] %v4901_v9  ;;  %v1533_v13 = vsel %vm343_vm6, %v1532_v53, %v4611_v2 }
 0x3a1   : > { %1537 = vrot.lane.b32.xlu0 %v1533_v13, %s3336_s26 }
 0x3a3   : > { %v1535_v27 = vpop.permute.xlu1 %1534  ;;  %v1764_v32 = vpop.permute.xlu0 %1763 }
 0x3a4   : > { %v1536_v7 = vsel %vm343_vm6, %v1535_v27, %v4620_v31  ;;  %v1765_v18 = vsel %vm343_vm6, %v1764_v32, %v4625_v58 }
 0x3a5   : > { %1539 = vrot.lane.b32.xlu1 %v1536_v7, %s3336_s26 }
 0x3a7   : > { %v1906_v19 = vpop.permute.xlu1 %1905  ;;  %v1909_v6 = vpop.permute.xlu0 %1908 }
 0x3a8   : > { %v1907_v34 = vsel %vm343_vm6, %v1906_v19, %v4634_v8  ;;  %v1910_v24 = vsel %vm343_vm6, %v1909_v6, %v4637_v62 }
 0x3a9   : > { %1911 = vrot.lane.b32.xlu0 %v1907_v34, %s3336_s26  ;;  %1769 = vrot.lane.b32.xlu1 %v1765_v18, %s3336_s26 }
 0x3ab   : > { %v2144_v12 = vpop.permute.xlu1 %2143  ;;  %v2286_v29 = vpop.permute.xlu0 %2285 }
 0x3ac   : > { %v2145_v26 = vsel %vm343_vm6, %v2144_v12, %v4648_v30  ;;  %v2287_v55 = vsel %vm343_vm6, %v2286_v29, %v4563_v63 }
 0x3ad   : > { %2149 = vrot.lane.b32.xlu0 %v2145_v26, %s3336_s26  ;;  %1913 = vrot.lane.b32.xlu1 %v1910_v24, %s3336_s26 }
 0x3af   : > { %v2289_v56 = vpop.permute.xlu1 %2288  ;;  %v2524_v43 = vpop.permute.xlu0 %2523 }
 0x3b0   : > { %v2290_v41 = vsel %vm343_vm6, %v2289_v56, %v4660_v11  ;;  %v2525_v46 = vsel %vm343_vm6, %v2524_v43, %v4665_v44 }
 0x3b1   : > { %2293 = vrot.lane.b32.xlu0 %v2290_v41, %s3336_s26  ;;  %2291 = vrot.lane.b32.xlu1 %v2287_v55, %s3336_s26 }
 0x3b3   : > { %v4927_v38 = vpop.permute.xlu1 %1563  ;;  %v4929_v10 = vpop.permute.xlu0 %1561 }
 0x3b5   : > { %2529 = vrot.lane.b32.xlu1 %v2525_v46, %s3336_s26 }
 0x3b7   : > { %v4934_v45 = vpop.permute.xlu1 %1577  ;;  %v4936_v22 = vpop.permute.xlu0 %1575 }
 0x3bb   : > { %v4938_v42 = vpop.permute.xlu1 %1591  ;;  %v4940_v57 = vpop.permute.xlu0 %1589 }
 0x3bf   : > { %v4942_v36 = vpop.permute.xlu1 %1943  ;;  %v4944_v59 = vpop.permute.xlu0 %1806 }
 0x3c0   : > { %5803 = vst [vmem:[#allocation37_spill] sm:$0xff] %v4942_v36 }
 0x3c3   : > { %v4946_v60 = vpop.permute.xlu1 %1957  ;;  %v4948_v53 = vpop.permute.xlu0 %1827 }
 0x3c4   : > { %5804 = vst [vmem:[#allocation29_spill] sm:$0xff] %v4946_v60 }
 0x3c7   : > { %v4950_v13 = vpop.permute.xlu1 %1971  ;;  %v4952_v27 = vpop.permute.xlu0 %1848 }
 0x3c8   : > { %5805 = vst [vmem:[#allocation36_spill] sm:$0xff] %v4950_v13 }
 0x3cb   : > { %v4954_v32 = vpop.permute.xlu1 %2323  ;;  %v4956_v7 = vpop.permute.xlu0 %1941 }
 0x3cc   : > { %5806 = vst [vmem:[#allocation26_spill] sm:$0xff] %v4954_v32 }
 0x3cf   : > { %v4958_v19 = vpop.permute.xlu1 %2337  ;;  %v4960_v6 = vpop.permute.xlu0 %1955 }
 0x3d0   : > { %5807 = vst [vmem:[#allocation27_spill] sm:$0xff] %v4958_v19 }
 0x3d3   : > { %v4962_v18 = vpop.permute.xlu1 %2351  ;;  %v4964_v34 = vpop.permute.xlu0 %1969 }
 0x3d4   : > { %5808 = vst [vmem:[#allocation51_spill] sm:$0xff] %v4962_v18 }
 0x3d7   : > { %v1767_v12 = vpop.permute.xlu1 %1766  ;;  %v4966_v29 = vpop.permute.xlu0 %2186 }
 0x3d8   : > { %v1768_v24 = vsel %vm343_vm6, %v1767_v12, %v4771_v15 }
 0x3d9   : > { %1771 = vrot.lane.b32.xlu0 %v1768_v24, %s3336_s26 }
 0x3db   : > { %v2527_v26 = vpop.permute.xlu1 %2526  ;;  %v4971_v56 = vpop.permute.xlu0 %2207 }
 0x3dc   : > { %v2528_v43 = vsel %vm343_vm6, %v2527_v26, %v4789_v14 }
 0x3dd   : > { %2531 = vrot.lane.b32.xlu0 %v2528_v43, %s3336_s26 }
 0x3df   : > { %v4976_v55 = vpop.permute.xlu1 %1808  ;;  %v4978_v41 = vpop.permute.xlu0 %2228 }
 0x3e3   : > { %v4980_v46 = vpop.permute.xlu1 %1829  ;;  %v4982_v9 = vpop.permute.xlu0 %2321 }
 0x3e4   : > { %5809 = vst [vmem:[#allocation48_spill] sm:$0xff] %v4980_v46  ;;  %5810 = vst [vmem:[#allocation34_spill] sm:$0xff] %v4982_v9 }
 0x3e7   : > { %v4984_v23 = vpop.permute.xlu1 %1850  ;;  %v4986_v12 = vpop.permute.xlu0 %2335 }
 0x3e8   : > { %5811 = vst [vmem:[#allocation43_spill] sm:$0xff] %v4984_v23  ;;  %5812 = vst [vmem:[#allocation44_spill] sm:$0xff] %v4986_v12 }
 0x3eb   : > { %v4988_v24 = vpop.permute.xlu1 %2188  ;;  %v4990_v18 = vpop.permute.xlu0 %2349 }
 0x3ec   : > { %5813 = vst [vmem:[#allocation41_spill] sm:$0xff] %v4988_v24  ;;  %5814 = vst [vmem:[#allocation38_spill] sm:$0xff] %v4990_v18  ;;  %v1712_v24 = vstv %s2981_s17  ;;  %s2974_s17 = sld [smem:[#allocation11 + $0x38]] }
 0x3ef   : > { %v4992_v48 = vpop.permute.xlu1 %2209  ;;  %v4994_v26 = vpop.permute.xlu0 %2566 }
 0x3f0   : > { %5815 = vst [vmem:[#allocation45_spill] sm:$0xff] %v4992_v48  ;;  %5816 = vst [vmem:[#allocation50_spill] sm:$0xff] %v4994_v26 }
 0x3f3   : > { %v4996_v43 = vpop.permute.xlu1 %2230  ;;  %v4998_v19 = vpop.permute.xlu0 %2587 }
 0x3f4   : > { %5817 = vst [vmem:[#allocation28_spill] sm:$0xff] %v4996_v43  ;;  %5818 = vst [vmem:[#allocation33_spill] sm:$0xff] %v4998_v19 }
 0x3f7   : > { %v5000_v32 = vpop.permute.xlu1 %2568  ;;  %v2147_v5 = vpop.permute.xlu0 %2146 }
 0x3f8   : > { %5819 = vst [vmem:[#allocation53_spill] sm:$0xff] %v5000_v32  ;;  %v2148_v25 = vsel %vm343_vm6, %v2147_v5, %v4854_v49 }
 0x3f9   : > { %2151 = vrot.lane.b32.xlu1 %v2148_v25, %s3336_s26  ;;  %s3009_s26 = sld [smem:[#allocation11 + $0x29]] }
 0x3fb   : > { %v1648_v1 = vpop.permute.xlu1 %1647  ;;  %v1646_v48 = vpop.permute.xlu0 %1645 }
 0x3fc   : > { %v5007_v26 = vsel %vm343_vm6, %v1648_v1, %v4529_v17  ;;  %v5011_v43 = vsel %vm343_vm6, %v1646_v48, %v4522_v50  ;;  %v1740_v17 = vstv %s2983_s15  ;;  %s5079_s15 = sld [smem:[#allocation11 + $0xb]] }
 0x3fd   : > { %v1714_v32 = vmul.f32 %v1712_v24, %v5007_v26  ;;  %v1713_v19 = vmul.f32 %v1712_v24, %v5011_v43  ;;  %v1728_v5 = vmul.f32 %v1726_v21, %v5007_v26  ;;  %v1727_v25 = vmul.f32 %v1726_v21, %v5011_v43 }
 0x3fe   : > { %v1742_v50 = vmul.f32 %v1740_v17, %v5007_v26  ;;  %v1741_v48 = vmul.f32 %v1740_v17, %v5011_v43  ;;  %v2092_v21 = vstv %s3008_s27  ;;  %s5083_s27 = sld [smem:[#allocation11 + $0x23]] }
 0x3ff   : > { %1719 = vrot.lane.b32.xlu1 %v1714_v32, %s3338_s29  ;;  %1717 = vrot.lane.b32.xlu0 %v1713_v19, %s3338_s29  ;;  %v2026_v1 = vpop.permute.xlu1 %2025  ;;  %v2028_v13 = vpop.permute.xlu0 %2027 }
 0x400   : > { %v5025_v32 = vsel %vm343_vm6, %v2026_v1, %v4535_v20  ;;  %v5029_v19 = vsel %vm343_vm6, %v2028_v13, %v4533_v4  ;;  %v2120_v13 = vstv %s3010_s6  ;;  %s5100_s6 = sld [smem:[#allocation11 + $0x3e]] }
 0x401   : > { %5820 = vst [vmem:[#allocation47_spill] sm:$0xff] %v5029_v19  ;;  %v2093_v24 = vmul.f32 %v2092_v21, %v5025_v32 }
 0x403   : > { %1733 = vrot.lane.b32.xlu1 %v1728_v5, %s3338_s29  ;;  %1731 = vrot.lane.b32.xlu0 %v1727_v25, %s3338_s29  ;;  %v2094_v5 = vmul.f32 %v2092_v21, %v5029_v19  ;;  %v2106_v25 = vstv %s3009_s26  ;;  %v2408_v17 = vpop.permute.xlu1 %2407  ;;  %v2406_v1 = vpop.permute.xlu0 %2405  ;;  %s5087_s26 = sld [smem:[#allocation11 + $0x26]] }
 0x404   : > { %v2107_v20 = vmul.f32 %v2106_v25, %v5025_v32  ;;  %v2108_v4 = vmul.f32 %v2106_v25, %v5029_v19  ;;  %v5045_v21 = vsel %vm343_vm6, %v2408_v17, %v4543_v52 }
 0x405   : > { %5821 = vst [vmem:[#allocation42_spill] sm:$0xff] %v5045_v21 }
 0x407   : > { %1747 = vrot.lane.b32.xlu1 %v1742_v50, %s3338_s29  ;;  %1745 = vrot.lane.b32.xlu0 %v1741_v48, %s3338_s29  ;;  %v2121_v50 = vmul.f32 %v2120_v13, %v5025_v32  ;;  %v2122_v48 = vmul.f32 %v2120_v13, %v5029_v19  ;;  %v2500_v13 = vstv %s3037_s24  ;;  %s5118_s24 = sld [smem:[#allocation11 + $0x2f]] }
 0x40b   : > { %2097 = vrot.lane.b32.xlu0 %v2093_v24, %s3338_s29  ;;  %2099 = vrot.lane.b32.xlu1 %v2094_v5, %s3338_s29  ;;  %v5049_v24 = vsel %vm343_vm6, %v2406_v1, %v4548_v35  ;;  %v2472_v5 = vstv %s3035_s23  ;;  %s5105_s23 = sld [smem:[#allocation11 + $0x41]] }
 0x40c   : > { %5822 = vst [vmem:[#allocation54_spill] sm:$0xff] %v5049_v24  ;;  %v2474_v25 = vmul.f32 %v2472_v5, %v5045_v21 }
 0x40d   : > { %v2372_v12 = vstv %s5118_s24  ;;  %s2975_s24 = sld [smem:[#allocation11 + $0x3]] }
 0x40f   : > { %2111 = vrot.lane.b32.xlu0 %v2107_v20, %s3338_s29  ;;  %2113 = vrot.lane.b32.xlu1 %v2108_v4, %s3338_s29  ;;  %v2473_v20 = vmul.f32 %v2472_v5, %v5049_v24  ;;  %v2486_v4 = vstv %s3036_s14  ;;  %s5110_s14 = sld [smem:[#allocation11 + $0x14]] }
 0x410   : > { %v2488_v52 = vmul.f32 %v2486_v4, %v5045_v21  ;;  %v2487_v35 = vmul.f32 %v2486_v4, %v5049_v24 }
 0x411   : > { %v2006_v3 = vstv %s5105_s23  ;;  %s1543_s23 = sld [smem:[#allocation11]] }
 0x413   : > { %2125 = vrot.lane.b32.xlu0 %v2121_v50, %s3338_s29  ;;  %2127 = vrot.lane.b32.xlu1 %v2122_v48, %s3338_s29  ;;  %v1538_v17 = vpop.permute.xlu0 %1537  ;;  %v2502_v50 = vmul.f32 %v2500_v13, %v5045_v21  ;;  %v2501_v48 = vmul.f32 %v2500_v13, %v5049_v24  ;;  %v1612_v13 = vstv %s2973_s30  ;;  %s5141_s30 = sld [smem:[#allocation11 + $0x11]] }
 0x414   : > { %v5065_v5 = vsel %vm343_vm6, %v1538_v17, %v4611_v2  ;;  %v1626_v17 = vstv %s2974_s17  ;;  %s5148_s17 = sld [smem:[#allocation11 + $0x2c]] }
 0x415   : > { %v2358_v60 = vstv %s5110_s14  ;;  %s2967_s14 = sld [smem:[#allocation11 + $0x1b]] }
 0x417   : > { %2479 = vrot.lane.b32.xlu1 %v2474_v25, %s3338_s29  ;;  %2477 = vrot.lane.b32.xlu0 %v2473_v20, %s3338_s29  ;;  %v1540_v1 = vpop.permute.xlu1 %1539  ;;  %v1598_v20 = vstv %s2972_s7  ;;  %s5134_s7 = sld [smem:[#allocation11 + $0x4a]] }
 0x418   : > { %v5069_v25 = vsel %vm343_vm6, %v1540_v1, %v4620_v31  ;;  %v1613_v31 = vmul.f32 %v1612_v13, %v5065_v5 }
 0x419   : > { %v1614_v2 = vmul.f32 %v1612_v13, %v5069_v25  ;;  %v1857_v13 = vstv %s5075_s13  ;;  %s5159_s13 = sld [smem:[#allocation11 + $0x47]] }
 0x41b   : > { %2493 = vrot.lane.b32.xlu1 %v2488_v52, %s3338_s29  ;;  %2491 = vrot.lane.b32.xlu0 %v2487_v35, %s3338_s29  ;;  %v1770_v4 = vpop.permute.xlu1 %1769  ;;  %v1600_v52 = vmul.f32 %v1598_v20, %v5069_v25  ;;  %v1599_v35 = vmul.f32 %v1598_v20, %v5065_v5  ;;  %v1912_v1 = vpop.permute.xlu0 %1911  ;;  %v1627_v20 = vmul.f32 %v1626_v17, %v5065_v5 }
 0x41f   : > { %2507 = vrot.lane.b32.xlu1 %v2502_v50, %s3338_s29  ;;  %2505 = vrot.lane.b32.xlu0 %v2501_v48, %s3338_s29  ;;  %v1914_v50 = vpop.permute.xlu1 %1913  ;;  %v1628_v48 = vmul.f32 %v1626_v17, %v5069_v25  ;;  %v1871_v17 = vstv %s5083_s27  ;;  %s5190_s27 = sld [smem:[#allocation11 + $0x1a]] }
 0x423   : > { %1605 = vrot.lane.b32.xlu1 %v1600_v52, %s3338_s29  ;;  %1603 = vrot.lane.b32.xlu0 %v1599_v35, %s3338_s29  ;;  %v5093_v52 = vsel %vm343_vm6, %v1770_v4, %v4625_v58  ;;  %v5097_v35 = vsel %vm343_vm6, %v1914_v50, %v4637_v62  ;;  %v1992_v62 = vstv %s5087_s26  ;;  %s5195_s26 = sld [smem:[#allocation11 + $0x35]] }
 0x424   : > { %5823 = vst [vmem:[#allocation35_spill] sm:$0xff] %v5097_v35  ;;  %v1858_v4 = vmul.f32 %v1857_v13, %v5093_v52  ;;  %v1994_v50 = vmul.f32 %v1992_v62, %v5097_v35  ;;  %v2008_v18 = vmul.f32 %v2006_v3, %v5097_v35 }
 0x427   : > { %1619 = vrot.lane.b32.xlu1 %v1614_v2, %s3338_s29  ;;  %1617 = vrot.lane.b32.xlu0 %v1613_v31, %s3338_s29  ;;  %v1978_v2 = vstv %s5079_s15  ;;  %v2150_v31 = vpop.permute.xlu0 %2149  ;;  %s3043_s15 = sld [smem:[#allocation11 + $0x4f]] }
 0x428   : > { %v1980_v58 = vmul.f32 %v1978_v2, %v5097_v35 }
 0x42b   : > { %1633 = vrot.lane.b32.xlu1 %v1628_v48, %s3338_s29  ;;  %1631 = vrot.lane.b32.xlu0 %v1627_v20, %s3338_s29  ;;  %v1872_v48 = vmul.f32 %v1871_v17, %v5093_v52  ;;  %v1885_v20 = vstv %s5100_s6  ;;  %v2294_v21 = vpop.permute.xlu0 %2293  ;;  %s5207_s6 = sld [smem:[#allocation11 + $0x50]] }
 0x42c   : > { %v5131_v39 = vsel %vm343_vm6, %v2294_v21, %v4660_v11  ;;  %v2386_v21 = vstv %s5134_s7  ;;  %s5274_s7 = sld [smem:[#allocation11 + $0x36]] }
 0x42d   : > { %5824 = vst [vmem:[#allocation39_spill] sm:$0xff] %v5131_v39  ;;  %v2374_v11 = vmul.f32 %v2372_v12, %v5131_v39 }
 0x42f   : > { %1985 = vrot.lane.b32.xlu1 %v1980_v58, %s3338_s29  ;;  %1862 = vrot.lane.b32.xlu0 %v1858_v4, %s3338_s29  ;;  %v1886_v58 = vmul.f32 %v1885_v20, %v5093_v52  ;;  %v5127_v4 = vsel %vm343_vm6, %v1912_v1, %v4634_v8  ;;  %v2388_v1 = vmul.f32 %v2386_v21, %v5131_v39 }
 0x430   : > { %v1993_v8 = vmul.f32 %v1992_v62, %v5127_v4 }
 0x433   : > { %1999 = vrot.lane.b32.xlu1 %v1994_v50, %s3338_s29  ;;  %1876 = vrot.lane.b32.xlu0 %v1872_v48, %s3338_s29  ;;  %v1979_v50 = vmul.f32 %v1978_v2, %v5127_v4  ;;  %v2360_v48 = vmul.f32 %v2358_v60, %v5131_v39  ;;  %v5156_v2 = vsel %vm343_vm6, %v2150_v31, %v4648_v30 }
 0x437   : > { %2013 = vrot.lane.b32.xlu1 %v2008_v18, %s3338_s29  ;;  %1890 = vrot.lane.b32.xlu0 %v1886_v58, %s3338_s29  ;;  %v2007_v18 = vmul.f32 %v2006_v3, %v5127_v4  ;;  %v2237_v58 = vstv %s5141_s30  ;;  %s5280_s30 = sld [smem:[#allocation11 + $0x1e]] }
 0x438   : > { %v2238_v62 = vmul.f32 %v2237_v58, %v5156_v2 }
 0x43b   : > { %1983 = vrot.lane.b32.xlu0 %v1979_v50, %s3338_s29  ;;  %2365 = vrot.lane.b32.xlu1 %v2360_v48, %s3338_s29  ;;  %v2251_v50 = vstv %s5148_s17  ;;  %v5689_v48 = vstv %s5159_s13  ;;  %s5291_s17 = sld [smem:[#allocation11 + $0x6]] }
 0x43c   : > { %v2252_v3 = vmul.f32 %v2251_v50, %v5156_v2 }
 0x43f   : > { %1997 = vrot.lane.b32.xlu0 %v1993_v8, %s3338_s29  ;;  %2379 = vrot.lane.b32.xlu1 %v2374_v11, %s3338_s29  ;;  %v2292_v8 = vpop.permute.xlu1 %2291  ;;  %v2266_v11 = vmul.f32 %v5689_v48, %v5156_v2  ;;  %v3156_v48 = vld [vmem:[#allocation3 + $0x30] sm:$0xff] }
 0x443   : > { %2011 = vrot.lane.b32.xlu0 %v2007_v18, %s3338_s29  ;;  %2393 = vrot.lane.b32.xlu1 %v2388_v1, %s3338_s29  ;;  %v5179_v1 = vsel %vm343_vm6, %v2292_v8, %v4563_v63 }
 0x447   : > { %2242 = vrot.lane.b32.xlu0 %v2238_v62, %s3338_s29  ;;  %v2359_v62 = vmul.f32 %v2358_v60, %v5179_v1  ;;  %v3157_v60 = vld [vmem:[#allocation3 + $0x38] sm:$0xff] }
 0x44b   : > { %2256 = vrot.lane.b32.xlu0 %v2252_v3, %s3338_s29  ;;  %v1772_v30 = vpop.permute.xlu0 %1771 }
 0x44c   : > { %v5171_v31 = vsel %vm343_vm6, %v1772_v30, %v4771_v15  ;;  %v2373_v15 = vmul.f32 %v2372_v12, %v5179_v1  ;;  %v2596_v30 = vstv %s3043_s15  ;;  %s5298_s15 = sld [smem:[#allocation11 + $0x3c]] }
 0x44d   : > { %v1859_v18 = vmul.f32 %v1857_v13, %v5171_v31  ;;  %v1873_v3 = vmul.f32 %v1871_v17, %v5171_v31  ;;  %v1887_v13 = vmul.f32 %v1885_v20, %v5171_v31  ;;  %v2597_v8 = vmul.f32 %v3156_v48, %v2596_v30  ;;  %v2530_v20 = vpop.permute.xlu1 %2529 }
 0x44e   : > { %v2599_v39 = vmul.f32 %v2596_v30, %v4563_v63  ;;  %v2598_v17 = vmul.f32 %v3157_v60, %v2596_v30  ;;  %v5202_v48 = vsel %vm343_vm6, %v2530_v20, %v4665_v44  ;;  %v2672_v60 = vld [vmem:[#allocation2] sm:$0xff] }
 0x44f   : > { %2270 = vrot.lane.b32.xlu0 %v2266_v11, %s3338_s29  ;;  %1864 = vrot.lane.b32.xlu1 %v1859_v18, %s3338_s29  ;;  %v2387_v11 = vmul.f32 %v2386_v21, %v5179_v1  ;;  %v2603_v18 = vrot.slane %v2597_v8, 1  ;;  %5825 = vst [vmem:[#allocation49_spill] sm:$0xff] %v5202_v48 }
 0x450   : > { %v2606_v12 = vrot.slane %v2599_v39, 1  ;;  %v2604_v63 = vrot.slane %v2598_v17, 1  ;;  %v2532_v17 = vpop.permute.xlu0 %2531 }
 0x452   : > { %v2607_v21 = vsel %vm569_vm5, %v2604_v63, %v2606_v12 }
 0x453   : > { %2363 = vrot.lane.b32.xlu0 %v2359_v62, %s3338_s29  ;;  %1878 = vrot.lane.b32.xlu1 %v1873_v3, %s3338_s29  ;;  %v2605_v62 = vsel %vm569_vm5, %v2603_v18, %v2604_v63  ;;  %v2617_v3 = vstv %s5190_s27  ;;  %v2696_v18 = vld [vmem:[#allocation2 + $0x18] sm:$0xff]  ;;  %s5321_s27 = sld [smem:[#allocation11 + $0x24]] }
 0x454   : > { %v2618_v39 = vmul.f32 %v2617_v3, %v5202_v48 }
 0x457   : > { %2377 = vrot.lane.b32.xlu0 %v2373_v15, %s3338_s29  ;;  %1892 = vrot.lane.b32.xlu1 %v1887_v13, %s3338_s29  ;;  %v2645_v15 = vstv %s5207_s6  ;;  %s5352_s6 = sld [smem:[#allocation11 + $0xc]] }
 0x458   : > { %v2646_v13 = vmul.f32 %v2645_v15, %v5202_v48 }
 0x45b   : > { %2391 = vrot.lane.b32.xlu0 %v2387_v11, %s3338_s29  ;;  %2589 = vrot.lane.b32.xlu1 %v4582_v47, %s3337_s28  ;;  %v2631_v47 = vstv %s5195_s26  ;;  %s5333_s26 = sld [smem:[#allocation11 + $0x3f]] }
 0x45c   : > { %v2632_v44 = vmul.f32 %v2631_v47, %v5202_v48 }
 0x45f   : > { %2608 = vrot.lane.b32.xlu0 %v2605_v62, %s3337_s28  ;;  %2610 = vrot.lane.b32.xlu1 %v2607_v21, %s3337_s28 }
 0x463   : > { %2622 = vrot.lane.b32.xlu0 %v2618_v39, %s3338_s29 }
 0x467   : > { %2636 = vrot.lane.b32.xlu0 %v2632_v44, %s3338_s29  ;;  %v2673_v44 = vld [vmem:[#allocation2 + $0x8] sm:$0xff] }
 0x46b   : > { %v2152_v30 = vpop.permute.xlu1 %2151  ;;  %2650 = vrot.lane.b32.xlu0 %v2646_v13, %s3338_s29 }
 0x46c   : > { %v5221_v8 = vsel %vm343_vm6, %v2152_v30, %v4854_v49  ;;  %v2721_v49 = vld [vmem:[#allocation2 + $0x30] sm:$0xff]  ;;  %v5248_v30 = vsel %vm343_vm6, %v2532_v17, %v4789_v14 }
 0x46d   : > { %5826 = vst [vmem:[#allocation46_spill] sm:$0xff] %v5221_v8  ;;  %v2239_v11 = vmul.f32 %v2237_v58, %v5221_v8  ;;  %v2253_v63 = vmul.f32 %v2251_v50, %v5221_v8  ;;  %v5827_v58 = vstv %s5159_s13  ;;  %5828 = vst [vmem:[#allocation40_spill] sm:$0xff] %v5248_v30  ;;  %s5293_s13 = sld [smem:[#allocation11 + $0x9]] }
 0x46e   : > { %v2267_v39 = vmul.f32 %v5827_v58, %v5221_v8  ;;  %v2633_v58 = vmul.f32 %v2631_v47, %v5248_v30  ;;  %v2722_v47 = vld [vmem:[#allocation2 + $0x38] sm:$0xff] }
 0x46f   : > { %2676 = vrot.lane.b32.xlu0 %v2672_v60, %s3337_s28  ;;  %2244 = vrot.lane.b32.xlu1 %v2239_v11, %s3338_s29 }
 0x471   : > { %v5226_v12 = vpop.permute.xlu1 %1719  ;;  %v5228_v20 = vpop.permute.xlu0 %1717 }
 0x473   : > { %2700 = vrot.lane.b32.xlu0 %v2696_v18, %s3337_s28  ;;  %2258 = vrot.lane.b32.xlu1 %v2253_v63, %s3338_s29  ;;  %v2619_v18 = vmul.f32 %v2617_v3, %v5248_v30  ;;  %v2697_v3 = vld [vmem:[#allocation2 + $0x20] sm:$0xff] }
 0x475   : > { %v5233_v62 = vpop.permute.xlu1 %1733  ;;  %v5235_v21 = vpop.permute.xlu0 %1731 }
 0x477   : > { %2725 = vrot.lane.b32.xlu0 %v2721_v49, %s3337_s28  ;;  %2272 = vrot.lane.b32.xlu1 %v2267_v39, %s3338_s29  ;;  %v2647_v39 = vmul.f32 %v2645_v15, %v5248_v30  ;;  %v1544_v15 = vstv %s1543_s23  ;;  %s5366_s23 = sld [smem:[#allocation11 + $0x27]] }
 0x479   : > { %v5242_v13 = vpop.permute.xlu1 %1747  ;;  %v5244_v50 = vpop.permute.xlu0 %1745 }
 0x47b   : > { %2678 = vrot.lane.b32.xlu1 %v2673_v44, %s3337_s28 }
 0x47d   : > { %v5251_v60 = vpop.permute.xlu1 %2099  ;;  %v5253_v11 = vpop.permute.xlu0 %2097 }
 0x47e   : > { %5829 = vst [vmem:[#allocation52_spill] sm:$0xff] %v5251_v60 }
 0x47f   : > { %2624 = vrot.lane.b32.xlu1 %v2619_v18, %s3338_s29 }
 0x481   : > { %v5257_v63 = vpop.permute.xlu1 %2113  ;;  %v5259_v49 = vpop.permute.xlu0 %2111 }
 0x482   : > { %5830 = vst [vmem:[#allocation55_spill] sm:$0xff] %v5257_v63  ;;  %v1548_v63 = vstv %s2967_s14  ;;  %s5369_s14 = sld [smem:[#allocation11 + $0xf]] }
 0x483   : > { %2638 = vrot.lane.b32.xlu1 %v2633_v58, %s3338_s29 }
 0x485   : > { %v5263_v14 = vpop.permute.xlu1 %2127  ;;  %v5265_v17 = vpop.permute.xlu0 %2125 }
 0x486   : > { %5831 = vst [vmem:[#allocation56_spill] sm:$0xff] %v5263_v14 }
 0x487   : > { %2652 = vrot.lane.b32.xlu1 %v2647_v39, %s3338_s29  ;;  %s5283_s29 = sld [smem:[#allocation11 + $0x39]]  ;;  %v1546_v39 = vmul.f32 %v1544_v15, %v5069_v25 }
 0x489   : > { %v5269_v44 = vpop.permute.xlu1 %2479  ;;  %v5271_v18 = vpop.permute.xlu0 %2477 }
 0x48a   : > { %5832 = vst [vmem:[#allocation57_spill] sm:$0xff] %v5269_v44  ;;  %5833 = vst [vmem:[#allocation58_spill] sm:$0xff] %v5271_v18  ;;  %v1658_v18 = vstv %s5280_s30  ;;  %s5386_s30 = sld [smem:[#allocation11 + $0x12]] }
 0x48b   : > { %2702 = vrot.lane.b32.xlu1 %v2697_v3, %s3337_s28  ;;  %v1545_v3 = vmul.f32 %v1544_v15, %v5065_v5  ;;  %v1660_v46 = vmul.f32 %v1658_v18, %v5007_v26 }
 0x48d   : > { %v5276_v58 = vpop.permute.xlu1 %2493  ;;  %v5278_v14 = vpop.permute.xlu0 %2491  ;;  %v1567_v15 = vadd.f32 %v4929_v10, %v1545_v3 }
 0x48e   : > { %5834 = vst [vmem:[#allocation59_spill] sm:$0xff] %v5276_v58  ;;  %5835 = vst [vmem:[#allocation60_spill] sm:$0xff] %v5278_v14  ;;  %v1652_v58 = vstv %s2975_s24  ;;  %v1552_v14 = vstv %s5274_s7  ;;  %s5377_s24 = sld [smem:[#allocation11 + $0x42]] }
 0x48f   : > { %2727 = vrot.lane.b32.xlu1 %v2722_v47, %s3337_s28  ;;  %s5296_s28 = sld [smem:[#allocation11 + $0x21]]  ;;  %v1568_v47 = vadd.f32 %v4927_v38, %v1546_v39  ;;  %v1654_v48 = vmul.f32 %v1652_v58, %v5007_v26  ;;  %v1653_v19 = vmul.f32 %v1652_v58, %v5011_v43  ;;  %v1554_v24 = vmul.f32 %v1552_v14, %v5069_v25  ;;  %s5380_s7 = sld [smem:[#allocation11 + $0x2a]] }
 0x490   : > { %v1664_v38 = vstv %s5283_s29  ;;  %v1553_v10 = vmul.f32 %v1552_v14, %v5065_v5  ;;  %s5392_s29 = sld [smem:[#allocation11 + $0x45]] }
 0x491   : > { %v5287_v30 = vpop.permute.xlu1 %2507  ;;  %v5289_v44 = vpop.permute.xlu0 %2505 }
 0x492   : > { %5836 = vst [vmem:[#allocation61_spill] sm:$0xff] %v5287_v30  ;;  %5837 = vst [vmem:[#allocation62_spill] sm:$0xff] %v5289_v44  ;;  %v1550_v30 = vmul.f32 %v1548_v63, %v5069_v25  ;;  %v1549_v44 = vmul.f32 %v1548_v63, %v5065_v5 }
 0x494   : > { %v1582_v63 = vadd.f32 %v4934_v45, %v1550_v30  ;;  %v1581_v9 = vadd.f32 %v4936_v22, %v1549_v44  ;;  %v1595_v45 = vadd.f32 %v4940_v57, %v1553_v10  ;;  %v1788_v22 = vstv %s5298_s15  ;;  %s5422_s15 = sld [smem:[#allocation11 + $0x15]] }
 0x495   : > { %v1606_v60 = vpop.permute.xlu1 %1605  ;;  %v1604_v8 = vpop.permute.xlu0 %1603 }
 0x496   : > { %v1610_v23 = vadd.f32 %v1606_v60, %v1568_v47  ;;  %v1609_v36 = vadd.f32 %v1604_v8, %v1567_v15  ;;  %v1659_v60 = vmul.f32 %v1658_v18, %v5011_v43  ;;  %v1776_v8 = vstv %s5291_s17  ;;  %s5399_s17 = sld [smem:[#allocation11 + $0x2d]] }
 0x497   : > { %v1918_v47 = vstv %s5293_s13  ;;  %v1778_v57 = vmul.f32 %v1776_v8, %v5171_v31  ;;  %s5462_s13 = sld [smem:[#allocation11 + $0x33]] }
 0x498   : > { %v1656_v39 = vadd.f32 %v1654_v48, %v1610_v23  ;;  %v1655_v3 = vadd.f32 %v1653_v19, %v1609_v36  ;;  %v1596_v36 = vadd.f32 %v4938_v42, %v1554_v24  ;;  %v1782_v19 = vstv %s5296_s28  ;;  %s5414_s28 = sld [smem:[#allocation11 + $0x48]] }
 0x499   : > { %v1620_v35 = vpop.permute.xlu1 %1619  ;;  %v1618_v58 = vpop.permute.xlu0 %1617  ;;  %v1777_v42 = vmul.f32 %v1776_v8, %v5093_v52 }
 0x49a   : > { %v1682_v25 = vadd.f32 %v4835_v40, %v1656_v39  ;;  %v1681_v5 = vadd.f32 %v4828_v28, %v1655_v3  ;;  %v1624_v23 = vadd.f32 %v1620_v35, %v1582_v63  ;;  %v1623_v48 = vadd.f32 %v1618_v58, %v1581_v9 }
 0x49b   : > { %v1666_v40 = vmul.f32 %v1664_v38, %v5007_v26  ;;  %v1665_v28 = vmul.f32 %v1664_v38, %v5011_v43  ;;  %v1784_v43 = vmul.f32 %v1782_v19, %v5171_v31 }
 0x49c   : > { %v1662_v30 = vadd.f32 %v1660_v46, %v1624_v23  ;;  %v1661_v14 = vadd.f32 %v1659_v60, %v1623_v48  ;;  %v1723_v44 = vadd.f32 %v5228_v20, %v1681_v5  ;;  %v1724_v18 = vadd.f32 %v5226_v12, %v1682_v25 }
 0x49d   : > { %v1634_v15 = vpop.permute.xlu1 %1633  ;;  %v1632_v9 = vpop.permute.xlu0 %1631  ;;  %v1783_v12 = vmul.f32 %v1782_v19, %v5093_v52  ;;  %v1919_v23 = vmul.f32 %v1918_v47, %v5127_v4  ;;  %v1924_v48 = vstv %s5321_s27  ;;  %s5484_s27 = sld [smem:[#allocation11 + $0x4e]] }
 0x49e   : > { %v1696_v24 = vadd.f32 %v4846_v51, %v1662_v30  ;;  %v1695_v35 = vadd.f32 %v4837_v37, %v1661_v14  ;;  %v1638_v46 = vadd.f32 %v1634_v15, %v1596_v36  ;;  %v1637_v10 = vadd.f32 %v1632_v9, %v1595_v45 }
 0x49f   : > { %v1779_v39 = vadd.f32 %v1777_v42, %v1723_v44  ;;  %v5335_v26 = vadd.f32 %v1778_v57, %v1724_v18  ;;  %v1790_v36 = vmul.f32 %v1788_v22, %v5171_v31  ;;  %v1925_v14 = vmul.f32 %v1924_v48, %v5127_v4 }
 0x4a0   : > { %v1668_v20 = vadd.f32 %v1666_v40, %v1638_v46  ;;  %v1667_v38 = vadd.f32 %v1665_v28, %v1637_v10  ;;  %v1737_v3 = vadd.f32 %v5235_v21, %v1695_v35  ;;  %v1738_v51 = vadd.f32 %v5233_v62, %v1696_v24 }
 0x4a1   : > { %v5340_v37 = vpop.permute.xlu1 %1985  ;;  %v1812_v63 = vadd.f32 %v4944_v59, %v1779_v39  ;;  %v1863_v60 = vpop.permute.xlu0 %1862  ;;  %v1789_v62 = vmul.f32 %v1788_v22, %v5093_v52  ;;  %v2032_v28 = vstv %s5352_s6  ;;  %v2156_v39 = vstv %s5369_s14  ;;  %s5530_s6 = sld [smem:[#allocation12 + $0x1]]  ;;  %s5867_s14 = smov 112  }
 0x4a2   : > { %v1710_v58 = vadd.f32 %v4859_v54, %v1668_v20  ;;  %v1709_v8 = vadd.f32 %v4848_v33, %v1667_v38  ;;  %v1785_v25 = vadd.f32 %v1783_v12, %v1737_v3  ;;  %v5345_v5 = vadd.f32 %v1784_v43, %v1738_v51 }
 0x4a3   : > { %v1868_v21 = vadd.f32 %v1863_v60, %v1812_v63  ;;  %v2044_v38 = vstv %s5377_s24  ;;  %v2157_v63 = vmul.f32 %v2156_v39, %v5156_v2  ;;  %s3059_s24 = smul.u32 768, %s3394_s22  ;;  %s3340_s22 = smov [#allocation14]  }
 0x4a4   : > { %v1833_v59 = vadd.f32 %v4948_v53, %v1785_v25  ;;  %v1751_v54 = vadd.f32 %v5244_v50, %v1709_v8  ;;  %v1752_v33 = vadd.f32 %v5242_v13, %v1710_v58  ;;  %v1930_v53 = vstv %s5333_s26  ;;  %s5514_s26 = sld [smem:[#allocation12]] }
 0x4a5   : > { %v1921_v45 = vadd.f32 %v1919_v23, %v1868_v21  ;;  %v5358_v19 = vpop.permute.xlu1 %1999  ;;  %v1877_v30 = vpop.permute.xlu0 %1876  ;;  %v1931_v22 = vmul.f32 %v1930_v53, %v5127_v4  ;;  %v2038_v4 = vstv %s5366_s23  ;;  %v2045_v8 = vmul.f32 %v2044_v38, %v5025_v32  ;;  %s5540_s23 = sld [smem:[#allocation12 + $0x2]] }
 0x4a6   : > { %v1882_v52 = vadd.f32 %v1877_v30, %v1833_v59  ;;  %v1791_v44 = vadd.f32 %v1789_v62, %v1751_v54  ;;  %v5363_v18 = vadd.f32 %v1790_v36, %v1752_v33  ;;  %v2039_v43 = vmul.f32 %v2038_v4, %v5025_v32 }
 0x4a7   : > { %v1947_v42 = vadd.f32 %v4956_v7, %v1921_v45 }
 0x4a8   : > { %v1927_v13 = vadd.f32 %v1925_v14, %v1882_v52  ;;  %v1854_v31 = vadd.f32 %v4952_v27, %v1791_v44  ;;  %v2033_v27 = vmul.f32 %v2032_v28, %v5025_v32  ;;  %v2168_v32 = vstv %s5392_s29  ;;  %s5623_s29 = scalar_lea.hbm %s5673_s5, %s3059_s24 }
 0x4a9   : > { %v1891_v50 = vpop.permute.xlu0 %1890  ;;  %v5374_v15 = vpop.permute.xlu1 %2013  ;;  %v2304_v14 = vstv %s5399_s17  ;;  %v2169_v44 = vmul.f32 %v2168_v32, %v5156_v2  ;;  %s2745_s17 = scalar_lea.sflag [#allocation6], %s3534_s10 }
 0x4aa   : > { %v1896_v40 = vadd.f32 %v1891_v50, %v1854_v31  ;;  %v1961_v46 = vadd.f32 %v4960_v6, %v1927_v13 }
 0x4ac   : > { %v1933_v9 = vadd.f32 %v1931_v22, %v1896_v40  ;;  %v2310_v40 = vstv %s5414_s28 }
 0x4ad   : > { %v1984_v57 = vpop.permute.xlu0 %1983  ;;  %v5389_v10 = vpop.permute.xlu1 %2365 }
 0x4ae   : > { %v1989_v24 = vadd.f32 %v1984_v57, %v1947_v42  ;;  %v1975_v6 = vadd.f32 %v4964_v34, %v1933_v9  ;;  %v2298_v34 = vstv %s5386_s30  ;;  %v2412_v57 = vstv %s5422_s15  ;;  %s3252_s15 = sshll.u32 %s3340_s22, 4  ;;  %s3253_s15 = int_to_ptr.vmem [resolvable:$false] %s3252_s15 }
 0x4af   : > { %v2299_v36 = vmul.f32 %v2298_v34, %v5179_v1 }
 0x4b0   : > { %v2035_v35 = vadd.f32 %v2033_v27, %v1989_v24  ;;  %v5838_v27 = vld [vmem:[#allocation35_spill] sm:$0xff] }
 0x4b1   : > { %v1998_v7 = vpop.permute.xlu0 %1997  ;;  %v5411_v21 = vpop.permute.xlu1 %2379  ;;  %v1920_v24 = vmul.f32 %v1918_v47, %v5838_v27 }
 0x4b2   : > { %v2061_v12 = vadd.f32 %v4861_v0, %v2035_v35  ;;  %v2003_v20 = vadd.f32 %v1998_v7, %v1961_v46  ;;  %v2162_v0 = vstv %s5380_s7  ;;  %v2311_v46 = vmul.f32 %v2310_v40, %v5179_v1 }
 0x4b4   : > { %v2041_v3 = vadd.f32 %v2039_v43, %v2003_v20  ;;  %v2103_v51 = vadd.f32 %v5253_v11, %v2061_v12  ;;  %v5840_v43 = vld [vmem:[#allocation34_spill] sm:$0xff] }
 0x4b5   : > { %v2012_v60 = vpop.permute.xlu0 %2011  ;;  %v5434_v13 = vpop.permute.xlu1 %2393 }
 0x4b6   : > { %v2075_v58 = vadd.f32 %v4871_v61, %v2041_v3  ;;  %v2017_v25 = vadd.f32 %v2012_v60, %v1975_v6  ;;  %v2159_v23 = vadd.f32 %v2157_v63, %v2103_v51  ;;  %v2163_v61 = vmul.f32 %v2162_v0, %v5156_v2  ;;  %v5841_v6 = vld [vmem:[#allocation54_spill] sm:$0xff]  ;;  %v5842_v63 = vld [vmem:[#allocation37_spill] sm:$0xff] }
 0x4b7   : > { %v1813_v2 = vadd.f32 %v4976_v55, %v5335_v26  ;;  %v2413_v47 = vmul.f32 %v2412_v57, %v5841_v6  ;;  %v1926_v60 = vmul.f32 %v1924_v48, %v5838_v27  ;;  %v1932_v48 = vmul.f32 %v1930_v53, %v5838_v27  ;;  %v5848_v53 = vld [vmem:[#allocation38_spill] sm:$0xff] }
 0x4b8   : > { %v2047_v11 = vadd.f32 %v2045_v8, %v2017_v25  ;;  %v2192_v62 = vadd.f32 %v4966_v29, %v2159_v23  ;;  %v2117_v59 = vadd.f32 %v5259_v49, %v2075_v58  ;;  %v2418_v23 = vstv %s5440_s11 }
 0x4b9   : > { %v2243_v54 = vpop.permute.xlu0 %2242 }
 0x4ba   : > { %v2089_v33 = vadd.f32 %v4881_v16, %v2047_v11  ;;  %v2248_v45 = vadd.f32 %v2243_v54, %v2192_v62  ;;  %v2165_v30 = vadd.f32 %v2163_v61, %v2117_v59  ;;  %v2305_v16 = vmul.f32 %v2304_v14, %v5179_v1  ;;  %v5844_v54 = vld [vmem:[#allocation43_spill] sm:$0xff] }
 0x4bb   : > { %v2536_v11 = vstv %s5442_s16 }
 0x4bc   : > { %v2301_v29 = vadd.f32 %v2299_v36, %v2248_v45  ;;  %v2213_v49 = vadd.f32 %v4971_v56, %v2165_v30  ;;  %v2131_v52 = vadd.f32 %v5265_v17, %v2089_v33  ;;  %v1855_v33 = vadd.f32 %v5844_v54, %v5363_v18  ;;  %v5845_v30 = vld [vmem:[#allocation44_spill] sm:$0xff] }
 0x4bd   : > { %v2257_v31 = vpop.permute.xlu0 %2256  ;;  %v5857_v54 = vld [vmem:[#allocation60_spill] sm:$0xff] }
 0x4be   : > { %v2262_v50 = vadd.f32 %v2257_v31, %v2213_v49  ;;  %v2171_v22 = vadd.f32 %v2169_v44, %v2131_v52  ;;  %v2327_v20 = vadd.f32 %v5840_v43, %v2301_v29  ;;  %v2424_v49 = vstv %s5448_s0  ;;  %v5846_v52 = vld [vmem:[#allocation29_spill] sm:$0xff]  ;;  %v5847_v31 = vld [vmem:[#allocation32_spill] sm:$0xff]  ;;  %s5882_s0 = smul.u32 48, %s3534_s10 }
 0x4c0   : > { %v2307_v56 = vadd.f32 %v2305_v16, %v2262_v50  ;;  %v2234_v17 = vadd.f32 %v4978_v41, %v2171_v22  ;;  %v5839_v41 = vld [vmem:[#allocation48_spill] sm:$0xff]  ;;  %s294_s11 = scalar_lea.vmem [#allocation14], %s5882_s0 }
 0x4c1   : > { %v1865_v9 = vpop.permute.xlu1 %1864  ;;  %v2271_v42 = vpop.permute.xlu0 %2270  ;;  %v1834_v12 = vadd.f32 %v5839_v41, %v5345_v5  ;;  %v5843_v5 = vld [vmem:[#allocation47_spill] sm:$0xff]  ;;  %v2542_v41 = vstv %s5462_s13  ;;  %s2758_s16 = sshll.u32 %s294_s11, 4  ;;  %s3254_s13 = scalar_lea.vmem %s3253_s15, 1536  ;;  %s5617_s16 = int_to_ptr.vmem [resolvable:$true] %s2758_s16 }
 0x4c2   : > { %v1869_v35 = vadd.f32 %v1865_v9, %v1813_v2  ;;  %v2276_v7 = vadd.f32 %v2271_v42, %v2234_v17  ;;  %v2034_v25 = vmul.f32 %v2032_v28, %v5843_v5  ;;  %v2040_v36 = vmul.f32 %v2038_v4, %v5843_v5  ;;  %v5850_v42 = vld [vmem:[#allocation58_spill] sm:$0xff]  ;;  %s3248_s28 = scalar_lea.vmem %s5617_s16, 768  ;;  %p3255_p3 = scmp.lt.s32.totalorder %s5617_s16, %s3253_s15 }
 0x4c3   : > { %v2341_v28 = vadd.f32 %v5845_v30, %v2307_v56  ;;  %v2419_v4 = vmul.f32 %v2418_v23, %v5841_v6  ;;  %v5849_v56 = vld [vmem:[#allocation49_spill] sm:$0xff]  ;;  %p3249_p7 = scmp.ne.s32.totalorder %s5617_s16, %s3248_s28  ;;  %p3256_p13 = scmp.lt.s32.totalorder %s3254_s13, %s3248_s28 }
 0x4c4   : > { %v1922_v55 = vadd.f32 %v1920_v24, %v1869_v35  ;;  %v2313_v26 = vadd.f32 %v2311_v46, %v2276_v7  ;;  %v2537_v2 = vmul.f32 %v2536_v11, %v5849_v56  ;;  %v5851_v24 = vld [vmem:[#allocation20_spill] sm:$0xff]  ;;  %v2425_v7 = vmul.f32 %v2424_v49, %v5841_v6 }
 0x4c5   : > { %v1879_v3 = vpop.permute.xlu1 %1878  ;;  %v2364_v51 = vpop.permute.xlu0 %2363  ;;  %p3250_p12 = pnand %p3249_p7, %p3485_p6  ;;  %p3257_p10 = por %p3256_p13, %p3255_p3 }
 0x4c6   : > { %v1948_v1 = vadd.f32 %v5842_v63, %v1922_v55  ;;  %v1883_v58 = vadd.f32 %v1879_v3, %v1834_v12  ;;  %v2369_v8 = vadd.f32 %v2364_v51, %v2327_v20  ;;  %v2355_v22 = vadd.f32 %v5848_v53, %v2313_v26  ;;  %v5852_v12 = vld [vmem:[#allocation36_spill] sm:$0xff]  ;;  %v5854_v51 = vld [vmem:[#allocation46_spill] sm:$0xff] }
 0x4c7   : > { %v2158_v63 = vmul.f32 %v2156_v39, %v5854_v51  ;;  %v2543_v39 = vmul.f32 %v2542_v41, %v5849_v56  ;;  %v2170_v53 = vmul.f32 %v2168_v32, %v5854_v51  ;;  %v2663_v32 = vstv %s5530_s6  ;;  %p3251_p9 = pneg %p3250_p12 }
 0x4c8   : > { %v1990_v62 = vadd.f32 %v5340_v37, %v1948_v1  ;;  %v1928_v59 = vadd.f32 %v1926_v60, %v1883_v58  ;;  %v2415_v61 = vadd.f32 %v2413_v47, %v2369_v8  ;;  %v5853_v47 = vld [vmem:[#allocation23_spill] sm:$0xff]  ;;  %v5855_v1 = vld [vmem:[#allocation52_spill] sm:$0xff]  ;;  %v2046_v58 = vmul.f32 %v2044_v38, %v5843_v5 }
 0x4c9   : > { %v1893_v45 = vpop.permute.xlu1 %1892  ;;  %v2378_v29 = vpop.permute.xlu0 %2377  ;;  %v5859_v5 = vld [vmem:[#allocation55_spill] sm:$0xff]  ;;  %p3258_p0 = pnand %p3257_p10, %p3251_p9 }
 0x4ca   : > { %v2036_v37 = vadd.f32 %v2034_v25, %v1990_v62  ;;  %v1962_v44 = vadd.f32 %v5846_v52, %v1928_v59  ;;  %v2441_v18 = vadd.f32 %v5847_v31, %v2415_v61  ;;  %v1897_v16 = vadd.f32 %v1893_v45, %v1855_v33  ;;  %v5856_v25 = vld [vmem:[#allocation22_spill] sm:$0xff]  ;;  %v5858_v45 = vld [vmem:[#allocation25_spill] sm:$0xff]  ;;  %v5861_v31 = vld [vmem:[#allocation31_spill] sm:$0xff] }
 0x4cb   : > { %v2383_v50 = vadd.f32 %v2378_v29, %v2341_v28  ;;  %v2548_v59 = vstv %s5484_s27  ;;  %v5860_v29 = vld [vmem:[#allocation62_spill] sm:$0xff] }
 0x4cc   : > { %v2004_v17 = vadd.f32 %v5358_v19, %v1962_v44  ;;  %v1934_v9 = vadd.f32 %v1932_v48, %v1897_v16  ;;  %v2483_v27 = vadd.f32 %v5850_v42, %v2441_v18  ;;  %v2062_v35 = vadd.f32 %v5851_v24, %v2036_v37  ;;  %v5864_v24 = vld [vmem:[#allocation33_spill] sm:$0xff] }
 0x4cd   : > { %v2421_v46 = vadd.f32 %v2419_v4, %v2383_v50  ;;  %v2392_v55 = vpop.permute.xlu0 %2391  ;;  %v2549_v52 = vmul.f32 %v2548_v59, %v5849_v56  ;;  %v5862_v50 = vld [vmem:[#allocation50_spill] sm:$0xff]  ;;  %v2659_v42 = vstv %s5514_s26 }
 0x4ce   : > { %v2042_v26 = vadd.f32 %v2040_v36, %v2004_v17  ;;  %v1976_v43 = vadd.f32 %v5852_v12, %v1934_v9  ;;  %v2397_v20 = vadd.f32 %v2392_v55, %v2355_v22  ;;  %v2539_v3 = vadd.f32 %v2537_v2, %v2483_v27  ;;  %v5863_v22 = vld [vmem:[#allocation56_spill] sm:$0xff]  ;;  %v5537_v17 = vpop.permute.xlu1 %2589 }
 0x4cf   : > { %v2455_v19 = vadd.f32 %v5853_v47, %v2421_v46  ;;  %v2104_v60 = vadd.f32 %v5855_v1, %v2062_v35 }
 0x4d0   : > { %v2018_v6 = vadd.f32 %v5374_v15, %v1976_v43  ;;  %v2427_v8 = vadd.f32 %v2425_v7, %v2397_v20  ;;  %v2076_v62 = vadd.f32 %v5856_v25, %v2042_v26  ;;  %v2164_v15 = vmul.f32 %v2162_v0, %v5854_v51 }
 0x4d1   : > { %v2609_v61 = vpop.permute.xlu0 %2608  ;;  %v2497_v33 = vadd.f32 %v5857_v54, %v2455_v19  ;;  %v2160_v36 = vadd.f32 %v2158_v63, %v2104_v60  ;;  %v2572_v0 = vadd.f32 %v5862_v50, %v2539_v3  ;;  %v5865_v3 = vld [vmem:[#allocation41_spill] sm:$0xff]  ;;  %v2667_v51 = vstv %s5540_s23  ;;  %v5866_v60 = vld [vmem:[#allocation39_spill] sm:$0xff] }
 0x4d2   : > { %v2048_v48 = vadd.f32 %v2046_v58, %v2018_v6  ;;  %v2469_v38 = vadd.f32 %v5858_v45, %v2427_v8  ;;  %v2118_v30 = vadd.f32 %v5859_v5, %v2076_v62  ;;  %v5545_v55 = vpop.permute.xlu1 %2610  ;;  %v2300_v58 = vmul.f32 %v2298_v34, %v5866_v60  ;;  %v5870_v5 = vld [vmem:[#allocation42_spill] sm:$0xff] }
 0x4d3   : > { %v2545_v28 = vadd.f32 %v2543_v39, %v2497_v33  ;;  %v2193_v47 = vadd.f32 %v5865_v3, %v2160_v36 }
 0x4d4   : > { %v2511_v37 = vadd.f32 %v5860_v29, %v2469_v38  ;;  %v2166_v44 = vadd.f32 %v2164_v15, %v2118_v30  ;;  %v2090_v18 = vadd.f32 %v5861_v31, %v2048_v48  ;;  %v5869_v48 = vld [vmem:[#allocation26_spill] sm:$0xff]  ;;  %v2306_v38 = vmul.f32 %v2304_v14, %v5866_v60 }
 0x4d5   : > { %v2623_v16 = vpop.permute.xlu0 %2622  ;;  %v2593_v35 = vadd.f32 %v5864_v24, %v2545_v28  ;;  %v2414_v30 = vmul.f32 %v2412_v57, %v5870_v5  ;;  %v2312_v31 = vmul.f32 %v2310_v40, %v5866_v60 }
 0x4d6   : > { %v2551_v4 = vadd.f32 %v2549_v52, %v2511_v37  ;;  %v2132_v2 = vadd.f32 %v5863_v22, %v2090_v18  ;;  %v2628_v56 = vadd.f32 %v2623_v16, %v2572_v0  ;;  %v5871_v37 = vld [vmem:[#allocation28_spill] sm:$0xff] }
 0x4d8   : > { %v2172_v9 = vadd.f32 %v2170_v53, %v2132_v2  ;;  %v2660_v46 = vadd.f32 %v2659_v42, %v2628_v56  ;;  %v2614_v12 = vadd.f32 %v2609_v61, %v2551_v4  ;;  %v5868_v61 = vld [vmem:[#allocation45_spill] sm:$0xff]  ;;  %v5872_v4 = vld [vmem:[#allocation27_spill] sm:$0xff] }
 0x4d9   : > { %v2637_v27 = vpop.permute.xlu0 %2636  ;;  %v2214_v54 = vadd.f32 %v5868_v61, %v2166_v44  ;;  %v5873_v2 = vld [vmem:[#allocation21_spill] sm:$0xff] }
 0x4da   : > { %v2642_v7 = vadd.f32 %v2637_v27, %v2593_v35  ;;  %v2670_v19 = vmax.f32 %v2660_v46, 0.0  ;;  %v2235_v52 = vadd.f32 %v5871_v37, %v2172_v9  ;;  %v5874_v27 = vld [vmem:[#allocation51_spill] sm:$0xff]  ;;  %v5875_v35 = vld [vmem:[#allocation57_spill] sm:$0xff] }
 0x4db   : > { %v5881_v61 = vld [vmem:[#allocation61_spill] sm:$0xff] }
 0x4dc   : > { %v2664_v43 = vadd.f32 %v2663_v32, %v2642_v7  ;;  %v5876_v7 = vld [vmem:[#allocation40_spill] sm:$0xff] }
 0x4dd   : > { %v2651_v26 = vpop.permute.xlu0 %2650 }
 0x4de   : > { %v2656_v20 = vadd.f32 %v2651_v26, %v2614_v12  ;;  %v2694_v33 = vmax.f32 %v2664_v43, 0.0  ;;  %v2538_v26 = vmul.f32 %v2536_v11, %v5876_v7  ;;  %v5877_v43 = vld [vmem:[#allocation30_spill] sm:$0xff] }
 0x4e0   : > { %v2668_v25 = vadd.f32 %v2667_v51, %v2656_v20 }
 0x4e1   : > { %v2245_v63 = vpop.permute.xlu1 %2244  ;;  %v2677_v1 = vpop.permute.xlu0 %2676 }
 0x4e2   : > { %v2249_v6 = vadd.f32 %v2245_v63, %v2193_v47  ;;  %v2682_v8 = vadd.f32 %v2677_v1, %v2670_v19  ;;  %v2719_v44 = vmax.f32 %v2668_v25, 0.0  ;;  %v5878_v19 = vld [vmem:[#allocation53_spill] sm:$0xff]  ;;  %v5879_v1 = vld [vmem:[#allocation59_spill] sm:$0xff] }
 0x4e4   : > { %v2302_v62 = vadd.f32 %v2300_v58, %v2249_v6  ;;  %2686 = vrot.lane.b32.xlu0 %v2682_v8, %s5867_s14  ;;  %v2544_v58 = vmul.f32 %v2542_v41, %v5876_v7  ;;  %v5880_v8 = vld [vmem:[#allocation24_spill] sm:$0xff] }
 0x4e5   : > { %v2259_v39 = vpop.permute.xlu1 %2258  ;;  %v2701_v36 = vpop.permute.xlu0 %2700 }
 0x4e6   : > { %v2328_v45 = vadd.f32 %v5869_v48, %v2302_v62  ;;  %v2263_v34 = vadd.f32 %v2259_v39, %v2214_v54  ;;  %v2706_v15 = vadd.f32 %v2701_v36, %v2694_v33  ;;  %v2550_v33 = vmul.f32 %v2548_v59, %v5876_v7 }
 0x4e8   : > { %v2370_v28 = vadd.f32 %v5389_v10, %v2328_v45  ;;  %v2308_v29 = vadd.f32 %v2306_v38, %v2263_v34  ;;  %2710 = vrot.lane.b32.xlu0 %v2706_v15, %s5867_s14  ;;  %v2420_v10 = vmul.f32 %v2418_v23, %v5870_v5  ;;  %v2426_v23 = vmul.f32 %v2424_v49, %v5870_v5 }
 0x4e9   : > { %v2273_v18 = vpop.permute.xlu1 %2272  ;;  %v2726_v14 = vpop.permute.xlu0 %2725 }
 0x4ea   : > { %v2416_v16 = vadd.f32 %v2414_v30, %v2370_v28  ;;  %v2342_v50 = vadd.f32 %v5872_v4, %v2308_v29  ;;  %v2277_v0 = vadd.f32 %v2273_v18, %v2235_v52  ;;  %v2731_v57 = vadd.f32 %v2726_v14, %v2719_v44 }
 0x4ec   : > { %v2384_v53 = vadd.f32 %v5411_v21, %v2342_v50  ;;  %v2314_v22 = vadd.f32 %v2312_v31, %v2277_v0  ;;  %2735 = vrot.lane.b32.xlu0 %v2731_v57, %s5867_s14  ;;  %v2442_v40 = vadd.f32 %v5873_v2, %v2416_v16 }
 0x4ed   : > { %v2679_v56 = vpop.permute.xlu1 %2678 }
 0x4ee   : > { %v2422_v9 = vadd.f32 %v2420_v10, %v2384_v53  ;;  %v2356_v24 = vadd.f32 %v5874_v27, %v2314_v22  ;;  %v2484_v46 = vadd.f32 %v5875_v35, %v2442_v40 }
 0x4f0   : > { %v2398_v21 = vadd.f32 %v5434_v13, %v2356_v24  ;;  %v2540_v12 = vadd.f32 %v2538_v26, %v2484_v46  ;;  %v2456_v20 = vadd.f32 %v5877_v43, %v2422_v9 }
 0x4f1   : > { %v2625_v3 = vpop.permute.xlu1 %2624 }
 0x4f2   : > { %v2428_v47 = vadd.f32 %v2426_v23, %v2398_v21  ;;  %v2573_v63 = vadd.f32 %v5878_v19, %v2540_v12  ;;  %v2498_v60 = vadd.f32 %v5879_v1, %v2456_v20 }
 0x4f4   : > { %v2629_v11 = vadd.f32 %v2625_v3, %v2573_v63  ;;  %v2546_v6 = vadd.f32 %v2544_v58, %v2498_v60  ;;  %v2470_v49 = vadd.f32 %v5880_v8, %v2428_v47 }
 0x4f5   : > { %v2639_v25 = vpop.permute.xlu1 %2638 }
 0x4f6   : > { %v2661_v13 = vadd.f32 %v2659_v42, %v2629_v11  ;;  %v2594_v62 = vadd.f32 %v5537_v17, %v2546_v6  ;;  %v2512_v54 = vadd.f32 %v5881_v61, %v2470_v49 }
 0x4f8   : > { %v2671_v39 = vmax.f32 %v2661_v13, 0.0  ;;  %v2643_v36 = vadd.f32 %v2639_v25, %v2594_v62  ;;  %v2552_v48 = vadd.f32 %v2550_v33, %v2512_v54 }
 0x4f9   : > { %v2653_v45 = vpop.permute.xlu1 %2652 }
 0x4fa   : > { %v2683_v41 = vadd.f32 %v2679_v56, %v2671_v39  ;;  %v2665_v38 = vadd.f32 %v2663_v32, %v2643_v36  ;;  %v2615_v34 = vadd.f32 %v5545_v55, %v2552_v48 }
 0x4fc   : > { %v2657_v15 = vadd.f32 %v2653_v45, %v2615_v34  ;;  %2688 = vrot.lane.b32.xlu1 %v2683_v41, %s5867_s14  ;;  %v2695_v42 = vmax.f32 %v2665_v38, 0.0 }
 0x4fd   : > { %v2703_v17 = vpop.permute.xlu1 %2702 }
 0x4fe   : > { %v2669_v5 = vadd.f32 %v2667_v51, %v2657_v15  ;;  %v2707_v30 = vadd.f32 %v2703_v17, %v2695_v42 }
 0x500   : > { %2712 = vrot.lane.b32.xlu1 %v2707_v30, %s5867_s14  ;;  %v2720_v59 = vmax.f32 %v2669_v5, 0.0 }
 0x501   : > { %v2728_v28 = vpop.permute.xlu1 %2727 }
 0x502   : > { %v2732_v29 = vadd.f32 %v2728_v28, %v2720_v59 }
 0x504   : > { %2737 = vrot.lane.b32.xlu1 %v2732_v29, %s5867_s14 }
 0x556   : > { %v2687_v37 = vpop.permute.xlu0 %2686 }
 0x557   : > { %2692 = vst.msk [vmem:[%s294_s11] sm:$0xff] %vm328_vm3, %v2687_v37 }
 0x55a   : > { %v2711_v55 = vpop.permute.xlu0 %2710 }
 0x55b   : > { %3049 = vst.msk [vmem:[%s294_s11 + $0x10] sm:$0xff] %vm328_vm3, %v2711_v55 }
 0x55e   : > { %v2736_v32 = vpop.permute.xlu0 %2735 }
 0x55f   : > { %3051 = vst.msk [vmem:[%s294_s11 + $0x20] sm:$0xff] %vm328_vm3, %v2736_v32 }
 0x56e   : > { %v2689_v51 = vpop.permute.xlu1 %2688 }
 0x56f   : > { %2693 = vst.msk [vmem:[%s294_s11 + $0x8] sm:$0xff] %vm328_vm3, %v2689_v51 }
 0x572   : > { %v2713_v52 = vpop.permute.xlu1 %2712 }
 0x573   : > { %3050 = vst.msk [vmem:[%s294_s11 + $0x18] sm:$0xff] %vm328_vm3, %v2713_v52 }
 0x576   : > { %v2738_v44 = vpop.permute.xlu1 %2737 }
 0x577   : > { %3052 = vst.msk [vmem:[%s294_s11 + $0x28] sm:$0xff] %vm328_vm3, %v2738_v44 }
 0x578   : > { %3261 = shalt.err (!%p3258_p0)
}
 0x579   : > { %s3262_s27 = scalar_lea.hbm %s5623_s29, 768  ;;  %s3266_s23 = scalar_lea.hbm %s5673_s5, 1536 }
 0x57a   : > { %p3263_p11 = scmp.ne.s32.totalorder %s5623_s29, %s3262_s27  ;;  %p3267_p5 = scmp.lt.u32.totalorder %s5623_s29, %s5673_s5 }
 0x57b   : > { %p3268_p4 = scmp.lt.u32.totalorder %s3266_s23, %s3262_s27  ;;  %p3270_p7 = scmp.lt.u32.totalorder %s3262_s27, %s5623_s29 }
 0x57c   : > { %p3264_p1 = pnand %p3263_p11, %p3485_p6 }
 0x57d   : > { %p3269_p8 = por %p3268_p4, %p3267_p5 }
 0x57e   : > { %p3265_p2 = pneg %p3264_p1 }
 0x57f   : > { %p3271_p12 = por %p3270_p7, %p3269_p8 }
 0x581   : > { %p3272_p9 = pnand %p3271_p12, %p3265_p2 }
 0x583   : > { %3275 = shalt.err (!%p3272_p9)
}
 0x584   : > { %s3341_s11 = smov 128   ;;  %s3342_s24 = smov 8  }
 0x585   : > { %3078 = dma.vmem_to_hbm [thread:$0]  (%p3485_p6), %s5617_s16, 768, %s5623_s29, %s2745_s17, %s3341_s11, %s3341_s11, %s3342_s24  }
 0x586 PF: > { %s2773_s7 = sand.u32 1, %s3314_s18   ;;  %p5883_p3 = scmp.ne.s32.totalorder %s5709_s25, 0 }
 0x587   : > { %p5884_p13 = scmp.ge.s32.totalorder %s3326_s21, 2  ;;  %s2774_s30 = scalar_lea.sflag [#allocation6], %s2773_s7 }
 0x589   : > { %p3098_p10 = pnand %p5884_p13, %p5883_p3 }
 0x58b   : > { %3309 = dma.done.wait (!%p3098_p10), %s2774_s30, 768  }
 0x58c   : > { %3311 = vsyncadd (!%p3098_p10), %s2774_s30, 4294966528  ;;  %p21_p0 = scmp.ge.s32.totalorder %s3472_s9, 4   ;;  %s5885_s18 = smov %s3318_s19 }
 0x58d   : > { %s5886_s19 = smov %s3322_s20  ;;  %s5887_s20 = smov %s3481_s8 }
 0x58e   : > { %s5888_s21 = smov %s3472_s9  ;;  %23 = sbr.rel (!%p21_p0) target bundleno = 10 (0xa), region = 108 }
 0x595   :  { %2779 = vsyncpa [#allocation5], 1 }
 0x596   :  { %2781 = vsyncpa [#allocation5 + $0x1], 1 }
 0x597   :  { %2782 = vsyncpa [#allocation6], 1 }
 0x598   :  { %2784 = vsyncpa [#allocation6 + $0x1], 1 }
 0x599   :  { %2785 = vsyncpa [#allocation7], 1 }
 0x59a   :  { %2787 = vsyncpa [#allocation7 + $0x1], 1 }
 0x59b   :  { %2788 = vsyncpa [#allocation10], 1 }
 0x59c   :  { %2789 = vsyncpa [#allocation13], 1 }

</bundles_post_ra>
